<compile_context>
chip_gen: v7x
topology: tpu7x:2x2x1
jax: 0.10.0
libtpu: 0.0.40
codegen_flags: <defaults>
</compile_context>

<pallas_src>
import functools

import jax
import jax.numpy as jnp
from jax import lax
from jax.experimental import pallas as pl
from jax.experimental.pallas import tpu as pltpu


# ----------------------------------------------------------------------------
# Fused Pallas kernel: all LSTM layers (both directions) + FC head
# ----------------------------------------------------------------------------
def _fused_bilstm_kernel(x_ref, *refs, num_layers, hidden, batch, seq):
    """Refs (after x_ref):
         per layer l: wih_l (Din, 8H), whh_l (2H, 8H) block-diagonal, b_l (1, 8H)
         fc_w (2H, H), fc_b (1, H)
         out_ref (T*B, H)
         scratch: gx (T*B, 8H), hf (T*B, H), hb (T*B, H)
       Row layout of the sequence buffers: row = t*B + b (time-major flattened).
       Gate column order per direction follows PyTorch: [i | f | g | o].
    """
    H, B, T = hidden, batch, seq
    H4 = 4 * H

    layer_refs = []
    idx = 0
    for _ in range(num_layers):
        layer_refs.append((refs[idx], refs[idx + 1], refs[idx + 2]))
        idx += 3
    fcw_ref, fcb_ref = refs[idx], refs[idx + 1]
    out_ref = refs[idx + 2]
    gx_scr, hf_scr, hb_scr = refs[idx + 3], refs[idx + 4], refs[idx + 5]

    layer_in = x_ref[...].astype(jnp.float32)          # (T*B, Din)

    for wih_ref, whh_ref, b_ref in layer_refs:
        # --- hoisted, time-parallel input projection for BOTH directions ----
        # (T*B, Din) @ (Din, 8H) + bias  -> gate pre-activations from x.
        gx_scr[...] = (
            jnp.dot(layer_in, wih_ref[...], preferred_element_type=jnp.float32)
            + b_ref[...]
        )

        # --- serial recurrence: only h @ W_hh remains on the critical path --
        def step(t, carry, whh_ref=whh_ref):
            h_both, c_both = carry                      # (B, 2H) = [h_f | h_b]
            row_f = t * B                               # forward reads time t
            row_b = (T - 1 - t) * B                     # backward reads time T-1-t
            gx_f = gx_scr[pl.ds(row_f, B), :H4]         # (B, 4H)
            gx_b = gx_scr[pl.ds(row_b, B), H4:]         # (B, 4H)

            # one fused (B, 2H) @ (2H, 8H) MXU push for both directions
            gh = jnp.dot(h_both, whh_ref[...],
                         preferred_element_type=jnp.float32)          # (B, 8H)
            gates = jnp.concatenate([gx_f, gx_b], axis=-1) + gh       # (B, 8H)

            # full-width transcendentals (EUP), then static lane slices
            sig = jax.nn.sigmoid(gates)
            th = jnp.tanh(gates)

            def piece(src, d, k):   # d: 0=fwd, 1=bwd ; k: gate index i,f,g,o
                off = d * H4 + k * H
                return src[:, off:off + H]

            i_g = jnp.concatenate([piece(sig, 0, 0), piece(sig, 1, 0)], -1)
            f_g = jnp.concatenate([piece(sig, 0, 1), piece(sig, 1, 1)], -1)
            g_g = jnp.concatenate([piece(th, 0, 2), piece(th, 1, 2)], -1)
            o_g = jnp.concatenate([piece(sig, 0, 3), piece(sig, 1, 3)], -1)

            c_new = f_g * c_both + i_g * g_g            # (B, 2H)
            h_new = o_g * jnp.tanh(c_new)               # (B, 2H)

            hf_scr[pl.ds(row_f, B), :] = h_new[:, :H]   # forward output at t
            hb_scr[pl.ds(row_b, B), :] = h_new[:, H:]   # backward output at T-1-t
            return h_new, c_new

        zeros = jnp.zeros((B, 2 * H), jnp.float32)
        lax.fori_loop(0, T, step, (zeros, zeros), unroll=True)

        # next layer's input: [h_fwd | h_bwd], still resident in VMEM
        layer_in = jnp.concatenate([hf_scr[...], hb_scr[...]], axis=-1)  # (T*B, 2H)

    # --- FC epilogue on the VMEM-resident last-layer hidden sequence --------
    out_ref[...] = (
        jnp.dot(layer_in, fcw_ref[...], preferred_element_type=jnp.float32)
        + fcb_ref[...]
    ).astype(out_ref.dtype)


# ----------------------------------------------------------------------------
# Wrapper
# ----------------------------------------------------------------------------
def bilstm_forward(x, packed):
    """x: (B, T, input_size) batch-first -> (B, T, hidden_size)."""
    B, T, D = x.shape
    H = packed["hidden_size"]
    L = len(packed["layers"])
    N = T * B

    # batch-first -> time-major flattened rows (row = t*B + b); two tiny XLA ops
    x2d = jnp.transpose(x, (1, 0, 2)).reshape(N, D)

    inputs = [x2d]
    in_specs = [pl.BlockSpec((N, D), lambda i: (0, 0))]
    for (wih, whh, bb) in packed["layers"]:
        inputs += [wih, whh, bb]
        in_specs += [
            pl.BlockSpec(wih.shape, lambda i: (0, 0)),
            pl.BlockSpec(whh.shape, lambda i: (0, 0)),
            pl.BlockSpec(bb.shape, lambda i: (0, 0)),
        ]
    inputs += [packed["fc_w_t"], packed["fc_b2d"]]
    in_specs += [
        pl.BlockSpec(packed["fc_w_t"].shape, lambda i: (0, 0)),
        pl.BlockSpec(packed["fc_b2d"].shape, lambda i: (0, 0)),
    ]

    kernel = functools.partial(
        _fused_bilstm_kernel, num_layers=L, hidden=H, batch=B, seq=T)

    out2d = pl.pallas_call(
        kernel,
        out_shape=jax.ShapeDtypeStruct((N, H), jnp.float32),
        grid_spec=pltpu.PrefetchScalarGridSpec(
            num_scalar_prefetch=0,
            grid=(1,),
            in_specs=in_specs,
            out_specs=pl.BlockSpec((N, H), lambda i: (0, 0)),
            scratch_shapes=[
                pltpu.VMEM((N, 8 * H), jnp.float32),   # hoisted input gates (both dirs)
                pltpu.VMEM((N, H), jnp.float32),       # forward hidden sequence
                pltpu.VMEM((N, H), jnp.float32),       # backward hidden sequence
            ],
        ),
        compiler_params=pltpu.CompilerParams(dimension_semantics=("arbitrary",)),
    )(*inputs)

    return jnp.transpose(out2d.reshape(T, B, H), (1, 0, 2))


# ----------------------------------------------------------------------------
# Deterministic parameter init (mirrors BiLSTM.__init__/initialize_parameters)
# ----------------------------------------------------------------------------
def init_params(key, input_size, hidden_size, num_layers):
    H = hidden_size
    raw = []

    def xavier_normal(k, shape):
        fan_out, fan_in = shape
        std = (2.0 / (fan_in + fan_out)) ** 0.5
        return std * jax.random.normal(k, shape, dtype=jnp.float32)

    bound = 1.0 / (H ** 0.5)
    for layer in range(num_layers):
        d_in = input_size if layer == 0 else 2 * H
        dirs = []
        for _direction in range(2):
            key, k1, k2, k3, k4 = jax.random.split(key, 5)
            w_ih = xavier_normal(k1, (4 * H, d_in))
            w_hh = xavier_normal(k2, (4 * H, H))
            b_ih = jax.random.uniform(k3, (4 * H,), jnp.float32, -bound, bound)
            b_hh = jax.random.uniform(k4, (4 * H,), jnp.float32, -bound, bound)
            # initialize_parameters(): bias[len//4 : len//2] = 2.5 (forget gate)
            b_ih = b_ih.at[H:2 * H].set(2.5)
            b_hh = b_hh.at[H:2 * H].set(2.5)
            dirs.append((w_ih, w_hh, b_ih, b_hh))
        raw.append(tuple(dirs))

    key, k5, k6 = jax.random.split(key, 3)
    fc_bound = 1.0 / ((2 * H) ** 0.5)
    fc_w = jax.random.uniform(k5, (H, 2 * H), jnp.float32, -fc_bound, fc_bound)
    fc_b = jax.random.uniform(k6, (H,), jnp.float32, -fc_bound, fc_bound)
    return {"hidden_size": H, "raw_lstm": raw, "fc_w": fc_w, "fc_b": fc_b}


def pack_params(params):
    """Pack per-direction weights into the fused kernel layout."""
    H = params["hidden_size"]
    layers = []
    for (fwd, bwd) in params["raw_lstm"]:
        w_ih_f, w_hh_f, b_ih_f, b_hh_f = fwd
        w_ih_b, w_hh_b, b_ih_b, b_hh_b = bwd
        # (Din, 8H): forward gate columns 0:4H, backward 4H:8H (PyTorch i,f,g,o order)
        wih_both = jnp.concatenate([w_ih_f.T, w_ih_b.T], axis=1)
        # block-diagonal (2H, 8H): h_f feeds forward gates, h_b feeds backward gates
        whh_both = jnp.zeros((2 * H, 8 * H), jnp.float32)
        whh_both = whh_both.at[:H, :4 * H].set(w_hh_f.T)
        whh_both = whh_both.at[H:, 4 * H:].set(w_hh_b.T)
        b_both = jnp.concatenate([b_ih_f + b_hh_f, b_ih_b + b_hh_b]).reshape(1, 8 * H)
        layers.append((wih_both, whh_both, b_both))
    return {
        "hidden_size": H,
        "layers": layers,
        "fc_w_t": params["fc_w"].T,              # (2H, H)
        "fc_b2d": params["fc_b"].reshape(1, H),  # (1, H)
    }


# ----------------------------------------------------------------------------
# Pure-JAX reference (for correctness check)
# ----------------------------------------------------------------------------
def _lstm_dir_ref(x_tm, w_ih, w_hh, b_ih, b_hh):
    _, B, _ = x_tm.shape
    H = w_hh.shape[1]
    wih_t, whh_t, b = w_ih.T, w_hh.T, b_ih + b_hh

    def step(carry, x_t):
        h, c = carry
        gates = x_t @ wih_t + h @ whh_t + b
        i, f, g, o = jnp.split(gates, 4, axis=-1)
        i, f, o = jax.nn.sigmoid(i), jax.nn.sigmoid(f), jax.nn.sigmoid(o)
        g = jnp.tanh(g)
        c = f * c + i * g
        h = o * jnp.tanh(c)
        return (h, c), h

    init = (jnp.zeros((B, H), jnp.float32), jnp.zeros((B, H), jnp.float32))
    _, hs = jax.lax.scan(step, init, x_tm)
    return hs


def bilstm_ref(x, params):
    B, T, _ = x.shape
    H = params["hidden_size"]
    layer_in = jnp.transpose(x, (1, 0, 2))
    for (fwd, bwd) in params["raw_lstm"]:
        out_f = _lstm_dir_ref(layer_in, *fwd)
        out_b = _lstm_dir_ref(layer_in[::-1], *bwd)[::-1]
        layer_in = jnp.concatenate([out_f, out_b], axis=-1)
    out = jnp.transpose(layer_in, (1, 0, 2))
    return (out.reshape(B * T, 2 * H) @ params["fc_w"].T
            + params["fc_b"]).reshape(B, T, H)


# ----------------------------------------------------------------------------
if __name__ == "__main__":
    B, T, INPUT_SIZE = 2, 8, 16
    HIDDEN_SIZE, NUM_LAYERS = 32, 2  # args.hidden_size, args.num_layers

    key = jax.random.PRNGKey(0)
    key, kx = jax.random.split(key)
    x = jax.random.normal(kx, (B, T, INPUT_SIZE), dtype=jnp.float32)

    params = init_params(key, INPUT_SIZE, HIDDEN_SIZE, NUM_LAYERS)
    packed = pack_params(params)

    out = jax.block_until_ready(bilstm_forward(x, packed))
    assert out.shape == (B, T, HIDDEN_SIZE), out.shape

    ref = jax.block_until_ready(bilstm_ref(x, params))
    assert jnp.allclose(out, ref, atol=1e-5, rtol=1e-5), (
        float(jnp.max(jnp.abs(out - ref))))

    print("KERNEL_OK")
</pallas_src>

<mosaic_0001>
module attributes {stable_mosaic.version = 11 : i64} {
  func.func @_fused_bilstm_kernel(%arg0: i32, %arg1: memref<16x16xf32, #tpu.memory_space<vmem>>, %arg2: memref<16x256xf32, #tpu.memory_space<vmem>>, %arg3: memref<64x256xf32, #tpu.memory_space<vmem>>, %arg4: memref<1x256xf32, #tpu.memory_space<vmem>>, %arg5: memref<64x256xf32, #tpu.memory_space<vmem>>, %arg6: memref<64x256xf32, #tpu.memory_space<vmem>>, %arg7: memref<1x256xf32, #tpu.memory_space<vmem>>, %arg8: memref<64x32xf32, #tpu.memory_space<vmem>>, %arg9: memref<1x32xf32, #tpu.memory_space<vmem>>, %arg10: memref<16x32xf32, #tpu.memory_space<vmem>>, %arg11: memref<16x256xf32, #tpu.memory_space<vmem>>, %arg12: memref<16x32xf32, #tpu.memory_space<vmem>>, %arg13: memref<16x32xf32, #tpu.memory_space<vmem>>) attributes {dimension_semantics = [#tpu.dimension_semantics<arbitrary>], iteration_bounds = array<i64: 1>, scalar_prefetch = 0 : i64, scratch_operands = 3 : i64, tpu.core_type = #tpu.core_type<tc>, window_params = [{pipeline_mode = #tpu.pipeline_mode<synchronous>, transform_indices = @transform_0, window_bounds = array<i64: 16, 16>}, {pipeline_mode = #tpu.pipeline_mode<synchronous>, transform_indices = @transform_1, window_bounds = array<i64: 16, 256>}, {pipeline_mode = #tpu.pipeline_mode<synchronous>, transform_indices = @transform_2, window_bounds = array<i64: 64, 256>}, {pipeline_mode = #tpu.pipeline_mode<synchronous>, transform_indices = @transform_3, window_bounds = array<i64: 1, 256>}, {pipeline_mode = #tpu.pipeline_mode<synchronous>, transform_indices = @transform_4, window_bounds = array<i64: 64, 256>}, {pipeline_mode = #tpu.pipeline_mode<synchronous>, transform_indices = @transform_5, window_bounds = array<i64: 64, 256>}, {pipeline_mode = #tpu.pipeline_mode<synchronous>, transform_indices = @transform_6, window_bounds = array<i64: 1, 256>}, {pipeline_mode = #tpu.pipeline_mode<synchronous>, transform_indices = @transform_7, window_bounds = array<i64: 64, 32>}, {pipeline_mode = #tpu.pipeline_mode<synchronous>, transform_indices = @transform_8, window_bounds = array<i64: 1, 32>}, {pipeline_mode = #tpu.pipeline_mode<synchronous>, transform_indices = @transform_9, window_bounds = array<i64: 16, 32>}]} {
    %c0 = arith.constant 0 : index
    %c0_0 = arith.constant 0 : index
    %0 = vector.load %arg1[%c0, %c0_0] : memref<16x16xf32, #tpu.memory_space<vmem>>, vector<16x16xf32>
    %c0_1 = arith.constant 0 : index
    %c0_2 = arith.constant 0 : index
    %1 = vector.load %arg2[%c0_1, %c0_2] : memref<16x256xf32, #tpu.memory_space<vmem>>, vector<16x256xf32>
    %cst = arith.constant dense<0.000000e+00> : vector<16x256xf32>
    %2 = tpu.matmul %0, %1, %cst {dimension_numbers = #tpu.dot_dimension_numbers<[1], [0], [0], [1], [0, 0, 1, 1], [], []>} : vector<16x16xf32>, vector<16x256xf32>, vector<16x256xf32> -> vector<16x256xf32>
    %c0_3 = arith.constant 0 : index
    %c0_4 = arith.constant 0 : index
    %3 = vector.load %arg4[%c0_3, %c0_4] : memref<1x256xf32, #tpu.memory_space<vmem>>, vector<1x256xf32>
    %4 = vector.broadcast %3 : vector<1x256xf32> to vector<16x256xf32>
    %5 = arith.addf %2, %4 : vector<16x256xf32>
    %c0_5 = arith.constant 0 : index
    %c0_6 = arith.constant 0 : index
    %6 = vector.load %arg11[%c0_5, %c0_6] : memref<16x256xf32, #tpu.memory_space<vmem>>, vector<16x256xf32>
    tpu.vector_store %arg11[%c0_5, %c0_6], %5 {strides = array<i32>} : memref<16x256xf32, #tpu.memory_space<vmem>>, vector<16x256xf32>,
    %cst_7 = arith.constant 0.000000e+00 : f32
    %7 = vector.broadcast %cst_7 : f32 to vector<2x64xf32>
    %c0_i32 = arith.constant 0 : i32
    %c2_i32 = arith.constant 2 : i32
    %8 = arith.muli %c0_i32, %c2_i32 : i32
    %c7_i32 = arith.constant 7 : i32
    %9 = arith.subi %c7_i32, %c0_i32 : i32
    %c2_i32_8 = arith.constant 2 : i32
    %10 = arith.muli %9, %c2_i32_8 : i32
    %11 = arith.index_cast %8 : i32 to index
    %c0_9 = arith.constant 0 : index
    %12 = vector.load %arg11[%11, %c0_9] : memref<16x256xf32, #tpu.memory_space<vmem>>, vector<2x128xf32>
    %13 = arith.index_cast %10 : i32 to index
    %c128 = arith.constant 128 : index
    %14 = vector.load %arg11[%13, %c128] : memref<16x256xf32, #tpu.memory_space<vmem>>, vector<2x128xf32>
    %c0_10 = arith.constant 0 : index
    %c0_11 = arith.constant 0 : index
    %15 = vector.load %arg3[%c0_10, %c0_11] : memref<64x256xf32, #tpu.memory_space<vmem>>, vector<64x256xf32>
    %cst_12 = arith.constant dense<0.000000e+00> : vector<2x256xf32>
    %16 = tpu.matmul %7, %15, %cst_12 {dimension_numbers = #tpu.dot_dimension_numbers<[1], [0], [0], [1], [0, 0, 1, 1], [], []>} : vector<2x64xf32>, vector<64x256xf32>, vector<2x256xf32> -> vector<2x256xf32>
    %17 = tpu.concatenate %12, %14 in 1 : vector<2x128xf32>, vector<2x128xf32> -> vector<2x256xf32>
    %18 = arith.addf %17, %16 : vector<2x256xf32>
    %19 = arith.negf %18 : vector<2x256xf32>
    %20 = math.exp %19 : vector<2x256xf32>
    %cst_13 = arith.constant 1.000000e+00 : f32
    %21 = vector.broadcast %cst_13 : f32 to vector<2x256xf32>
    %22 = arith.addf %21, %20 : vector<2x256xf32>
    %23 = arith.divf %21, %22 : vector<2x256xf32>
    %24 = math.tanh %18 : vector<2x256xf32>
    %25 = vector.extract_strided_slice %23 {offsets = [0, 0], sizes = [2, 32], strides = [1, 1]} : vector<2x256xf32> to vector<2x32xf32>
    %26 = vector.extract_strided_slice %23 {offsets = [0, 128], sizes = [2, 32], strides = [1, 1]} : vector<2x256xf32> to vector<2x32xf32>
    %27 = tpu.concatenate %25, %26 in 1 : vector<2x32xf32>, vector<2x32xf32> -> vector<2x64xf32>
    %28 = vector.extract_strided_slice %23 {offsets = [0, 32], sizes = [2, 32], strides = [1, 1]} : vector<2x256xf32> to vector<2x32xf32>
    %29 = vector.extract_strided_slice %23 {offsets = [0, 160], sizes = [2, 32], strides = [1, 1]} : vector<2x256xf32> to vector<2x32xf32>
    %30 = tpu.concatenate %28, %29 in 1 : vector<2x32xf32>, vector<2x32xf32> -> vector<2x64xf32>
    %31 = vector.extract_strided_slice %24 {offsets = [0, 64], sizes = [2, 32], strides = [1, 1]} : vector<2x256xf32> to vector<2x32xf32>
    %32 = vector.extract_strided_slice %24 {offsets = [0, 192], sizes = [2, 32], strides = [1, 1]} : vector<2x256xf32> to vector<2x32xf32>
    %33 = tpu.concatenate %31, %32 in 1 : vector<2x32xf32>, vector<2x32xf32> -> vector<2x64xf32>
    %34 = vector.extract_strided_slice %23 {offsets = [0, 96], sizes = [2, 32], strides = [1, 1]} : vector<2x256xf32> to vector<2x32xf32>
    %35 = vector.extract_strided_slice %23 {offsets = [0, 224], sizes = [2, 32], strides = [1, 1]} : vector<2x256xf32> to vector<2x32xf32>
    %36 = tpu.concatenate %34, %35 in 1 : vector<2x32xf32>, vector<2x32xf32> -> vector<2x64xf32>
    %37 = arith.mulf %30, %7 : vector<2x64xf32>
    %38 = arith.mulf %27, %33 : vector<2x64xf32>
    %39 = arith.addf %37, %38 : vector<2x64xf32>
    %40 = math.tanh %39 : vector<2x64xf32>
    %41 = arith.mulf %36, %40 : vector<2x64xf32>
    %42 = vector.extract_strided_slice %41 {offsets = [0, 0], sizes = [2, 32], strides = [1, 1]} : vector<2x64xf32> to vector<2x32xf32>
    %43 = arith.index_cast %8 : i32 to index
    %c0_14 = arith.constant 0 : index
    %44 = vector.load %arg12[%43, %c0_14] : memref<16x32xf32, #tpu.memory_space<vmem>>, vector<2x32xf32>
    tpu.vector_store %arg12[%43, %c0_14], %42 {strides = array<i32>} : memref<16x32xf32, #tpu.memory_space<vmem>>, vector<2x32xf32>,
    %45 = vector.extract_strided_slice %41 {offsets = [0, 32], sizes = [2, 32], strides = [1, 1]} : vector<2x64xf32> to vector<2x32xf32>
    %46 = arith.index_cast %10 : i32 to index
    %c0_15 = arith.constant 0 : index
    %47 = vector.load %arg13[%46, %c0_15] : memref<16x32xf32, #tpu.memory_space<vmem>>, vector<2x32xf32>
    tpu.vector_store %arg13[%46, %c0_15], %45 {strides = array<i32>} : memref<16x32xf32, #tpu.memory_space<vmem>>, vector<2x32xf32>,
    %c1_i32 = arith.constant 1 : i32
    %c2_i32_16 = arith.constant 2 : i32
    %48 = arith.muli %c1_i32, %c2_i32_16 : i32
    %c7_i32_17 = arith.constant 7 : i32
    %49 = arith.subi %c7_i32_17, %c1_i32 : i32
    %c2_i32_18 = arith.constant 2 : i32
    %50 = arith.muli %49, %c2_i32_18 : i32
    %51 = arith.index_cast %48 : i32 to index
    %c0_19 = arith.constant 0 : index
    %52 = vector.load %arg11[%51, %c0_19] : memref<16x256xf32, #tpu.memory_space<vmem>>, vector<2x128xf32>
    %53 = arith.index_cast %50 : i32 to index
    %c128_20 = arith.constant 128 : index
    %54 = vector.load %arg11[%53, %c128_20] : memref<16x256xf32, #tpu.memory_space<vmem>>, vector<2x128xf32>
    %c0_21 = arith.constant 0 : index
    %c0_22 = arith.constant 0 : index
    %55 = vector.load %arg3[%c0_21, %c0_22] : memref<64x256xf32, #tpu.memory_space<vmem>>, vector<64x256xf32>
    %cst_23 = arith.constant dense<0.000000e+00> : vector<2x256xf32>
    %56 = tpu.matmul %41, %55, %cst_23 {dimension_numbers = #tpu.dot_dimension_numbers<[1], [0], [0], [1], [0, 0, 1, 1], [], []>} : vector<2x64xf32>, vector<64x256xf32>, vector<2x256xf32> -> vector<2x256xf32>
    %57 = tpu.concatenate %52, %54 in 1 : vector<2x128xf32>, vector<2x128xf32> -> vector<2x256xf32>
    %58 = arith.addf %57, %56 : vector<2x256xf32>
    %59 = arith.negf %58 : vector<2x256xf32>
    %60 = math.exp %59 : vector<2x256xf32>
    %cst_24 = arith.constant 1.000000e+00 : f32
    %61 = vector.broadcast %cst_24 : f32 to vector<2x256xf32>
    %62 = arith.addf %61, %60 : vector<2x256xf32>
    %63 = arith.divf %61, %62 : vector<2x256xf32>
    %64 = math.tanh %58 : vector<2x256xf32>
    %65 = vector.extract_strided_slice %63 {offsets = [0, 0], sizes = [2, 32], strides = [1, 1]} : vector<2x256xf32> to vector<2x32xf32>
    %66 = vector.extract_strided_slice %63 {offsets = [0, 128], sizes = [2, 32], strides = [1, 1]} : vector<2x256xf32> to vector<2x32xf32>
    %67 = tpu.concatenate %65, %66 in 1 : vector<2x32xf32>, vector<2x32xf32> -> vector<2x64xf32>
    %68 = vector.extract_strided_slice %63 {offsets = [0, 32], sizes = [2, 32], strides = [1, 1]} : vector<2x256xf32> to vector<2x32xf32>
    %69 = vector.extract_strided_slice %63 {offsets = [0, 160], sizes = [2, 32], strides = [1, 1]} : vector<2x256xf32> to vector<2x32xf32>
    %70 = tpu.concatenate %68, %69 in 1 : vector<2x32xf32>, vector<2x32xf32> -> vector<2x64xf32>
    %71 = vector.extract_strided_slice %64 {offsets = [0, 64], sizes = [2, 32], strides = [1, 1]} : vector<2x256xf32> to vector<2x32xf32>
    %72 = vector.extract_strided_slice %64 {offsets = [0, 192], sizes = [2, 32], strides = [1, 1]} : vector<2x256xf32> to vector<2x32xf32>
    %73 = tpu.concatenate %71, %72 in 1 : vector<2x32xf32>, vector<2x32xf32> -> vector<2x64xf32>
    %74 = vector.extract_strided_slice %63 {offsets = [0, 96], sizes = [2, 32], strides = [1, 1]} : vector<2x256xf32> to vector<2x32xf32>
    %75 = vector.extract_strided_slice %63 {offsets = [0, 224], sizes = [2, 32], strides = [1, 1]} : vector<2x256xf32> to vector<2x32xf32>
    %76 = tpu.concatenate %74, %75 in 1 : vector<2x32xf32>, vector<2x32xf32> -> vector<2x64xf32>
    %77 = arith.mulf %70, %39 : vector<2x64xf32>
    %78 = arith.mulf %67, %73 : vector<2x64xf32>
    %79 = arith.addf %77, %78 : vector<2x64xf32>
    %80 = math.tanh %79 : vector<2x64xf32>
    %81 = arith.mulf %76, %80 : vector<2x64xf32>
    %82 = vector.extract_strided_slice %81 {offsets = [0, 0], sizes = [2, 32], strides = [1, 1]} : vector<2x64xf32> to vector<2x32xf32>
    %83 = arith.index_cast %48 : i32 to index
    %c0_25 = arith.constant 0 : index
    %84 = vector.load %arg12[%83, %c0_25] : memref<16x32xf32, #tpu.memory_space<vmem>>, vector<2x32xf32>
    tpu.vector_store %arg12[%83, %c0_25], %82 {strides = array<i32>} : memref<16x32xf32, #tpu.memory_space<vmem>>, vector<2x32xf32>,
    %85 = vector.extract_strided_slice %81 {offsets = [0, 32], sizes = [2, 32], strides = [1, 1]} : vector<2x64xf32> to vector<2x32xf32>
    %86 = arith.index_cast %50 : i32 to index
    %c0_26 = arith.constant 0 : index
    %87 = vector.load %arg13[%86, %c0_26] : memref<16x32xf32, #tpu.memory_space<vmem>>, vector<2x32xf32>
    tpu.vector_store %arg13[%86, %c0_26], %85 {strides = array<i32>} : memref<16x32xf32, #tpu.memory_space<vmem>>, vector<2x32xf32>,
    %c2_i32_27 = arith.constant 2 : i32
    %c2_i32_28 = arith.constant 2 : i32
    %88 = arith.muli %c2_i32_27, %c2_i32_28 : i32
    %c7_i32_29 = arith.constant 7 : i32
    %89 = arith.subi %c7_i32_29, %c2_i32_27 : i32
    %c2_i32_30 = arith.constant 2 : i32
    %90 = arith.muli %89, %c2_i32_30 : i32
    %91 = arith.index_cast %88 : i32 to index
    %c0_31 = arith.constant 0 : index
    %92 = vector.load %arg11[%91, %c0_31] : memref<16x256xf32, #tpu.memory_space<vmem>>, vector<2x128xf32>
    %93 = arith.index_cast %90 : i32 to index
    %c128_32 = arith.constant 128 : index
    %94 = vector.load %arg11[%93, %c128_32] : memref<16x256xf32, #tpu.memory_space<vmem>>, vector<2x128xf32>
    %c0_33 = arith.constant 0 : index
    %c0_34 = arith.constant 0 : index
    %95 = vector.load %arg3[%c0_33, %c0_34] : memref<64x256xf32, #tpu.memory_space<vmem>>, vector<64x256xf32>
    %cst_35 = arith.constant dense<0.000000e+00> : vector<2x256xf32>
    %96 = tpu.matmul %81, %95, %cst_35 {dimension_numbers = #tpu.dot_dimension_numbers<[1], [0], [0], [1], [0, 0, 1, 1], [], []>} : vector<2x64xf32>, vector<64x256xf32>, vector<2x256xf32> -> vector<2x256xf32>
    %97 = tpu.concatenate %92, %94 in 1 : vector<2x128xf32>, vector<2x128xf32> -> vector<2x256xf32>
    %98 = arith.addf %97, %96 : vector<2x256xf32>
    %99 = arith.negf %98 : vector<2x256xf32>
    %100 = math.exp %99 : vector<2x256xf32>
    %cst_36 = arith.constant 1.000000e+00 : f32
    %101 = vector.broadcast %cst_36 : f32 to vector<2x256xf32>
    %102 = arith.addf %101, %100 : vector<2x256xf32>
    %103 = arith.divf %101, %102 : vector<2x256xf32>
    %104 = math.tanh %98 : vector<2x256xf32>
    %105 = vector.extract_strided_slice %103 {offsets = [0, 0], sizes = [2, 32], strides = [1, 1]} : vector<2x256xf32> to vector<2x32xf32>
    %106 = vector.extract_strided_slice %103 {offsets = [0, 128], sizes = [2, 32], strides = [1, 1]} : vector<2x256xf32> to vector<2x32xf32>
    %107 = tpu.concatenate %105, %106 in 1 : vector<2x32xf32>, vector<2x32xf32> -> vector<2x64xf32>
    %108 = vector.extract_strided_slice %103 {offsets = [0, 32], sizes = [2, 32], strides = [1, 1]} : vector<2x256xf32> to vector<2x32xf32>
    %109 = vector.extract_strided_slice %103 {offsets = [0, 160], sizes = [2, 32], strides = [1, 1]} : vector<2x256xf32> to vector<2x32xf32>
    %110 = tpu.concatenate %108, %109 in 1 : vector<2x32xf32>, vector<2x32xf32> -> vector<2x64xf32>
    %111 = vector.extract_strided_slice %104 {offsets = [0, 64], sizes = [2, 32], strides = [1, 1]} : vector<2x256xf32> to vector<2x32xf32>
    %112 = vector.extract_strided_slice %104 {offsets = [0, 192], sizes = [2, 32], strides = [1, 1]} : vector<2x256xf32> to vector<2x32xf32>
    %113 = tpu.concatenate %111, %112 in 1 : vector<2x32xf32>, vector<2x32xf32> -> vector<2x64xf32>
    %114 = vector.extract_strided_slice %103 {offsets = [0, 96], sizes = [2, 32], strides = [1, 1]} : vector<2x256xf32> to vector<2x32xf32>
    %115 = vector.extract_strided_slice %103 {offsets = [0, 224], sizes = [2, 32], strides = [1, 1]} : vector<2x256xf32> to vector<2x32xf32>
    %116 = tpu.concatenate %114, %115 in 1 : vector<2x32xf32>, vector<2x32xf32> -> vector<2x64xf32>
    %117 = arith.mulf %110, %79 : vector<2x64xf32>
    %118 = arith.mulf %107, %113 : vector<2x64xf32>
    %119 = arith.addf %117, %118 : vector<2x64xf32>
    %120 = math.tanh %119 : vector<2x64xf32>
    %121 = arith.mulf %116, %120 : vector<2x64xf32>
    %122 = vector.extract_strided_slice %121 {offsets = [0, 0], sizes = [2, 32], strides = [1, 1]} : vector<2x64xf32> to vector<2x32xf32>
    %123 = arith.index_cast %88 : i32 to index
    %c0_37 = arith.constant 0 : index
    %124 = vector.load %arg12[%123, %c0_37] : memref<16x32xf32, #tpu.memory_space<vmem>>, vector<2x32xf32>
    tpu.vector_store %arg12[%123, %c0_37], %122 {strides = array<i32>} : memref<16x32xf32, #tpu.memory_space<vmem>>, vector<2x32xf32>,
    %125 = vector.extract_strided_slice %121 {offsets = [0, 32], sizes = [2, 32], strides = [1, 1]} : vector<2x64xf32> to vector<2x32xf32>
    %126 = arith.index_cast %90 : i32 to index
    %c0_38 = arith.constant 0 : index
    %127 = vector.load %arg13[%126, %c0_38] : memref<16x32xf32, #tpu.memory_space<vmem>>, vector<2x32xf32>
    tpu.vector_store %arg13[%126, %c0_38], %125 {strides = array<i32>} : memref<16x32xf32, #tpu.memory_space<vmem>>, vector<2x32xf32>,
    %c3_i32 = arith.constant 3 : i32
    %c2_i32_39 = arith.constant 2 : i32
    %128 = arith.muli %c3_i32, %c2_i32_39 : i32
    %c7_i32_40 = arith.constant 7 : i32
    %129 = arith.subi %c7_i32_40, %c3_i32 : i32
    %c2_i32_41 = arith.constant 2 : i32
    %130 = arith.muli %129, %c2_i32_41 : i32
    %131 = arith.index_cast %128 : i32 to index
    %c0_42 = arith.constant 0 : index
    %132 = vector.load %arg11[%131, %c0_42] : memref<16x256xf32, #tpu.memory_space<vmem>>, vector<2x128xf32>
    %133 = arith.index_cast %130 : i32 to index
    %c128_43 = arith.constant 128 : index
    %134 = vector.load %arg11[%133, %c128_43] : memref<16x256xf32, #tpu.memory_space<vmem>>, vector<2x128xf32>
    %c0_44 = arith.constant 0 : index
    %c0_45 = arith.constant 0 : index
    %135 = vector.load %arg3[%c0_44, %c0_45] : memref<64x256xf32, #tpu.memory_space<vmem>>, vector<64x256xf32>
    %cst_46 = arith.constant dense<0.000000e+00> : vector<2x256xf32>
    %136 = tpu.matmul %121, %135, %cst_46 {dimension_numbers = #tpu.dot_dimension_numbers<[1], [0], [0], [1], [0, 0, 1, 1], [], []>} : vector<2x64xf32>, vector<64x256xf32>, vector<2x256xf32> -> vector<2x256xf32>
    %137 = tpu.concatenate %132, %134 in 1 : vector<2x128xf32>, vector<2x128xf32> -> vector<2x256xf32>
    %138 = arith.addf %137, %136 : vector<2x256xf32>
    %139 = arith.negf %138 : vector<2x256xf32>
    %140 = math.exp %139 : vector<2x256xf32>
    %cst_47 = arith.constant 1.000000e+00 : f32
    %141 = vector.broadcast %cst_47 : f32 to vector<2x256xf32>
    %142 = arith.addf %141, %140 : vector<2x256xf32>
    %143 = arith.divf %141, %142 : vector<2x256xf32>
    %144 = math.tanh %138 : vector<2x256xf32>
    %145 = vector.extract_strided_slice %143 {offsets = [0, 0], sizes = [2, 32], strides = [1, 1]} : vector<2x256xf32> to vector<2x32xf32>
    %146 = vector.extract_strided_slice %143 {offsets = [0, 128], sizes = [2, 32], strides = [1, 1]} : vector<2x256xf32> to vector<2x32xf32>
    %147 = tpu.concatenate %145, %146 in 1 : vector<2x32xf32>, vector<2x32xf32> -> vector<2x64xf32>
    %148 = vector.extract_strided_slice %143 {offsets = [0, 32], sizes = [2, 32], strides = [1, 1]} : vector<2x256xf32> to vector<2x32xf32>
    %149 = vector.extract_strided_slice %143 {offsets = [0, 160], sizes = [2, 32], strides = [1, 1]} : vector<2x256xf32> to vector<2x32xf32>
    %150 = tpu.concatenate %148, %149 in 1 : vector<2x32xf32>, vector<2x32xf32> -> vector<2x64xf32>
    %151 = vector.extract_strided_slice %144 {offsets = [0, 64], sizes = [2, 32], strides = [1, 1]} : vector<2x256xf32> to vector<2x32xf32>
    %152 = vector.extract_strided_slice %144 {offsets = [0, 192], sizes = [2, 32], strides = [1, 1]} : vector<2x256xf32> to vector<2x32xf32>
    %153 = tpu.concatenate %151, %152 in 1 : vector<2x32xf32>, vector<2x32xf32> -> vector<2x64xf32>
    %154 = vector.extract_strided_slice %143 {offsets = [0, 96], sizes = [2, 32], strides = [1, 1]} : vector<2x256xf32> to vector<2x32xf32>
    %155 = vector.extract_strided_slice %143 {offsets = [0, 224], sizes = [2, 32], strides = [1, 1]} : vector<2x256xf32> to vector<2x32xf32>
    %156 = tpu.concatenate %154, %155 in 1 : vector<2x32xf32>, vector<2x32xf32> -> vector<2x64xf32>
    %157 = arith.mulf %150, %119 : vector<2x64xf32>
    %158 = arith.mulf %147, %153 : vector<2x64xf32>
    %159 = arith.addf %157, %158 : vector<2x64xf32>
    %160 = math.tanh %159 : vector<2x64xf32>
    %161 = arith.mulf %156, %160 : vector<2x64xf32>
    %162 = vector.extract_strided_slice %161 {offsets = [0, 0], sizes = [2, 32], strides = [1, 1]} : vector<2x64xf32> to vector<2x32xf32>
    %163 = arith.index_cast %128 : i32 to index
    %c0_48 = arith.constant 0 : index
    %164 = vector.load %arg12[%163, %c0_48] : memref<16x32xf32, #tpu.memory_space<vmem>>, vector<2x32xf32>
    tpu.vector_store %arg12[%163, %c0_48], %162 {strides = array<i32>} : memref<16x32xf32, #tpu.memory_space<vmem>>, vector<2x32xf32>,
    %165 = vector.extract_strided_slice %161 {offsets = [0, 32], sizes = [2, 32], strides = [1, 1]} : vector<2x64xf32> to vector<2x32xf32>
    %166 = arith.index_cast %130 : i32 to index
    %c0_49 = arith.constant 0 : index
    %167 = vector.load %arg13[%166, %c0_49] : memref<16x32xf32, #tpu.memory_space<vmem>>, vector<2x32xf32>
    tpu.vector_store %arg13[%166, %c0_49], %165 {strides = array<i32>} : memref<16x32xf32, #tpu.memory_space<vmem>>, vector<2x32xf32>,
    %c4_i32 = arith.constant 4 : i32
    %c2_i32_50 = arith.constant 2 : i32
    %168 = arith.muli %c4_i32, %c2_i32_50 : i32
    %c7_i32_51 = arith.constant 7 : i32
    %169 = arith.subi %c7_i32_51, %c4_i32 : i32
    %c2_i32_52 = arith.constant 2 : i32
    %170 = arith.muli %169, %c2_i32_52 : i32
    %171 = arith.index_cast %168 : i32 to index
    %c0_53 = arith.constant 0 : index
    %172 = vector.load %arg11[%171, %c0_53] : memref<16x256xf32, #tpu.memory_space<vmem>>, vector<2x128xf32>
    %173 = arith.index_cast %170 : i32 to index
    %c128_54 = arith.constant 128 : index
    %174 = vector.load %arg11[%173, %c128_54] : memref<16x256xf32, #tpu.memory_space<vmem>>, vector<2x128xf32>
    %c0_55 = arith.constant 0 : index
    %c0_56 = arith.constant 0 : index
    %175 = vector.load %arg3[%c0_55, %c0_56] : memref<64x256xf32, #tpu.memory_space<vmem>>, vector<64x256xf32>
    %cst_57 = arith.constant dense<0.000000e+00> : vector<2x256xf32>
    %176 = tpu.matmul %161, %175, %cst_57 {dimension_numbers = #tpu.dot_dimension_numbers<[1], [0], [0], [1], [0, 0, 1, 1], [], []>} : vector<2x64xf32>, vector<64x256xf32>, vector<2x256xf32> -> vector<2x256xf32>
    %177 = tpu.concatenate %172, %174 in 1 : vector<2x128xf32>, vector<2x128xf32> -> vector<2x256xf32>
    %178 = arith.addf %177, %176 : vector<2x256xf32>
    %179 = arith.negf %178 : vector<2x256xf32>
    %180 = math.exp %179 : vector<2x256xf32>
    %cst_58 = arith.constant 1.000000e+00 : f32
    %181 = vector.broadcast %cst_58 : f32 to vector<2x256xf32>
    %182 = arith.addf %181, %180 : vector<2x256xf32>
    %183 = arith.divf %181, %182 : vector<2x256xf32>
    %184 = math.tanh %178 : vector<2x256xf32>
    %185 = vector.extract_strided_slice %183 {offsets = [0, 0], sizes = [2, 32], strides = [1, 1]} : vector<2x256xf32> to vector<2x32xf32>
    %186 = vector.extract_strided_slice %183 {offsets = [0, 128], sizes = [2, 32], strides = [1, 1]} : vector<2x256xf32> to vector<2x32xf32>
    %187 = tpu.concatenate %185, %186 in 1 : vector<2x32xf32>, vector<2x32xf32> -> vector<2x64xf32>
    %188 = vector.extract_strided_slice %183 {offsets = [0, 32], sizes = [2, 32], strides = [1, 1]} : vector<2x256xf32> to vector<2x32xf32>
    %189 = vector.extract_strided_slice %183 {offsets = [0, 160], sizes = [2, 32], strides = [1, 1]} : vector<2x256xf32> to vector<2x32xf32>
    %190 = tpu.concatenate %188, %189 in 1 : vector<2x32xf32>, vector<2x32xf32> -> vector<2x64xf32>
    %191 = vector.extract_strided_slice %184 {offsets = [0, 64], sizes = [2, 32], strides = [1, 1]} : vector<2x256xf32> to vector<2x32xf32>
    %192 = vector.extract_strided_slice %184 {offsets = [0, 192], sizes = [2, 32], strides = [1, 1]} : vector<2x256xf32> to vector<2x32xf32>
    %193 = tpu.concatenate %191, %192 in 1 : vector<2x32xf32>, vector<2x32xf32> -> vector<2x64xf32>
    %194 = vector.extract_strided_slice %183 {offsets = [0, 96], sizes = [2, 32], strides = [1, 1]} : vector<2x256xf32> to vector<2x32xf32>
    %195 = vector.extract_strided_slice %183 {offsets = [0, 224], sizes = [2, 32], strides = [1, 1]} : vector<2x256xf32> to vector<2x32xf32>
    %196 = tpu.concatenate %194, %195 in 1 : vector<2x32xf32>, vector<2x32xf32> -> vector<2x64xf32>
    %197 = arith.mulf %190, %159 : vector<2x64xf32>
    %198 = arith.mulf %187, %193 : vector<2x64xf32>
    %199 = arith.addf %197, %198 : vector<2x64xf32>
    %200 = math.tanh %199 : vector<2x64xf32>
    %201 = arith.mulf %196, %200 : vector<2x64xf32>
    %202 = vector.extract_strided_slice %201 {offsets = [0, 0], sizes = [2, 32], strides = [1, 1]} : vector<2x64xf32> to vector<2x32xf32>
    %203 = arith.index_cast %168 : i32 to index
    %c0_59 = arith.constant 0 : index
    %204 = vector.load %arg12[%203, %c0_59] : memref<16x32xf32, #tpu.memory_space<vmem>>, vector<2x32xf32>
    tpu.vector_store %arg12[%203, %c0_59], %202 {strides = array<i32>} : memref<16x32xf32, #tpu.memory_space<vmem>>, vector<2x32xf32>,
    %205 = vector.extract_strided_slice %201 {offsets = [0, 32], sizes = [2, 32], strides = [1, 1]} : vector<2x64xf32> to vector<2x32xf32>
    %206 = arith.index_cast %170 : i32 to index
    %c0_60 = arith.constant 0 : index
    %207 = vector.load %arg13[%206, %c0_60] : memref<16x32xf32, #tpu.memory_space<vmem>>, vector<2x32xf32>
    tpu.vector_store %arg13[%206, %c0_60], %205 {strides = array<i32>} : memref<16x32xf32, #tpu.memory_space<vmem>>, vector<2x32xf32>,
    %c5_i32 = arith.constant 5 : i32
    %c2_i32_61 = arith.constant 2 : i32
    %208 = arith.muli %c5_i32, %c2_i32_61 : i32
    %c7_i32_62 = arith.constant 7 : i32
    %209 = arith.subi %c7_i32_62, %c5_i32 : i32
    %c2_i32_63 = arith.constant 2 : i32
    %210 = arith.muli %209, %c2_i32_63 : i32
    %211 = arith.index_cast %208 : i32 to index
    %c0_64 = arith.constant 0 : index
    %212 = vector.load %arg11[%211, %c0_64] : memref<16x256xf32, #tpu.memory_space<vmem>>, vector<2x128xf32>
    %213 = arith.index_cast %210 : i32 to index
    %c128_65 = arith.constant 128 : index
    %214 = vector.load %arg11[%213, %c128_65] : memref<16x256xf32, #tpu.memory_space<vmem>>, vector<2x128xf32>
    %c0_66 = arith.constant 0 : index
    %c0_67 = arith.constant 0 : index
    %215 = vector.load %arg3[%c0_66, %c0_67] : memref<64x256xf32, #tpu.memory_space<vmem>>, vector<64x256xf32>
    %cst_68 = arith.constant dense<0.000000e+00> : vector<2x256xf32>
    %216 = tpu.matmul %201, %215, %cst_68 {dimension_numbers = #tpu.dot_dimension_numbers<[1], [0], [0], [1], [0, 0, 1, 1], [], []>} : vector<2x64xf32>, vector<64x256xf32>, vector<2x256xf32> -> vector<2x256xf32>
    %217 = tpu.concatenate %212, %214 in 1 : vector<2x128xf32>, vector<2x128xf32> -> vector<2x256xf32>
    %218 = arith.addf %217, %216 : vector<2x256xf32>
    %219 = arith.negf %218 : vector<2x256xf32>
    %220 = math.exp %219 : vector<2x256xf32>
    %cst_69 = arith.constant 1.000000e+00 : f32
    %221 = vector.broadcast %cst_69 : f32 to vector<2x256xf32>
    %222 = arith.addf %221, %220 : vector<2x256xf32>
    %223 = arith.divf %221, %222 : vector<2x256xf32>
    %224 = math.tanh %218 : vector<2x256xf32>
    %225 = vector.extract_strided_slice %223 {offsets = [0, 0], sizes = [2, 32], strides = [1, 1]} : vector<2x256xf32> to vector<2x32xf32>
    %226 = vector.extract_strided_slice %223 {offsets = [0, 128], sizes = [2, 32], strides = [1, 1]} : vector<2x256xf32> to vector<2x32xf32>
    %227 = tpu.concatenate %225, %226 in 1 : vector<2x32xf32>, vector<2x32xf32> -> vector<2x64xf32>
    %228 = vector.extract_strided_slice %223 {offsets = [0, 32], sizes = [2, 32], strides = [1, 1]} : vector<2x256xf32> to vector<2x32xf32>
    %229 = vector.extract_strided_slice %223 {offsets = [0, 160], sizes = [2, 32], strides = [1, 1]} : vector<2x256xf32> to vector<2x32xf32>
    %230 = tpu.concatenate %228, %229 in 1 : vector<2x32xf32>, vector<2x32xf32> -> vector<2x64xf32>
    %231 = vector.extract_strided_slice %224 {offsets = [0, 64], sizes = [2, 32], strides = [1, 1]} : vector<2x256xf32> to vector<2x32xf32>
    %232 = vector.extract_strided_slice %224 {offsets = [0, 192], sizes = [2, 32], strides = [1, 1]} : vector<2x256xf32> to vector<2x32xf32>
    %233 = tpu.concatenate %231, %232 in 1 : vector<2x32xf32>, vector<2x32xf32> -> vector<2x64xf32>
    %234 = vector.extract_strided_slice %223 {offsets = [0, 96], sizes = [2, 32], strides = [1, 1]} : vector<2x256xf32> to vector<2x32xf32>
    %235 = vector.extract_strided_slice %223 {offsets = [0, 224], sizes = [2, 32], strides = [1, 1]} : vector<2x256xf32> to vector<2x32xf32>
    %236 = tpu.concatenate %234, %235 in 1 : vector<2x32xf32>, vector<2x32xf32> -> vector<2x64xf32>
    %237 = arith.mulf %230, %199 : vector<2x64xf32>
    %238 = arith.mulf %227, %233 : vector<2x64xf32>
    %239 = arith.addf %237, %238 : vector<2x64xf32>
    %240 = math.tanh %239 : vector<2x64xf32>
    %241 = arith.mulf %236, %240 : vector<2x64xf32>
    %242 = vector.extract_strided_slice %241 {offsets = [0, 0], sizes = [2, 32], strides = [1, 1]} : vector<2x64xf32> to vector<2x32xf32>
    %243 = arith.index_cast %208 : i32 to index
    %c0_70 = arith.constant 0 : index
    %244 = vector.load %arg12[%243, %c0_70] : memref<16x32xf32, #tpu.memory_space<vmem>>, vector<2x32xf32>
    tpu.vector_store %arg12[%243, %c0_70], %242 {strides = array<i32>} : memref<16x32xf32, #tpu.memory_space<vmem>>, vector<2x32xf32>,
    %245 = vector.extract_strided_slice %241 {offsets = [0, 32], sizes = [2, 32], strides = [1, 1]} : vector<2x64xf32> to vector<2x32xf32>
    %246 = arith.index_cast %210 : i32 to index
    %c0_71 = arith.constant 0 : index
    %247 = vector.load %arg13[%246, %c0_71] : memref<16x32xf32, #tpu.memory_space<vmem>>, vector<2x32xf32>
    tpu.vector_store %arg13[%246, %c0_71], %245 {strides = array<i32>} : memref<16x32xf32, #tpu.memory_space<vmem>>, vector<2x32xf32>,
    %c6_i32 = arith.constant 6 : i32
    %c2_i32_72 = arith.constant 2 : i32
    %248 = arith.muli %c6_i32, %c2_i32_72 : i32
    %c7_i32_73 = arith.constant 7 : i32
    %249 = arith.subi %c7_i32_73, %c6_i32 : i32
    %c2_i32_74 = arith.constant 2 : i32
    %250 = arith.muli %249, %c2_i32_74 : i32
    %251 = arith.index_cast %248 : i32 to index
    %c0_75 = arith.constant 0 : index
    %252 = vector.load %arg11[%251, %c0_75] : memref<16x256xf32, #tpu.memory_space<vmem>>, vector<2x128xf32>
    %253 = arith.index_cast %250 : i32 to index
    %c128_76 = arith.constant 128 : index
    %254 = vector.load %arg11[%253, %c128_76] : memref<16x256xf32, #tpu.memory_space<vmem>>, vector<2x128xf32>
    %c0_77 = arith.constant 0 : index
    %c0_78 = arith.constant 0 : index
    %255 = vector.load %arg3[%c0_77, %c0_78] : memref<64x256xf32, #tpu.memory_space<vmem>>, vector<64x256xf32>
    %cst_79 = arith.constant dense<0.000000e+00> : vector<2x256xf32>
    %256 = tpu.matmul %241, %255, %cst_79 {dimension_numbers = #tpu.dot_dimension_numbers<[1], [0], [0], [1], [0, 0, 1, 1], [], []>} : vector<2x64xf32>, vector<64x256xf32>, vector<2x256xf32> -> vector<2x256xf32>
    %257 = tpu.concatenate %252, %254 in 1 : vector<2x128xf32>, vector<2x128xf32> -> vector<2x256xf32>
    %258 = arith.addf %257, %256 : vector<2x256xf32>
    %259 = arith.negf %258 : vector<2x256xf32>
    %260 = math.exp %259 : vector<2x256xf32>
    %cst_80 = arith.constant 1.000000e+00 : f32
    %261 = vector.broadcast %cst_80 : f32 to vector<2x256xf32>
    %262 = arith.addf %261, %260 : vector<2x256xf32>
    %263 = arith.divf %261, %262 : vector<2x256xf32>
    %264 = math.tanh %258 : vector<2x256xf32>
    %265 = vector.extract_strided_slice %263 {offsets = [0, 0], sizes = [2, 32], strides = [1, 1]} : vector<2x256xf32> to vector<2x32xf32>
    %266 = vector.extract_strided_slice %263 {offsets = [0, 128], sizes = [2, 32], strides = [1, 1]} : vector<2x256xf32> to vector<2x32xf32>
    %267 = tpu.concatenate %265, %266 in 1 : vector<2x32xf32>, vector<2x32xf32> -> vector<2x64xf32>
    %268 = vector.extract_strided_slice %263 {offsets = [0, 32], sizes = [2, 32], strides = [1, 1]} : vector<2x256xf32> to vector<2x32xf32>
    %269 = vector.extract_strided_slice %263 {offsets = [0, 160], sizes = [2, 32], strides = [1, 1]} : vector<2x256xf32> to vector<2x32xf32>
    %270 = tpu.concatenate %268, %269 in 1 : vector<2x32xf32>, vector<2x32xf32> -> vector<2x64xf32>
    %271 = vector.extract_strided_slice %264 {offsets = [0, 64], sizes = [2, 32], strides = [1, 1]} : vector<2x256xf32> to vector<2x32xf32>
    %272 = vector.extract_strided_slice %264 {offsets = [0, 192], sizes = [2, 32], strides = [1, 1]} : vector<2x256xf32> to vector<2x32xf32>
    %273 = tpu.concatenate %271, %272 in 1 : vector<2x32xf32>, vector<2x32xf32> -> vector<2x64xf32>
    %274 = vector.extract_strided_slice %263 {offsets = [0, 96], sizes = [2, 32], strides = [1, 1]} : vector<2x256xf32> to vector<2x32xf32>
    %275 = vector.extract_strided_slice %263 {offsets = [0, 224], sizes = [2, 32], strides = [1, 1]} : vector<2x256xf32> to vector<2x32xf32>
    %276 = tpu.concatenate %274, %275 in 1 : vector<2x32xf32>, vector<2x32xf32> -> vector<2x64xf32>
    %277 = arith.mulf %270, %239 : vector<2x64xf32>
    %278 = arith.mulf %267, %273 : vector<2x64xf32>
    %279 = arith.addf %277, %278 : vector<2x64xf32>
    %280 = math.tanh %279 : vector<2x64xf32>
    %281 = arith.mulf %276, %280 : vector<2x64xf32>
    %282 = vector.extract_strided_slice %281 {offsets = [0, 0], sizes = [2, 32], strides = [1, 1]} : vector<2x64xf32> to vector<2x32xf32>
    %283 = arith.index_cast %248 : i32 to index
    %c0_81 = arith.constant 0 : index
    %284 = vector.load %arg12[%283, %c0_81] : memref<16x32xf32, #tpu.memory_space<vmem>>, vector<2x32xf32>
    tpu.vector_store %arg12[%283, %c0_81], %282 {strides = array<i32>} : memref<16x32xf32, #tpu.memory_space<vmem>>, vector<2x32xf32>,
    %285 = vector.extract_strided_slice %281 {offsets = [0, 32], sizes = [2, 32], strides = [1, 1]} : vector<2x64xf32> to vector<2x32xf32>
    %286 = arith.index_cast %250 : i32 to index
    %c0_82 = arith.constant 0 : index
    %287 = vector.load %arg13[%286, %c0_82] : memref<16x32xf32, #tpu.memory_space<vmem>>, vector<2x32xf32>
    tpu.vector_store %arg13[%286, %c0_82], %285 {strides = array<i32>} : memref<16x32xf32, #tpu.memory_space<vmem>>, vector<2x32xf32>,
    %c7_i32_83 = arith.constant 7 : i32
    %c2_i32_84 = arith.constant 2 : i32
    %288 = arith.muli %c7_i32_83, %c2_i32_84 : i32
    %c7_i32_85 = arith.constant 7 : i32
    %289 = arith.subi %c7_i32_85, %c7_i32_83 : i32
    %c2_i32_86 = arith.constant 2 : i32
    %290 = arith.muli %289, %c2_i32_86 : i32
    %291 = arith.index_cast %288 : i32 to index
    %c0_87 = arith.constant 0 : index
    %292 = vector.load %arg11[%291, %c0_87] : memref<16x256xf32, #tpu.memory_space<vmem>>, vector<2x128xf32>
    %293 = arith.index_cast %290 : i32 to index
    %c128_88 = arith.constant 128 : index
    %294 = vector.load %arg11[%293, %c128_88] : memref<16x256xf32, #tpu.memory_space<vmem>>, vector<2x128xf32>
    %c0_89 = arith.constant 0 : index
    %c0_90 = arith.constant 0 : index
    %295 = vector.load %arg3[%c0_89, %c0_90] : memref<64x256xf32, #tpu.memory_space<vmem>>, vector<64x256xf32>
    %cst_91 = arith.constant dense<0.000000e+00> : vector<2x256xf32>
    %296 = tpu.matmul %281, %295, %cst_91 {dimension_numbers = #tpu.dot_dimension_numbers<[1], [0], [0], [1], [0, 0, 1, 1], [], []>} : vector<2x64xf32>, vector<64x256xf32>, vector<2x256xf32> -> vector<2x256xf32>
    %297 = tpu.concatenate %292, %294 in 1 : vector<2x128xf32>, vector<2x128xf32> -> vector<2x256xf32>
    %298 = arith.addf %297, %296 : vector<2x256xf32>
    %299 = arith.negf %298 : vector<2x256xf32>
    %300 = math.exp %299 : vector<2x256xf32>
    %cst_92 = arith.constant 1.000000e+00 : f32
    %301 = vector.broadcast %cst_92 : f32 to vector<2x256xf32>
    %302 = arith.addf %301, %300 : vector<2x256xf32>
    %303 = arith.divf %301, %302 : vector<2x256xf32>
    %304 = math.tanh %298 : vector<2x256xf32>
    %305 = vector.extract_strided_slice %303 {offsets = [0, 0], sizes = [2, 32], strides = [1, 1]} : vector<2x256xf32> to vector<2x32xf32>
    %306 = vector.extract_strided_slice %303 {offsets = [0, 128], sizes = [2, 32], strides = [1, 1]} : vector<2x256xf32> to vector<2x32xf32>
    %307 = tpu.concatenate %305, %306 in 1 : vector<2x32xf32>, vector<2x32xf32> -> vector<2x64xf32>
    %308 = vector.extract_strided_slice %303 {offsets = [0, 32], sizes = [2, 32], strides = [1, 1]} : vector<2x256xf32> to vector<2x32xf32>
    %309 = vector.extract_strided_slice %303 {offsets = [0, 160], sizes = [2, 32], strides = [1, 1]} : vector<2x256xf32> to vector<2x32xf32>
    %310 = tpu.concatenate %308, %309 in 1 : vector<2x32xf32>, vector<2x32xf32> -> vector<2x64xf32>
    %311 = vector.extract_strided_slice %304 {offsets = [0, 64], sizes = [2, 32], strides = [1, 1]} : vector<2x256xf32> to vector<2x32xf32>
    %312 = vector.extract_strided_slice %304 {offsets = [0, 192], sizes = [2, 32], strides = [1, 1]} : vector<2x256xf32> to vector<2x32xf32>
    %313 = tpu.concatenate %311, %312 in 1 : vector<2x32xf32>, vector<2x32xf32> -> vector<2x64xf32>
    %314 = vector.extract_strided_slice %303 {offsets = [0, 96], sizes = [2, 32], strides = [1, 1]} : vector<2x256xf32> to vector<2x32xf32>
    %315 = vector.extract_strided_slice %303 {offsets = [0, 224], sizes = [2, 32], strides = [1, 1]} : vector<2x256xf32> to vector<2x32xf32>
    %316 = tpu.concatenate %314, %315 in 1 : vector<2x32xf32>, vector<2x32xf32> -> vector<2x64xf32>
    %317 = arith.mulf %310, %279 : vector<2x64xf32>
    %318 = arith.mulf %307, %313 : vector<2x64xf32>
    %319 = arith.addf %317, %318 : vector<2x64xf32>
    %320 = math.tanh %319 : vector<2x64xf32>
    %321 = arith.mulf %316, %320 : vector<2x64xf32>
    %322 = vector.extract_strided_slice %321 {offsets = [0, 0], sizes = [2, 32], strides = [1, 1]} : vector<2x64xf32> to vector<2x32xf32>
    %323 = arith.index_cast %288 : i32 to index
    %c0_93 = arith.constant 0 : index
    %324 = vector.load %arg12[%323, %c0_93] : memref<16x32xf32, #tpu.memory_space<vmem>>, vector<2x32xf32>
    tpu.vector_store %arg12[%323, %c0_93], %322 {strides = array<i32>} : memref<16x32xf32, #tpu.memory_space<vmem>>, vector<2x32xf32>,
    %325 = vector.extract_strided_slice %321 {offsets = [0, 32], sizes = [2, 32], strides = [1, 1]} : vector<2x64xf32> to vector<2x32xf32>
    %326 = arith.index_cast %290 : i32 to index
    %c0_94 = arith.constant 0 : index
    %327 = vector.load %arg13[%326, %c0_94] : memref<16x32xf32, #tpu.memory_space<vmem>>, vector<2x32xf32>
    tpu.vector_store %arg13[%326, %c0_94], %325 {strides = array<i32>} : memref<16x32xf32, #tpu.memory_space<vmem>>, vector<2x32xf32>,
    %c8_i32 = arith.constant 8 : i32
    %c0_95 = arith.constant 0 : index
    %c0_96 = arith.constant 0 : index
    %328 = vector.load %arg12[%c0_95, %c0_96] : memref<16x32xf32, #tpu.memory_space<vmem>>, vector<16x32xf32>
    %c0_97 = arith.constant 0 : index
    %c0_98 = arith.constant 0 : index
    %329 = vector.load %arg13[%c0_97, %c0_98] : memref<16x32xf32, #tpu.memory_space<vmem>>, vector<16x32xf32>
    %330 = tpu.concatenate %328, %329 in 1 : vector<16x32xf32>, vector<16x32xf32> -> vector<16x64xf32>
    %c0_99 = arith.constant 0 : index
    %c0_100 = arith.constant 0 : index
    %331 = vector.load %arg5[%c0_99, %c0_100] : memref<64x256xf32, #tpu.memory_space<vmem>>, vector<64x256xf32>
    %cst_101 = arith.constant dense<0.000000e+00> : vector<16x256xf32>
    %332 = tpu.matmul %330, %331, %cst_101 {dimension_numbers = #tpu.dot_dimension_numbers<[1], [0], [0], [1], [0, 0, 1, 1], [], []>} : vector<16x64xf32>, vector<64x256xf32>, vector<16x256xf32> -> vector<16x256xf32>
    %c0_102 = arith.constant 0 : index
    %c0_103 = arith.constant 0 : index
    %333 = vector.load %arg7[%c0_102, %c0_103] : memref<1x256xf32, #tpu.memory_space<vmem>>, vector<1x256xf32>
    %334 = vector.broadcast %333 : vector<1x256xf32> to vector<16x256xf32>
    %335 = arith.addf %332, %334 : vector<16x256xf32>
    %c0_104 = arith.constant 0 : index
    %c0_105 = arith.constant 0 : index
    %336 = vector.load %arg11[%c0_104, %c0_105] : memref<16x256xf32, #tpu.memory_space<vmem>>, vector<16x256xf32>
    tpu.vector_store %arg11[%c0_104, %c0_105], %335 {strides = array<i32>} : memref<16x256xf32, #tpu.memory_space<vmem>>, vector<16x256xf32>,
    %cst_106 = arith.constant 0.000000e+00 : f32
    %337 = vector.broadcast %cst_106 : f32 to vector<2x64xf32>
    %c0_i32_107 = arith.constant 0 : i32
    %c2_i32_108 = arith.constant 2 : i32
    %338 = arith.muli %c0_i32_107, %c2_i32_108 : i32
    %c7_i32_109 = arith.constant 7 : i32
    %339 = arith.subi %c7_i32_109, %c0_i32_107 : i32
    %c2_i32_110 = arith.constant 2 : i32
    %340 = arith.muli %339, %c2_i32_110 : i32
    %341 = arith.index_cast %338 : i32 to index
    %c0_111 = arith.constant 0 : index
    %342 = vector.load %arg11[%341, %c0_111] : memref<16x256xf32, #tpu.memory_space<vmem>>, vector<2x128xf32>
    %343 = arith.index_cast %340 : i32 to index
    %c128_112 = arith.constant 128 : index
    %344 = vector.load %arg11[%343, %c128_112] : memref<16x256xf32, #tpu.memory_space<vmem>>, vector<2x128xf32>
    %c0_113 = arith.constant 0 : index
    %c0_114 = arith.constant 0 : index
    %345 = vector.load %arg6[%c0_113, %c0_114] : memref<64x256xf32, #tpu.memory_space<vmem>>, vector<64x256xf32>
    %cst_115 = arith.constant dense<0.000000e+00> : vector<2x256xf32>
    %346 = tpu.matmul %337, %345, %cst_115 {dimension_numbers = #tpu.dot_dimension_numbers<[1], [0], [0], [1], [0, 0, 1, 1], [], []>} : vector<2x64xf32>, vector<64x256xf32>, vector<2x256xf32> -> vector<2x256xf32>
    %347 = tpu.concatenate %342, %344 in 1 : vector<2x128xf32>, vector<2x128xf32> -> vector<2x256xf32>
    %348 = arith.addf %347, %346 : vector<2x256xf32>
    %349 = arith.negf %348 : vector<2x256xf32>
    %350 = math.exp %349 : vector<2x256xf32>
    %cst_116 = arith.constant 1.000000e+00 : f32
    %351 = vector.broadcast %cst_116 : f32 to vector<2x256xf32>
    %352 = arith.addf %351, %350 : vector<2x256xf32>
    %353 = arith.divf %351, %352 : vector<2x256xf32>
    %354 = math.tanh %348 : vector<2x256xf32>
    %355 = vector.extract_strided_slice %353 {offsets = [0, 0], sizes = [2, 32], strides = [1, 1]} : vector<2x256xf32> to vector<2x32xf32>
    %356 = vector.extract_strided_slice %353 {offsets = [0, 128], sizes = [2, 32], strides = [1, 1]} : vector<2x256xf32> to vector<2x32xf32>
    %357 = tpu.concatenate %355, %356 in 1 : vector<2x32xf32>, vector<2x32xf32> -> vector<2x64xf32>
    %358 = vector.extract_strided_slice %353 {offsets = [0, 32], sizes = [2, 32], strides = [1, 1]} : vector<2x256xf32> to vector<2x32xf32>
    %359 = vector.extract_strided_slice %353 {offsets = [0, 160], sizes = [2, 32], strides = [1, 1]} : vector<2x256xf32> to vector<2x32xf32>
    %360 = tpu.concatenate %358, %359 in 1 : vector<2x32xf32>, vector<2x32xf32> -> vector<2x64xf32>
    %361 = vector.extract_strided_slice %354 {offsets = [0, 64], sizes = [2, 32], strides = [1, 1]} : vector<2x256xf32> to vector<2x32xf32>
    %362 = vector.extract_strided_slice %354 {offsets = [0, 192], sizes = [2, 32], strides = [1, 1]} : vector<2x256xf32> to vector<2x32xf32>
    %363 = tpu.concatenate %361, %362 in 1 : vector<2x32xf32>, vector<2x32xf32> -> vector<2x64xf32>
    %364 = vector.extract_strided_slice %353 {offsets = [0, 96], sizes = [2, 32], strides = [1, 1]} : vector<2x256xf32> to vector<2x32xf32>
    %365 = vector.extract_strided_slice %353 {offsets = [0, 224], sizes = [2, 32], strides = [1, 1]} : vector<2x256xf32> to vector<2x32xf32>
    %366 = tpu.concatenate %364, %365 in 1 : vector<2x32xf32>, vector<2x32xf32> -> vector<2x64xf32>
    %367 = arith.mulf %360, %337 : vector<2x64xf32>
    %368 = arith.mulf %357, %363 : vector<2x64xf32>
    %369 = arith.addf %367, %368 : vector<2x64xf32>
    %370 = math.tanh %369 : vector<2x64xf32>
    %371 = arith.mulf %366, %370 : vector<2x64xf32>
    %372 = vector.extract_strided_slice %371 {offsets = [0, 0], sizes = [2, 32], strides = [1, 1]} : vector<2x64xf32> to vector<2x32xf32>
    %373 = arith.index_cast %338 : i32 to index
    %c0_117 = arith.constant 0 : index
    %374 = vector.load %arg12[%373, %c0_117] : memref<16x32xf32, #tpu.memory_space<vmem>>, vector<2x32xf32>
    tpu.vector_store %arg12[%373, %c0_117], %372 {strides = array<i32>} : memref<16x32xf32, #tpu.memory_space<vmem>>, vector<2x32xf32>,
    %375 = vector.extract_strided_slice %371 {offsets = [0, 32], sizes = [2, 32], strides = [1, 1]} : vector<2x64xf32> to vector<2x32xf32>
    %376 = arith.index_cast %340 : i32 to index
    %c0_118 = arith.constant 0 : index
    %377 = vector.load %arg13[%376, %c0_118] : memref<16x32xf32, #tpu.memory_space<vmem>>, vector<2x32xf32>
    tpu.vector_store %arg13[%376, %c0_118], %375 {strides = array<i32>} : memref<16x32xf32, #tpu.memory_space<vmem>>, vector<2x32xf32>,
    %c1_i32_119 = arith.constant 1 : i32
    %c2_i32_120 = arith.constant 2 : i32
    %378 = arith.muli %c1_i32_119, %c2_i32_120 : i32
    %c7_i32_121 = arith.constant 7 : i32
    %379 = arith.subi %c7_i32_121, %c1_i32_119 : i32
    %c2_i32_122 = arith.constant 2 : i32
    %380 = arith.muli %379, %c2_i32_122 : i32
    %381 = arith.index_cast %378 : i32 to index
    %c0_123 = arith.constant 0 : index
    %382 = vector.load %arg11[%381, %c0_123] : memref<16x256xf32, #tpu.memory_space<vmem>>, vector<2x128xf32>
    %383 = arith.index_cast %380 : i32 to index
    %c128_124 = arith.constant 128 : index
    %384 = vector.load %arg11[%383, %c128_124] : memref<16x256xf32, #tpu.memory_space<vmem>>, vector<2x128xf32>
    %c0_125 = arith.constant 0 : index
    %c0_126 = arith.constant 0 : index
    %385 = vector.load %arg6[%c0_125, %c0_126] : memref<64x256xf32, #tpu.memory_space<vmem>>, vector<64x256xf32>
    %cst_127 = arith.constant dense<0.000000e+00> : vector<2x256xf32>
    %386 = tpu.matmul %371, %385, %cst_127 {dimension_numbers = #tpu.dot_dimension_numbers<[1], [0], [0], [1], [0, 0, 1, 1], [], []>} : vector<2x64xf32>, vector<64x256xf32>, vector<2x256xf32> -> vector<2x256xf32>
    %387 = tpu.concatenate %382, %384 in 1 : vector<2x128xf32>, vector<2x128xf32> -> vector<2x256xf32>
    %388 = arith.addf %387, %386 : vector<2x256xf32>
    %389 = arith.negf %388 : vector<2x256xf32>
    %390 = math.exp %389 : vector<2x256xf32>
    %cst_128 = arith.constant 1.000000e+00 : f32
    %391 = vector.broadcast %cst_128 : f32 to vector<2x256xf32>
    %392 = arith.addf %391, %390 : vector<2x256xf32>
    %393 = arith.divf %391, %392 : vector<2x256xf32>
    %394 = math.tanh %388 : vector<2x256xf32>
    %395 = vector.extract_strided_slice %393 {offsets = [0, 0], sizes = [2, 32], strides = [1, 1]} : vector<2x256xf32> to vector<2x32xf32>
    %396 = vector.extract_strided_slice %393 {offsets = [0, 128], sizes = [2, 32], strides = [1, 1]} : vector<2x256xf32> to vector<2x32xf32>
    %397 = tpu.concatenate %395, %396 in 1 : vector<2x32xf32>, vector<2x32xf32> -> vector<2x64xf32>
    %398 = vector.extract_strided_slice %393 {offsets = [0, 32], sizes = [2, 32], strides = [1, 1]} : vector<2x256xf32> to vector<2x32xf32>
    %399 = vector.extract_strided_slice %393 {offsets = [0, 160], sizes = [2, 32], strides = [1, 1]} : vector<2x256xf32> to vector<2x32xf32>
    %400 = tpu.concatenate %398, %399 in 1 : vector<2x32xf32>, vector<2x32xf32> -> vector<2x64xf32>
    %401 = vector.extract_strided_slice %394 {offsets = [0, 64], sizes = [2, 32], strides = [1, 1]} : vector<2x256xf32> to vector<2x32xf32>
    %402 = vector.extract_strided_slice %394 {offsets = [0, 192], sizes = [2, 32], strides = [1, 1]} : vector<2x256xf32> to vector<2x32xf32>
    %403 = tpu.concatenate %401, %402 in 1 : vector<2x32xf32>, vector<2x32xf32> -> vector<2x64xf32>
    %404 = vector.extract_strided_slice %393 {offsets = [0, 96], sizes = [2, 32], strides = [1, 1]} : vector<2x256xf32> to vector<2x32xf32>
    %405 = vector.extract_strided_slice %393 {offsets = [0, 224], sizes = [2, 32], strides = [1, 1]} : vector<2x256xf32> to vector<2x32xf32>
    %406 = tpu.concatenate %404, %405 in 1 : vector<2x32xf32>, vector<2x32xf32> -> vector<2x64xf32>
    %407 = arith.mulf %400, %369 : vector<2x64xf32>
    %408 = arith.mulf %397, %403 : vector<2x64xf32>
    %409 = arith.addf %407, %408 : vector<2x64xf32>
    %410 = math.tanh %409 : vector<2x64xf32>
    %411 = arith.mulf %406, %410 : vector<2x64xf32>
    %412 = vector.extract_strided_slice %411 {offsets = [0, 0], sizes = [2, 32], strides = [1, 1]} : vector<2x64xf32> to vector<2x32xf32>
    %413 = arith.index_cast %378 : i32 to index
    %c0_129 = arith.constant 0 : index
    %414 = vector.load %arg12[%413, %c0_129] : memref<16x32xf32, #tpu.memory_space<vmem>>, vector<2x32xf32>
    tpu.vector_store %arg12[%413, %c0_129], %412 {strides = array<i32>} : memref<16x32xf32, #tpu.memory_space<vmem>>, vector<2x32xf32>,
    %415 = vector.extract_strided_slice %411 {offsets = [0, 32], sizes = [2, 32], strides = [1, 1]} : vector<2x64xf32> to vector<2x32xf32>
    %416 = arith.index_cast %380 : i32 to index
    %c0_130 = arith.constant 0 : index
    %417 = vector.load %arg13[%416, %c0_130] : memref<16x32xf32, #tpu.memory_space<vmem>>, vector<2x32xf32>
    tpu.vector_store %arg13[%416, %c0_130], %415 {strides = array<i32>} : memref<16x32xf32, #tpu.memory_space<vmem>>, vector<2x32xf32>,
    %c2_i32_131 = arith.constant 2 : i32
    %c2_i32_132 = arith.constant 2 : i32
    %418 = arith.muli %c2_i32_131, %c2_i32_132 : i32
    %c7_i32_133 = arith.constant 7 : i32
    %419 = arith.subi %c7_i32_133, %c2_i32_131 : i32
    %c2_i32_134 = arith.constant 2 : i32
    %420 = arith.muli %419, %c2_i32_134 : i32
    %421 = arith.index_cast %418 : i32 to index
    %c0_135 = arith.constant 0 : index
    %422 = vector.load %arg11[%421, %c0_135] : memref<16x256xf32, #tpu.memory_space<vmem>>, vector<2x128xf32>
    %423 = arith.index_cast %420 : i32 to index
    %c128_136 = arith.constant 128 : index
    %424 = vector.load %arg11[%423, %c128_136] : memref<16x256xf32, #tpu.memory_space<vmem>>, vector<2x128xf32>
    %c0_137 = arith.constant 0 : index
    %c0_138 = arith.constant 0 : index
    %425 = vector.load %arg6[%c0_137, %c0_138] : memref<64x256xf32, #tpu.memory_space<vmem>>, vector<64x256xf32>
    %cst_139 = arith.constant dense<0.000000e+00> : vector<2x256xf32>
    %426 = tpu.matmul %411, %425, %cst_139 {dimension_numbers = #tpu.dot_dimension_numbers<[1], [0], [0], [1], [0, 0, 1, 1], [], []>} : vector<2x64xf32>, vector<64x256xf32>, vector<2x256xf32> -> vector<2x256xf32>
    %427 = tpu.concatenate %422, %424 in 1 : vector<2x128xf32>, vector<2x128xf32> -> vector<2x256xf32>
    %428 = arith.addf %427, %426 : vector<2x256xf32>
    %429 = arith.negf %428 : vector<2x256xf32>
    %430 = math.exp %429 : vector<2x256xf32>
    %cst_140 = arith.constant 1.000000e+00 : f32
    %431 = vector.broadcast %cst_140 : f32 to vector<2x256xf32>
    %432 = arith.addf %431, %430 : vector<2x256xf32>
    %433 = arith.divf %431, %432 : vector<2x256xf32>
    %434 = math.tanh %428 : vector<2x256xf32>
    %435 = vector.extract_strided_slice %433 {offsets = [0, 0], sizes = [2, 32], strides = [1, 1]} : vector<2x256xf32> to vector<2x32xf32>
    %436 = vector.extract_strided_slice %433 {offsets = [0, 128], sizes = [2, 32], strides = [1, 1]} : vector<2x256xf32> to vector<2x32xf32>
    %437 = tpu.concatenate %435, %436 in 1 : vector<2x32xf32>, vector<2x32xf32> -> vector<2x64xf32>
    %438 = vector.extract_strided_slice %433 {offsets = [0, 32], sizes = [2, 32], strides = [1, 1]} : vector<2x256xf32> to vector<2x32xf32>
    %439 = vector.extract_strided_slice %433 {offsets = [0, 160], sizes = [2, 32], strides = [1, 1]} : vector<2x256xf32> to vector<2x32xf32>
    %440 = tpu.concatenate %438, %439 in 1 : vector<2x32xf32>, vector<2x32xf32> -> vector<2x64xf32>
    %441 = vector.extract_strided_slice %434 {offsets = [0, 64], sizes = [2, 32], strides = [1, 1]} : vector<2x256xf32> to vector<2x32xf32>
    %442 = vector.extract_strided_slice %434 {offsets = [0, 192], sizes = [2, 32], strides = [1, 1]} : vector<2x256xf32> to vector<2x32xf32>
    %443 = tpu.concatenate %441, %442 in 1 : vector<2x32xf32>, vector<2x32xf32> -> vector<2x64xf32>
    %444 = vector.extract_strided_slice %433 {offsets = [0, 96], sizes = [2, 32], strides = [1, 1]} : vector<2x256xf32> to vector<2x32xf32>
    %445 = vector.extract_strided_slice %433 {offsets = [0, 224], sizes = [2, 32], strides = [1, 1]} : vector<2x256xf32> to vector<2x32xf32>
    %446 = tpu.concatenate %444, %445 in 1 : vector<2x32xf32>, vector<2x32xf32> -> vector<2x64xf32>
    %447 = arith.mulf %440, %409 : vector<2x64xf32>
    %448 = arith.mulf %437, %443 : vector<2x64xf32>
    %449 = arith.addf %447, %448 : vector<2x64xf32>
    %450 = math.tanh %449 : vector<2x64xf32>
    %451 = arith.mulf %446, %450 : vector<2x64xf32>
    %452 = vector.extract_strided_slice %451 {offsets = [0, 0], sizes = [2, 32], strides = [1, 1]} : vector<2x64xf32> to vector<2x32xf32>
    %453 = arith.index_cast %418 : i32 to index
    %c0_141 = arith.constant 0 : index
    %454 = vector.load %arg12[%453, %c0_141] : memref<16x32xf32, #tpu.memory_space<vmem>>, vector<2x32xf32>
    tpu.vector_store %arg12[%453, %c0_141], %452 {strides = array<i32>} : memref<16x32xf32, #tpu.memory_space<vmem>>, vector<2x32xf32>,
    %455 = vector.extract_strided_slice %451 {offsets = [0, 32], sizes = [2, 32], strides = [1, 1]} : vector<2x64xf32> to vector<2x32xf32>
    %456 = arith.index_cast %420 : i32 to index
    %c0_142 = arith.constant 0 : index
    %457 = vector.load %arg13[%456, %c0_142] : memref<16x32xf32, #tpu.memory_space<vmem>>, vector<2x32xf32>
    tpu.vector_store %arg13[%456, %c0_142], %455 {strides = array<i32>} : memref<16x32xf32, #tpu.memory_space<vmem>>, vector<2x32xf32>,
    %c3_i32_143 = arith.constant 3 : i32
    %c2_i32_144 = arith.constant 2 : i32
    %458 = arith.muli %c3_i32_143, %c2_i32_144 : i32
    %c7_i32_145 = arith.constant 7 : i32
    %459 = arith.subi %c7_i32_145, %c3_i32_143 : i32
    %c2_i32_146 = arith.constant 2 : i32
    %460 = arith.muli %459, %c2_i32_146 : i32
    %461 = arith.index_cast %458 : i32 to index
    %c0_147 = arith.constant 0 : index
    %462 = vector.load %arg11[%461, %c0_147] : memref<16x256xf32, #tpu.memory_space<vmem>>, vector<2x128xf32>
    %463 = arith.index_cast %460 : i32 to index
    %c128_148 = arith.constant 128 : index
    %464 = vector.load %arg11[%463, %c128_148] : memref<16x256xf32, #tpu.memory_space<vmem>>, vector<2x128xf32>
    %c0_149 = arith.constant 0 : index
    %c0_150 = arith.constant 0 : index
    %465 = vector.load %arg6[%c0_149, %c0_150] : memref<64x256xf32, #tpu.memory_space<vmem>>, vector<64x256xf32>
    %cst_151 = arith.constant dense<0.000000e+00> : vector<2x256xf32>
    %466 = tpu.matmul %451, %465, %cst_151 {dimension_numbers = #tpu.dot_dimension_numbers<[1], [0], [0], [1], [0, 0, 1, 1], [], []>} : vector<2x64xf32>, vector<64x256xf32>, vector<2x256xf32> -> vector<2x256xf32>
    %467 = tpu.concatenate %462, %464 in 1 : vector<2x128xf32>, vector<2x128xf32> -> vector<2x256xf32>
    %468 = arith.addf %467, %466 : vector<2x256xf32>
    %469 = arith.negf %468 : vector<2x256xf32>
    %470 = math.exp %469 : vector<2x256xf32>
    %cst_152 = arith.constant 1.000000e+00 : f32
    %471 = vector.broadcast %cst_152 : f32 to vector<2x256xf32>
    %472 = arith.addf %471, %470 : vector<2x256xf32>
    %473 = arith.divf %471, %472 : vector<2x256xf32>
    %474 = math.tanh %468 : vector<2x256xf32>
    %475 = vector.extract_strided_slice %473 {offsets = [0, 0], sizes = [2, 32], strides = [1, 1]} : vector<2x256xf32> to vector<2x32xf32>
    %476 = vector.extract_strided_slice %473 {offsets = [0, 128], sizes = [2, 32], strides = [1, 1]} : vector<2x256xf32> to vector<2x32xf32>
    %477 = tpu.concatenate %475, %476 in 1 : vector<2x32xf32>, vector<2x32xf32> -> vector<2x64xf32>
    %478 = vector.extract_strided_slice %473 {offsets = [0, 32], sizes = [2, 32], strides = [1, 1]} : vector<2x256xf32> to vector<2x32xf32>
    %479 = vector.extract_strided_slice %473 {offsets = [0, 160], sizes = [2, 32], strides = [1, 1]} : vector<2x256xf32> to vector<2x32xf32>
    %480 = tpu.concatenate %478, %479 in 1 : vector<2x32xf32>, vector<2x32xf32> -> vector<2x64xf32>
    %481 = vector.extract_strided_slice %474 {offsets = [0, 64], sizes = [2, 32], strides = [1, 1]} : vector<2x256xf32> to vector<2x32xf32>
    %482 = vector.extract_strided_slice %474 {offsets = [0, 192], sizes = [2, 32], strides = [1, 1]} : vector<2x256xf32> to vector<2x32xf32>
    %483 = tpu.concatenate %481, %482 in 1 : vector<2x32xf32>, vector<2x32xf32> -> vector<2x64xf32>
    %484 = vector.extract_strided_slice %473 {offsets = [0, 96], sizes = [2, 32], strides = [1, 1]} : vector<2x256xf32> to vector<2x32xf32>
    %485 = vector.extract_strided_slice %473 {offsets = [0, 224], sizes = [2, 32], strides = [1, 1]} : vector<2x256xf32> to vector<2x32xf32>
    %486 = tpu.concatenate %484, %485 in 1 : vector<2x32xf32>, vector<2x32xf32> -> vector<2x64xf32>
    %487 = arith.mulf %480, %449 : vector<2x64xf32>
    %488 = arith.mulf %477, %483 : vector<2x64xf32>
    %489 = arith.addf %487, %488 : vector<2x64xf32>
    %490 = math.tanh %489 : vector<2x64xf32>
    %491 = arith.mulf %486, %490 : vector<2x64xf32>
    %492 = vector.extract_strided_slice %491 {offsets = [0, 0], sizes = [2, 32], strides = [1, 1]} : vector<2x64xf32> to vector<2x32xf32>
    %493 = arith.index_cast %458 : i32 to index
    %c0_153 = arith.constant 0 : index
    %494 = vector.load %arg12[%493, %c0_153] : memref<16x32xf32, #tpu.memory_space<vmem>>, vector<2x32xf32>
    tpu.vector_store %arg12[%493, %c0_153], %492 {strides = array<i32>} : memref<16x32xf32, #tpu.memory_space<vmem>>, vector<2x32xf32>,
    %495 = vector.extract_strided_slice %491 {offsets = [0, 32], sizes = [2, 32], strides = [1, 1]} : vector<2x64xf32> to vector<2x32xf32>
    %496 = arith.index_cast %460 : i32 to index
    %c0_154 = arith.constant 0 : index
    %497 = vector.load %arg13[%496, %c0_154] : memref<16x32xf32, #tpu.memory_space<vmem>>, vector<2x32xf32>
    tpu.vector_store %arg13[%496, %c0_154], %495 {strides = array<i32>} : memref<16x32xf32, #tpu.memory_space<vmem>>, vector<2x32xf32>,
    %c4_i32_155 = arith.constant 4 : i32
    %c2_i32_156 = arith.constant 2 : i32
    %498 = arith.muli %c4_i32_155, %c2_i32_156 : i32
    %c7_i32_157 = arith.constant 7 : i32
    %499 = arith.subi %c7_i32_157, %c4_i32_155 : i32
    %c2_i32_158 = arith.constant 2 : i32
    %500 = arith.muli %499, %c2_i32_158 : i32
    %501 = arith.index_cast %498 : i32 to index
    %c0_159 = arith.constant 0 : index
    %502 = vector.load %arg11[%501, %c0_159] : memref<16x256xf32, #tpu.memory_space<vmem>>, vector<2x128xf32>
    %503 = arith.index_cast %500 : i32 to index
    %c128_160 = arith.constant 128 : index
    %504 = vector.load %arg11[%503, %c128_160] : memref<16x256xf32, #tpu.memory_space<vmem>>, vector<2x128xf32>
    %c0_161 = arith.constant 0 : index
    %c0_162 = arith.constant 0 : index
    %505 = vector.load %arg6[%c0_161, %c0_162] : memref<64x256xf32, #tpu.memory_space<vmem>>, vector<64x256xf32>
    %cst_163 = arith.constant dense<0.000000e+00> : vector<2x256xf32>
    %506 = tpu.matmul %491, %505, %cst_163 {dimension_numbers = #tpu.dot_dimension_numbers<[1], [0], [0], [1], [0, 0, 1, 1], [], []>} : vector<2x64xf32>, vector<64x256xf32>, vector<2x256xf32> -> vector<2x256xf32>
    %507 = tpu.concatenate %502, %504 in 1 : vector<2x128xf32>, vector<2x128xf32> -> vector<2x256xf32>
    %508 = arith.addf %507, %506 : vector<2x256xf32>
    %509 = arith.negf %508 : vector<2x256xf32>
    %510 = math.exp %509 : vector<2x256xf32>
    %cst_164 = arith.constant 1.000000e+00 : f32
    %511 = vector.broadcast %cst_164 : f32 to vector<2x256xf32>
    %512 = arith.addf %511, %510 : vector<2x256xf32>
    %513 = arith.divf %511, %512 : vector<2x256xf32>
    %514 = math.tanh %508 : vector<2x256xf32>
    %515 = vector.extract_strided_slice %513 {offsets = [0, 0], sizes = [2, 32], strides = [1, 1]} : vector<2x256xf32> to vector<2x32xf32>
    %516 = vector.extract_strided_slice %513 {offsets = [0, 128], sizes = [2, 32], strides = [1, 1]} : vector<2x256xf32> to vector<2x32xf32>
    %517 = tpu.concatenate %515, %516 in 1 : vector<2x32xf32>, vector<2x32xf32> -> vector<2x64xf32>
    %518 = vector.extract_strided_slice %513 {offsets = [0, 32], sizes = [2, 32], strides = [1, 1]} : vector<2x256xf32> to vector<2x32xf32>
    %519 = vector.extract_strided_slice %513 {offsets = [0, 160], sizes = [2, 32], strides = [1, 1]} : vector<2x256xf32> to vector<2x32xf32>
    %520 = tpu.concatenate %518, %519 in 1 : vector<2x32xf32>, vector<2x32xf32> -> vector<2x64xf32>
    %521 = vector.extract_strided_slice %514 {offsets = [0, 64], sizes = [2, 32], strides = [1, 1]} : vector<2x256xf32> to vector<2x32xf32>
    %522 = vector.extract_strided_slice %514 {offsets = [0, 192], sizes = [2, 32], strides = [1, 1]} : vector<2x256xf32> to vector<2x32xf32>
    %523 = tpu.concatenate %521, %522 in 1 : vector<2x32xf32>, vector<2x32xf32> -> vector<2x64xf32>
    %524 = vector.extract_strided_slice %513 {offsets = [0, 96], sizes = [2, 32], strides = [1, 1]} : vector<2x256xf32> to vector<2x32xf32>
    %525 = vector.extract_strided_slice %513 {offsets = [0, 224], sizes = [2, 32], strides = [1, 1]} : vector<2x256xf32> to vector<2x32xf32>
    %526 = tpu.concatenate %524, %525 in 1 : vector<2x32xf32>, vector<2x32xf32> -> vector<2x64xf32>
    %527 = arith.mulf %520, %489 : vector<2x64xf32>
    %528 = arith.mulf %517, %523 : vector<2x64xf32>
    %529 = arith.addf %527, %528 : vector<2x64xf32>
    %530 = math.tanh %529 : vector<2x64xf32>
    %531 = arith.mulf %526, %530 : vector<2x64xf32>
    %532 = vector.extract_strided_slice %531 {offsets = [0, 0], sizes = [2, 32], strides = [1, 1]} : vector<2x64xf32> to vector<2x32xf32>
    %533 = arith.index_cast %498 : i32 to index
    %c0_165 = arith.constant 0 : index
    %534 = vector.load %arg12[%533, %c0_165] : memref<16x32xf32, #tpu.memory_space<vmem>>, vector<2x32xf32>
    tpu.vector_store %arg12[%533, %c0_165], %532 {strides = array<i32>} : memref<16x32xf32, #tpu.memory_space<vmem>>, vector<2x32xf32>,
    %535 = vector.extract_strided_slice %531 {offsets = [0, 32], sizes = [2, 32], strides = [1, 1]} : vector<2x64xf32> to vector<2x32xf32>
    %536 = arith.index_cast %500 : i32 to index
    %c0_166 = arith.constant 0 : index
    %537 = vector.load %arg13[%536, %c0_166] : memref<16x32xf32, #tpu.memory_space<vmem>>, vector<2x32xf32>
    tpu.vector_store %arg13[%536, %c0_166], %535 {strides = array<i32>} : memref<16x32xf32, #tpu.memory_space<vmem>>, vector<2x32xf32>,
    %c5_i32_167 = arith.constant 5 : i32
    %c2_i32_168 = arith.constant 2 : i32
    %538 = arith.muli %c5_i32_167, %c2_i32_168 : i32
    %c7_i32_169 = arith.constant 7 : i32
    %539 = arith.subi %c7_i32_169, %c5_i32_167 : i32
    %c2_i32_170 = arith.constant 2 : i32
    %540 = arith.muli %539, %c2_i32_170 : i32
    %541 = arith.index_cast %538 : i32 to index
    %c0_171 = arith.constant 0 : index
    %542 = vector.load %arg11[%541, %c0_171] : memref<16x256xf32, #tpu.memory_space<vmem>>, vector<2x128xf32>
    %543 = arith.index_cast %540 : i32 to index
    %c128_172 = arith.constant 128 : index
    %544 = vector.load %arg11[%543, %c128_172] : memref<16x256xf32, #tpu.memory_space<vmem>>, vector<2x128xf32>
    %c0_173 = arith.constant 0 : index
    %c0_174 = arith.constant 0 : index
    %545 = vector.load %arg6[%c0_173, %c0_174] : memref<64x256xf32, #tpu.memory_space<vmem>>, vector<64x256xf32>
    %cst_175 = arith.constant dense<0.000000e+00> : vector<2x256xf32>
    %546 = tpu.matmul %531, %545, %cst_175 {dimension_numbers = #tpu.dot_dimension_numbers<[1], [0], [0], [1], [0, 0, 1, 1], [], []>} : vector<2x64xf32>, vector<64x256xf32>, vector<2x256xf32> -> vector<2x256xf32>
    %547 = tpu.concatenate %542, %544 in 1 : vector<2x128xf32>, vector<2x128xf32> -> vector<2x256xf32>
    %548 = arith.addf %547, %546 : vector<2x256xf32>
    %549 = arith.negf %548 : vector<2x256xf32>
    %550 = math.exp %549 : vector<2x256xf32>
    %cst_176 = arith.constant 1.000000e+00 : f32
    %551 = vector.broadcast %cst_176 : f32 to vector<2x256xf32>
    %552 = arith.addf %551, %550 : vector<2x256xf32>
    %553 = arith.divf %551, %552 : vector<2x256xf32>
    %554 = math.tanh %548 : vector<2x256xf32>
    %555 = vector.extract_strided_slice %553 {offsets = [0, 0], sizes = [2, 32], strides = [1, 1]} : vector<2x256xf32> to vector<2x32xf32>
    %556 = vector.extract_strided_slice %553 {offsets = [0, 128], sizes = [2, 32], strides = [1, 1]} : vector<2x256xf32> to vector<2x32xf32>
    %557 = tpu.concatenate %555, %556 in 1 : vector<2x32xf32>, vector<2x32xf32> -> vector<2x64xf32>
    %558 = vector.extract_strided_slice %553 {offsets = [0, 32], sizes = [2, 32], strides = [1, 1]} : vector<2x256xf32> to vector<2x32xf32>
    %559 = vector.extract_strided_slice %553 {offsets = [0, 160], sizes = [2, 32], strides = [1, 1]} : vector<2x256xf32> to vector<2x32xf32>
    %560 = tpu.concatenate %558, %559 in 1 : vector<2x32xf32>, vector<2x32xf32> -> vector<2x64xf32>
    %561 = vector.extract_strided_slice %554 {offsets = [0, 64], sizes = [2, 32], strides = [1, 1]} : vector<2x256xf32> to vector<2x32xf32>
    %562 = vector.extract_strided_slice %554 {offsets = [0, 192], sizes = [2, 32], strides = [1, 1]} : vector<2x256xf32> to vector<2x32xf32>
    %563 = tpu.concatenate %561, %562 in 1 : vector<2x32xf32>, vector<2x32xf32> -> vector<2x64xf32>
    %564 = vector.extract_strided_slice %553 {offsets = [0, 96], sizes = [2, 32], strides = [1, 1]} : vector<2x256xf32> to vector<2x32xf32>
    %565 = vector.extract_strided_slice %553 {offsets = [0, 224], sizes = [2, 32], strides = [1, 1]} : vector<2x256xf32> to vector<2x32xf32>
    %566 = tpu.concatenate %564, %565 in 1 : vector<2x32xf32>, vector<2x32xf32> -> vector<2x64xf32>
    %567 = arith.mulf %560, %529 : vector<2x64xf32>
    %568 = arith.mulf %557, %563 : vector<2x64xf32>
    %569 = arith.addf %567, %568 : vector<2x64xf32>
    %570 = math.tanh %569 : vector<2x64xf32>
    %571 = arith.mulf %566, %570 : vector<2x64xf32>
    %572 = vector.extract_strided_slice %571 {offsets = [0, 0], sizes = [2, 32], strides = [1, 1]} : vector<2x64xf32> to vector<2x32xf32>
    %573 = arith.index_cast %538 : i32 to index
    %c0_177 = arith.constant 0 : index
    %574 = vector.load %arg12[%573, %c0_177] : memref<16x32xf32, #tpu.memory_space<vmem>>, vector<2x32xf32>
    tpu.vector_store %arg12[%573, %c0_177], %572 {strides = array<i32>} : memref<16x32xf32, #tpu.memory_space<vmem>>, vector<2x32xf32>,
    %575 = vector.extract_strided_slice %571 {offsets = [0, 32], sizes = [2, 32], strides = [1, 1]} : vector<2x64xf32> to vector<2x32xf32>
    %576 = arith.index_cast %540 : i32 to index
    %c0_178 = arith.constant 0 : index
    %577 = vector.load %arg13[%576, %c0_178] : memref<16x32xf32, #tpu.memory_space<vmem>>, vector<2x32xf32>
    tpu.vector_store %arg13[%576, %c0_178], %575 {strides = array<i32>} : memref<16x32xf32, #tpu.memory_space<vmem>>, vector<2x32xf32>,
    %c6_i32_179 = arith.constant 6 : i32
    %c2_i32_180 = arith.constant 2 : i32
    %578 = arith.muli %c6_i32_179, %c2_i32_180 : i32
    %c7_i32_181 = arith.constant 7 : i32
    %579 = arith.subi %c7_i32_181, %c6_i32_179 : i32
    %c2_i32_182 = arith.constant 2 : i32
    %580 = arith.muli %579, %c2_i32_182 : i32
    %581 = arith.index_cast %578 : i32 to index
    %c0_183 = arith.constant 0 : index
    %582 = vector.load %arg11[%581, %c0_183] : memref<16x256xf32, #tpu.memory_space<vmem>>, vector<2x128xf32>
    %583 = arith.index_cast %580 : i32 to index
    %c128_184 = arith.constant 128 : index
    %584 = vector.load %arg11[%583, %c128_184] : memref<16x256xf32, #tpu.memory_space<vmem>>, vector<2x128xf32>
    %c0_185 = arith.constant 0 : index
    %c0_186 = arith.constant 0 : index
    %585 = vector.load %arg6[%c0_185, %c0_186] : memref<64x256xf32, #tpu.memory_space<vmem>>, vector<64x256xf32>
    %cst_187 = arith.constant dense<0.000000e+00> : vector<2x256xf32>
    %586 = tpu.matmul %571, %585, %cst_187 {dimension_numbers = #tpu.dot_dimension_numbers<[1], [0], [0], [1], [0, 0, 1, 1], [], []>} : vector<2x64xf32>, vector<64x256xf32>, vector<2x256xf32> -> vector<2x256xf32>
    %587 = tpu.concatenate %582, %584 in 1 : vector<2x128xf32>, vector<2x128xf32> -> vector<2x256xf32>
    %588 = arith.addf %587, %586 : vector<2x256xf32>
    %589 = arith.negf %588 : vector<2x256xf32>
    %590 = math.exp %589 : vector<2x256xf32>
    %cst_188 = arith.constant 1.000000e+00 : f32
    %591 = vector.broadcast %cst_188 : f32 to vector<2x256xf32>
    %592 = arith.addf %591, %590 : vector<2x256xf32>
    %593 = arith.divf %591, %592 : vector<2x256xf32>
    %594 = math.tanh %588 : vector<2x256xf32>
    %595 = vector.extract_strided_slice %593 {offsets = [0, 0], sizes = [2, 32], strides = [1, 1]} : vector<2x256xf32> to vector<2x32xf32>
    %596 = vector.extract_strided_slice %593 {offsets = [0, 128], sizes = [2, 32], strides = [1, 1]} : vector<2x256xf32> to vector<2x32xf32>
    %597 = tpu.concatenate %595, %596 in 1 : vector<2x32xf32>, vector<2x32xf32> -> vector<2x64xf32>
    %598 = vector.extract_strided_slice %593 {offsets = [0, 32], sizes = [2, 32], strides = [1, 1]} : vector<2x256xf32> to vector<2x32xf32>
    %599 = vector.extract_strided_slice %593 {offsets = [0, 160], sizes = [2, 32], strides = [1, 1]} : vector<2x256xf32> to vector<2x32xf32>
    %600 = tpu.concatenate %598, %599 in 1 : vector<2x32xf32>, vector<2x32xf32> -> vector<2x64xf32>
    %601 = vector.extract_strided_slice %594 {offsets = [0, 64], sizes = [2, 32], strides = [1, 1]} : vector<2x256xf32> to vector<2x32xf32>
    %602 = vector.extract_strided_slice %594 {offsets = [0, 192], sizes = [2, 32], strides = [1, 1]} : vector<2x256xf32> to vector<2x32xf32>
    %603 = tpu.concatenate %601, %602 in 1 : vector<2x32xf32>, vector<2x32xf32> -> vector<2x64xf32>
    %604 = vector.extract_strided_slice %593 {offsets = [0, 96], sizes = [2, 32], strides = [1, 1]} : vector<2x256xf32> to vector<2x32xf32>
    %605 = vector.extract_strided_slice %593 {offsets = [0, 224], sizes = [2, 32], strides = [1, 1]} : vector<2x256xf32> to vector<2x32xf32>
    %606 = tpu.concatenate %604, %605 in 1 : vector<2x32xf32>, vector<2x32xf32> -> vector<2x64xf32>
    %607 = arith.mulf %600, %569 : vector<2x64xf32>
    %608 = arith.mulf %597, %603 : vector<2x64xf32>
    %609 = arith.addf %607, %608 : vector<2x64xf32>
    %610 = math.tanh %609 : vector<2x64xf32>
    %611 = arith.mulf %606, %610 : vector<2x64xf32>
    %612 = vector.extract_strided_slice %611 {offsets = [0, 0], sizes = [2, 32], strides = [1, 1]} : vector<2x64xf32> to vector<2x32xf32>
    %613 = arith.index_cast %578 : i32 to index
    %c0_189 = arith.constant 0 : index
    %614 = vector.load %arg12[%613, %c0_189] : memref<16x32xf32, #tpu.memory_space<vmem>>, vector<2x32xf32>
    tpu.vector_store %arg12[%613, %c0_189], %612 {strides = array<i32>} : memref<16x32xf32, #tpu.memory_space<vmem>>, vector<2x32xf32>,
    %615 = vector.extract_strided_slice %611 {offsets = [0, 32], sizes = [2, 32], strides = [1, 1]} : vector<2x64xf32> to vector<2x32xf32>
    %616 = arith.index_cast %580 : i32 to index
    %c0_190 = arith.constant 0 : index
    %617 = vector.load %arg13[%616, %c0_190] : memref<16x32xf32, #tpu.memory_space<vmem>>, vector<2x32xf32>
    tpu.vector_store %arg13[%616, %c0_190], %615 {strides = array<i32>} : memref<16x32xf32, #tpu.memory_space<vmem>>, vector<2x32xf32>,
    %c7_i32_191 = arith.constant 7 : i32
    %c2_i32_192 = arith.constant 2 : i32
    %618 = arith.muli %c7_i32_191, %c2_i32_192 : i32
    %c7_i32_193 = arith.constant 7 : i32
    %619 = arith.subi %c7_i32_193, %c7_i32_191 : i32
    %c2_i32_194 = arith.constant 2 : i32
    %620 = arith.muli %619, %c2_i32_194 : i32
    %621 = arith.index_cast %618 : i32 to index
    %c0_195 = arith.constant 0 : index
    %622 = vector.load %arg11[%621, %c0_195] : memref<16x256xf32, #tpu.memory_space<vmem>>, vector<2x128xf32>
    %623 = arith.index_cast %620 : i32 to index
    %c128_196 = arith.constant 128 : index
    %624 = vector.load %arg11[%623, %c128_196] : memref<16x256xf32, #tpu.memory_space<vmem>>, vector<2x128xf32>
    %c0_197 = arith.constant 0 : index
    %c0_198 = arith.constant 0 : index
    %625 = vector.load %arg6[%c0_197, %c0_198] : memref<64x256xf32, #tpu.memory_space<vmem>>, vector<64x256xf32>
    %cst_199 = arith.constant dense<0.000000e+00> : vector<2x256xf32>
    %626 = tpu.matmul %611, %625, %cst_199 {dimension_numbers = #tpu.dot_dimension_numbers<[1], [0], [0], [1], [0, 0, 1, 1], [], []>} : vector<2x64xf32>, vector<64x256xf32>, vector<2x256xf32> -> vector<2x256xf32>
    %627 = tpu.concatenate %622, %624 in 1 : vector<2x128xf32>, vector<2x128xf32> -> vector<2x256xf32>
    %628 = arith.addf %627, %626 : vector<2x256xf32>
    %629 = arith.negf %628 : vector<2x256xf32>
    %630 = math.exp %629 : vector<2x256xf32>
    %cst_200 = arith.constant 1.000000e+00 : f32
    %631 = vector.broadcast %cst_200 : f32 to vector<2x256xf32>
    %632 = arith.addf %631, %630 : vector<2x256xf32>
    %633 = arith.divf %631, %632 : vector<2x256xf32>
    %634 = math.tanh %628 : vector<2x256xf32>
    %635 = vector.extract_strided_slice %633 {offsets = [0, 0], sizes = [2, 32], strides = [1, 1]} : vector<2x256xf32> to vector<2x32xf32>
    %636 = vector.extract_strided_slice %633 {offsets = [0, 128], sizes = [2, 32], strides = [1, 1]} : vector<2x256xf32> to vector<2x32xf32>
    %637 = tpu.concatenate %635, %636 in 1 : vector<2x32xf32>, vector<2x32xf32> -> vector<2x64xf32>
    %638 = vector.extract_strided_slice %633 {offsets = [0, 32], sizes = [2, 32], strides = [1, 1]} : vector<2x256xf32> to vector<2x32xf32>
    %639 = vector.extract_strided_slice %633 {offsets = [0, 160], sizes = [2, 32], strides = [1, 1]} : vector<2x256xf32> to vector<2x32xf32>
    %640 = tpu.concatenate %638, %639 in 1 : vector<2x32xf32>, vector<2x32xf32> -> vector<2x64xf32>
    %641 = vector.extract_strided_slice %634 {offsets = [0, 64], sizes = [2, 32], strides = [1, 1]} : vector<2x256xf32> to vector<2x32xf32>
    %642 = vector.extract_strided_slice %634 {offsets = [0, 192], sizes = [2, 32], strides = [1, 1]} : vector<2x256xf32> to vector<2x32xf32>
    %643 = tpu.concatenate %641, %642 in 1 : vector<2x32xf32>, vector<2x32xf32> -> vector<2x64xf32>
    %644 = vector.extract_strided_slice %633 {offsets = [0, 96], sizes = [2, 32], strides = [1, 1]} : vector<2x256xf32> to vector<2x32xf32>
    %645 = vector.extract_strided_slice %633 {offsets = [0, 224], sizes = [2, 32], strides = [1, 1]} : vector<2x256xf32> to vector<2x32xf32>
    %646 = tpu.concatenate %644, %645 in 1 : vector<2x32xf32>, vector<2x32xf32> -> vector<2x64xf32>
    %647 = arith.mulf %640, %609 : vector<2x64xf32>
    %648 = arith.mulf %637, %643 : vector<2x64xf32>
    %649 = arith.addf %647, %648 : vector<2x64xf32>
    %650 = math.tanh %649 : vector<2x64xf32>
    %651 = arith.mulf %646, %650 : vector<2x64xf32>
    %652 = vector.extract_strided_slice %651 {offsets = [0, 0], sizes = [2, 32], strides = [1, 1]} : vector<2x64xf32> to vector<2x32xf32>
    %653 = arith.index_cast %618 : i32 to index
    %c0_201 = arith.constant 0 : index
    %654 = vector.load %arg12[%653, %c0_201] : memref<16x32xf32, #tpu.memory_space<vmem>>, vector<2x32xf32>
    tpu.vector_store %arg12[%653, %c0_201], %652 {strides = array<i32>} : memref<16x32xf32, #tpu.memory_space<vmem>>, vector<2x32xf32>,
    %655 = vector.extract_strided_slice %651 {offsets = [0, 32], sizes = [2, 32], strides = [1, 1]} : vector<2x64xf32> to vector<2x32xf32>
    %656 = arith.index_cast %620 : i32 to index
    %c0_202 = arith.constant 0 : index
    %657 = vector.load %arg13[%656, %c0_202] : memref<16x32xf32, #tpu.memory_space<vmem>>, vector<2x32xf32>
    tpu.vector_store %arg13[%656, %c0_202], %655 {strides = array<i32>} : memref<16x32xf32, #tpu.memory_space<vmem>>, vector<2x32xf32>,
    %c8_i32_203 = arith.constant 8 : i32
    %c0_204 = arith.constant 0 : index
    %c0_205 = arith.constant 0 : index
    %658 = vector.load %arg12[%c0_204, %c0_205] : memref<16x32xf32, #tpu.memory_space<vmem>>, vector<16x32xf32>
    %c0_206 = arith.constant 0 : index
    %c0_207 = arith.constant 0 : index
    %659 = vector.load %arg13[%c0_206, %c0_207] : memref<16x32xf32, #tpu.memory_space<vmem>>, vector<16x32xf32>
    %660 = tpu.concatenate %658, %659 in 1 : vector<16x32xf32>, vector<16x32xf32> -> vector<16x64xf32>
    %c0_208 = arith.constant 0 : index
    %c0_209 = arith.constant 0 : index
    %661 = vector.load %arg8[%c0_208, %c0_209] : memref<64x32xf32, #tpu.memory_space<vmem>>, vector<64x32xf32>
    %cst_210 = arith.constant dense<0.000000e+00> : vector<16x32xf32>
    %662 = tpu.matmul %660, %661, %cst_210 {dimension_numbers = #tpu.dot_dimension_numbers<[1], [0], [0], [1], [0, 0, 1, 1], [], []>} : vector<16x64xf32>, vector<64x32xf32>, vector<16x32xf32> -> vector<16x32xf32>
    %c0_211 = arith.constant 0 : index
    %c0_212 = arith.constant 0 : index
    %663 = vector.load %arg9[%c0_211, %c0_212] : memref<1x32xf32, #tpu.memory_space<vmem>>, vector<1x32xf32>
    %664 = vector.broadcast %663 : vector<1x32xf32> to vector<16x32xf32>
    %665 = arith.addf %662, %664 : vector<16x32xf32>
    %c0_213 = arith.constant 0 : index
    %c0_214 = arith.constant 0 : index
    %666 = vector.load %arg10[%c0_213, %c0_214] : memref<16x32xf32, #tpu.memory_space<vmem>>, vector<16x32xf32>
    tpu.vector_store %arg10[%c0_213, %c0_214], %665 {strides = array<i32>} : memref<16x32xf32, #tpu.memory_space<vmem>>, vector<16x32xf32>,
    return
  }
  func.func @transform_0(%arg0: i32) -> (i32, i32) {
    %c0_i32 = arith.constant 0 : i32
    %c0_i32_0 = arith.constant 0 : i32
    %c0_i32_1 = arith.constant 0 : i32
    return %c0_i32, %c0_i32_0 : i32, i32
  }
  func.func @transform_1(%arg0: i32) -> (i32, i32) {
    %c0_i32 = arith.constant 0 : i32
    %c0_i32_0 = arith.constant 0 : i32
    %c0_i32_1 = arith.constant 0 : i32
    return %c0_i32, %c0_i32_0 : i32, i32
  }
  func.func @transform_2(%arg0: i32) -> (i32, i32) {
    %c0_i32 = arith.constant 0 : i32
    %c0_i32_0 = arith.constant 0 : i32
    %c0_i32_1 = arith.constant 0 : i32
    return %c0_i32, %c0_i32_0 : i32, i32
  }
  func.func @transform_3(%arg0: i32) -> (i32, i32) {
    %c0_i32 = arith.constant 0 : i32
    %c0_i32_0 = arith.constant 0 : i32
    %c0_i32_1 = arith.constant 0 : i32
    return %c0_i32, %c0_i32_0 : i32, i32
  }
  func.func @transform_4(%arg0: i32) -> (i32, i32) {
    %c0_i32 = arith.constant 0 : i32
    %c0_i32_0 = arith.constant 0 : i32
    %c0_i32_1 = arith.constant 0 : i32
    return %c0_i32, %c0_i32_0 : i32, i32
  }
  func.func @transform_5(%arg0: i32) -> (i32, i32) {
    %c0_i32 = arith.constant 0 : i32
    %c0_i32_0 = arith.constant 0 : i32
    %c0_i32_1 = arith.constant 0 : i32
    return %c0_i32, %c0_i32_0 : i32, i32
  }
  func.func @transform_6(%arg0: i32) -> (i32, i32) {
    %c0_i32 = arith.constant 0 : i32
    %c0_i32_0 = arith.constant 0 : i32
    %c0_i32_1 = arith.constant 0 : i32
    return %c0_i32, %c0_i32_0 : i32, i32
  }
  func.func @transform_7(%arg0: i32) -> (i32, i32) {
    %c0_i32 = arith.constant 0 : i32
    %c0_i32_0 = arith.constant 0 : i32
    %c0_i32_1 = arith.constant 0 : i32
    return %c0_i32, %c0_i32_0 : i32, i32
  }
  func.func @transform_8(%arg0: i32) -> (i32, i32) {
    %c0_i32 = arith.constant 0 : i32
    %c0_i32_0 = arith.constant 0 : i32
    %c0_i32_1 = arith.constant 0 : i32
    return %c0_i32, %c0_i32_0 : i32, i32
  }
  func.func @transform_9(%arg0: i32) -> (i32, i32) {
    %c0_i32 = arith.constant 0 : i32
    %c0_i32_0 = arith.constant 0 : i32
    %c0_i32_1 = arith.constant 0 : i32
    return %c0_i32, %c0_i32_0 : i32, i32
  }
}

</mosaic_0001>

<bundles_post_ra>
// kernel: tpu_custom_call.1
= control target key start
LH: loop header
LB: loop body
LE: loop exit
PB: predicated region body
PF: predicated region fallthrough
CT: control target
= control target key end

     0   :  { %14 = vsyncpa [#allocation6], 0  ;;  %s4285_s0 = inlined_call_operand.vmem [shape: f32[16,16], index: 0, kind: input, shape index: {}]   ;;  %s4286_s1 = inlined_call_operand.vmem [shape: f32[16,256], index: 1, kind: input, shape index: {}]   ;;  %s4287_s2 = inlined_call_operand.hbm [shape: f32[64,256], index: 2, kind: input, shape index: {}]   ;;  %s4288_s3 = inlined_call_operand.vmem [shape: f32[1,256], index: 3, kind: input, shape index: {}]   ;;  %s4289_s4 = inlined_call_operand.hbm [shape: f32[64,256], index: 4, kind: input, shape index: {}]   ;;  %s4290_s5 = inlined_call_operand.hbm [shape: f32[64,256], index: 5, kind: input, shape index: {}]   ;;  %s4291_s6 = inlined_call_operand.vmem [shape: f32[1,256], index: 6, kind: input, shape index: {}]   ;;  %s4292_s7 = inlined_call_operand.vmem [shape: f32[64,32], index: 7, kind: input, shape index: {}]   ;;  %s4293_s8 = inlined_call_operand.vmem [shape: f32[1,32], index: 8, kind: input, shape index: {}]   ;;  %s4294_s9 = inlined_call_operand.hbm [shape: f32[16,32], index: 9, kind: output, shape index: {}]  }
   0x1   :  { %15 = vsyncpa [#allocation9], 0 }
   0x2   :  { %16 = vsyncpa [#allocation7], 0  ;;  %s3624_s30 = smov [#allocation8]   ;;  %s3625_s11 = smov [#allocation5]  }
   0x3   :  { %s40_s10 = sshll.u32 %s3624_s30, 4  ;;  %s26_s12 = sshll.u32 %s3625_s11, 4  ;;  %s41_s10 = int_to_ptr.vmem [resolvable:$true] %s40_s10  ;;  %s3686_s12 = int_to_ptr.vmem [resolvable:$true] %s26_s12 }
   0x4   :  { %s3530_s15 = scalar_lea.hbm %s4289_s4, 2048 }
   0x5   :  { %p3531_p0 = scmp.ne.s32.totalorder %s4289_s4, %s3530_s15  ;;  %p3534_p1 = scmp.lt.u32.totalorder %s3530_s15, %s4289_s4 }
   0x7   :  { %p3536_p2 = pnand %p3534_p1, %p3531_p0 }
   0x9   :  { %3539 = shalt.err (!%p3536_p2)
}
   0xa   :  { %s3540_s20 = scalar_lea.vmem %s41_s10, 2048  ;;  %p3545_p4 = scmp.lt.s32.totalorder %s41_s10, %s41_s10 }
   0xb   :  { %p3541_p3 = scmp.ne.s32.totalorder %s41_s10, %s3540_s20  ;;  %p3546_p5 = scmp.lt.s32.totalorder %s3540_s20, %s3540_s20 }
   0xd   :  { %p3547_p6 = por %p3546_p5, %p3545_p4 }
   0xf   :  { %p3548_p7 = pnand %p3547_p6, %p3541_p3 }
  0x11   :  { %3551 = shalt.err (!%p3548_p7)
}
  0x12   :  { %s3626_s21 = smov 256   ;;  %s3627_s22 = smov 16  }
  0x13   :  { %46 = dma.hbm_to_vmem [thread:$0]  %s4289_s4, 2048, %s41_s10, [#allocation9], %s3626_s21, %s3626_s21, %s3627_s22  }
  0x14   :  { %s3552_s27 = scalar_lea.hbm %s4287_s2, 2048 }
  0x15   :  { %p3553_p8 = scmp.ne.s32.totalorder %s4287_s2, %s3552_s27  ;;  %p3556_p9 = scmp.lt.u32.totalorder %s3552_s27, %s4287_s2 }
  0x17   :  { %p3558_p10 = pnand %p3556_p9, %p3553_p8 }
  0x19   :  { %3561 = shalt.err (!%p3558_p10)
}
  0x1a   :  { %s3562_s13 = scalar_lea.vmem %s3686_s12, 2048  ;;  %p3567_p12 = scmp.lt.s32.totalorder %s3686_s12, %s3686_s12 }
  0x1b   :  { %p3563_p11 = scmp.ne.s32.totalorder %s3686_s12, %s3562_s13  ;;  %p3568_p13 = scmp.lt.s32.totalorder %s3562_s13, %s3562_s13 }
  0x1d   :  { %p3569_p0 = por %p3568_p13, %p3567_p12 }
  0x1f   :  { %p3570_p1 = pnand %p3569_p0, %p3563_p11 }
  0x21   :  { %3573 = shalt.err (!%p3570_p1)
}
  0x22   :  { %32 = dma.hbm_to_vmem [thread:$0]  %s4287_s2, 2048, %s3686_s12, [#allocation6], %s3626_s21, %s3626_s21, %s3627_s22  }
  0x23   :  { %s3628_s14 = smov [#allocation10]   ;;  %s3574_s18 = scalar_lea.hbm %s4290_s5, 2048 }
  0x24   :  { %s52_s15 = sshll.u32 %s3628_s14, 4  ;;  %p3575_p2 = scmp.ne.s32.totalorder %s4290_s5, %s3574_s18  ;;  %s53_s15 = int_to_ptr.vmem [resolvable:$true] %s52_s15 }
  0x25   :  { %p3578_p3 = scmp.lt.u32.totalorder %s3574_s18, %s4290_s5 }
  0x27   :  { %p3580_p4 = pnand %p3578_p3, %p3575_p2 }
  0x29   :  { %3583 = shalt.err (!%p3580_p4)
}
  0x2a   :  { %s3584_s25 = scalar_lea.vmem %s53_s15, 2048  ;;  %p3589_p6 = scmp.lt.s32.totalorder %s53_s15, %s53_s15 }
  0x2b   :  { %p3585_p5 = scmp.ne.s32.totalorder %s53_s15, %s3584_s25  ;;  %p3590_p7 = scmp.lt.s32.totalorder %s3584_s25, %s3584_s25 }
  0x2d   :  { %p3591_p8 = por %p3590_p7, %p3589_p6 }
  0x2f   :  { %p3592_p9 = pnand %p3591_p8, %p3585_p5 }
  0x31   :  { %3595 = shalt.err (!%p3592_p9)
}
  0x32   :  { %58 = dma.hbm_to_vmem [thread:$0]  %s4290_s5, 2048, %s53_s15, [#allocation9], %s3626_s21, %s3626_s21, %s3627_s22  }
  0x33   :  { %3618 = dma.done.wait [#allocation6], 2048  }
  0x34   :  { %3619 = vsyncadd [#allocation6], 4294965248 }
  0x35   :  { %3620 = dma.done.wait [#allocation9], 4096  }
  0x36   :  { %3621 = vsyncadd [#allocation9], 4294963200  ;;  %v3629_v0 = vmov 0.0   ;;  %v77_v1 = vld [vmem:[%s4286_s1 + $0x8] sm:$0xff]  ;;  %v79_v2 = vld [vmem:[%s4286_s1 + $0x18] sm:$0xff]  ;;  %vm92_vm0 = vcmask 130048   ;;  %v82_v33 = vlaneseq }
  0x37   :  { %163 = vmatprep.mubr.f32.mxu0 %v3629_v0  ;;  %266 = vmatprep.mubr.f32.mxu1 %v3629_v0  ;;  %v183_v3 = vld [vmem:[#allocation5 + $0x8] sm:$0xff]  ;;  %v3002_v4 = vpack.c.bf16 %v79_v2, %v77_v1  ;;  %v185_v5 = vld [vmem:[#allocation5 + $0x18] sm:$0xff]  ;;  %v76_v6 = vld [vmem:[%s4286_s1] sm:$0xff]  ;;  %s3631_s14 = smov 96   ;;  %s3632_s15 = smov 32   ;;  %vm296_vm1 = vcmask 261120  }
  0x38   :  { %v78_v7 = vld [vmem:[%s4286_s1 + $0x10] sm:$0xff]  ;;  %v3752_v8 = vpack.c.bf16 %v185_v5, %v183_v3  ;;  %v182_v10 = vld [vmem:[#allocation5] sm:$0xff]  ;;  %v187_v13 = vld [vmem:[#allocation5 + $0x28] sm:$0xff]  ;;  %v3806_v34 = vshrl.u32 %v82_v33, 7  ;;  %vm324_vm2 = vcmask 254976   ;;  %vm198_vm3 = vcmask 523264  }
  0x39   :  { %v3004_v9 = vpack.c.bf16 %v78_v7, %v76_v6  ;;  %v184_v11 = vld [vmem:[#allocation5 + $0x10] sm:$0xff]  ;;  %3003 = vmatprep.subr.bf16.mxu0 %v3002_v4  ;;  %v189_v14 = vld [vmem:[#allocation5 + $0x38] sm:$0xff]  ;;  %v186_v15 = vld [vmem:[#allocation5 + $0x20] sm:$0xff]  ;;  %vm481_vm4 = vcmask 257026   ;;  %vm639_vm5 = vcmask 259076   ;;  %vm797_vm6 = vcmask 261126  }
  0x3a   :  { %v3754_v12 = vpack.c.bf16 %v184_v11, %v182_v10  ;;  %3007 = vmatprep.subr.bf16.mxu1 %v3752_v8  ;;  %v74_v16 = vld [vmem:[%s4285_s0] sm:$0xff]  ;;  %v3760_v17 = vpack.c.bf16 %v189_v14, %v187_v13  ;;  %v188_v18 = vld [vmem:[#allocation5 + $0x30] sm:$0xff]  ;;  %v191_v19 = vld [vmem:[#allocation5 + $0x48] sm:$0xff]  ;;  %v84_v35 = vsub.s32 0, %v3806_v34  ;;  %v88_v37 = vsub.s32 1, %v3806_v34  ;;  %s3633_s11 = smov [#allocation11]  }
  0x3b   :  { %3005 = vmatpush1.bf16.msra.mxu0 %v3004_v9  ;;  %v3763_v20 = vpack.c.bf16 %v188_v18, %v186_v15  ;;  %v193_v21 = vld [vmem:[#allocation5 + $0x58] sm:$0xff]  ;;  %v190_v23 = vld [vmem:[#allocation5 + $0x40] sm:$0xff]  ;;  %v192_v24 = vld [vmem:[#allocation5 + $0x50] sm:$0xff]  ;;  %s2907_s13 = sshll.u32 %s3633_s11, 4  ;;  %s2908_s13 = int_to_ptr.vmem [resolvable:$true] %s2907_s13 }
  0x3c   :  { %3009 = vmatpush1.bf16.msra.mxu1 %v3754_v12  ;;  %3023 = vmatprep.subr.bf16.mxu0 %v3752_v8  ;;  %v3767_v22 = vpack.c.bf16 %v193_v21, %v191_v19  ;;  %v195_v25 = vld [vmem:[#allocation5 + $0x68] sm:$0xff]  ;;  %v197_v26 = vld [vmem:[#allocation5 + $0x78] sm:$0xff]  ;;  %v3776_v28 = vpack.c.bf16 %v192_v24, %v190_v23  ;;  %v194_v30 = vld [vmem:[#allocation5 + $0x60] sm:$0xff]  ;;  %s3596_s1 = scalar_lea.vmem %s2908_s13, 256  ;;  %p3601_p11 = scmp.lt.s32.totalorder %s2908_s13, %s2908_s13 }
  0x3d   :  { %3011 = vmatprep.subr.bf16.mxu1 %v3760_v17  ;;  %v75_v27 = vld [vmem:[%s4285_s0 + $0x8] sm:$0xff]  ;;  %v3780_v29 = vpack.c.bf16 %v197_v26, %v195_v25  ;;  %v196_v31 = vld [vmem:[#allocation5 + $0x70] sm:$0xff]  ;;  %v80_v36 = vld [vmem:[%s4288_s3] sm:$0x3]  ;;  %s3630_s3 = smov 64   ;;  %p3597_p10 = scmp.ne.s32.totalorder %s2908_s13, %s3596_s1 }
  0x3e   :  { %2920 = vmatmul.mubr.msk.f32.vlgmr.msra.gmra.mrb[0].mxu0 %vm92_vm0, %v74_v16  ;;  %v3786_v32 = vpack.c.bf16 %v196_v31, %v194_v30  ;;  %v85_v38 = vrot.slane %v80_v36, %v84_v35  ;;  %v89_v39 = vrot.slane %v80_v36, %v88_v37  ;;  %p3602_p12 = scmp.lt.s32.totalorder %s3596_s1, %s3596_s1 }
  0x3f   :  { %169 = vmatprep.mubr.f32.mxu0 %v3629_v0  ;;  %3025 = vmatpush1.bf16.msra.mxu0 %v3754_v12 }
  0x40   :  { %3013 = vmatpush1.bf16.msra.mxu1 %v3763_v20  ;;  %3027 = vmatprep.subr.bf16.mxu0 %v3760_v17  ;;  %p3603_p13 = por %p3602_p12, %p3601_p11 }
  0x41   :  { %3015 = vmatprep.subr.bf16.mxu1 %v3767_v22 }
  0x42   :  { %2921 = vmatmul.mubr.msk.f32.gmra.mrb[2].mxu0 %vm92_vm0, %v75_v27  ;;  %p3604_p0 = pnand %p3603_p13, %p3597_p10 }
  0x43   :  { %3029 = vmatpush1.bf16.msra.mxu0 %v3763_v20  ;;  %415 = vmatprep.mubr.f32.mxu0 %v3629_v0 }
  0x44   :  { %3017 = vmatpush1.bf16.msra.mxu1 %v3776_v28  ;;  %3031 = vmatprep.subr.bf16.mxu0 %v3767_v22 }
  0x45   :  { %3019 = vmatprep.subr.bf16.mxu1 %v3780_v29 }
  0x47   :  { %3033 = vmatpush1.bf16.msra.mxu0 %v3776_v28 }
  0x48   :  { %3021 = vmatpush1.bf16.msra.mxu1 %v3786_v32  ;;  %3035 = vmatprep.subr.bf16.mxu0 %v3780_v29 }
  0x49   :  { %3039 = vmatprep.subr.bf16.mxu1 %v3752_v8 }
  0x4b   :  { %267 = vmatmul.mubr.f32.vlgmr.msra.gmra.mrb[0].mxu1 %v3629_v0  ;;  %3037 = vmatpush1.bf16.msra.mxu0 %v3786_v32 }
  0x4c   :  { %3041 = vmatpush1.bf16.msra.mxu1 %v3754_v12  ;;  %573 = vmatprep.mubr.f32.mxu1 %v3629_v0 }
  0x4d   :  { %3043 = vmatprep.subr.bf16.mxu1 %v3760_v17  ;;  %3055 = vmatprep.subr.bf16.mxu0 %v3752_v8 }
  0x50   :  { %3045 = vmatpush1.bf16.msra.mxu1 %v3763_v20 }
  0x51   :  { %3047 = vmatprep.subr.bf16.mxu1 %v3767_v22 }
  0x54   :  { %3049 = vmatpush1.bf16.msra.mxu1 %v3776_v28 }
  0x55   :  { %3051 = vmatprep.subr.bf16.mxu1 %v3780_v29 }
  0x58   :  { %3053 = vmatpush1.bf16.msra.mxu1 %v3786_v32 }
  0x59   :  { %3071 = vmatprep.subr.bf16.mxu1 %v3752_v8 }
 0x111   :  { %v165_v40 = vpop.f32.mrb[0].mxu0 }
 0x112   :  { %v166_v41 = vadd.f32 %v165_v40, %v85_v38  ;;  %v167_v42 = vpop.f32.mrb[1].mxu0 }
 0x113   :  { %v168_v43 = vadd.f32 %v167_v42, %v89_v39 }
 0x114   :  { %176 = vst [vmem:[#allocation2] sm:$0xff] %v166_v41 }
 0x115   :  { %177 = vst [vmem:[#allocation2 + $0x8] sm:$0xff] %v168_v43  ;;  %v171_v44 = vpop.f32.mrb[2].mxu0 }
 0x116   :  { %v172_v45 = vadd.f32 %v171_v44, %v85_v38  ;;  %v173_v46 = vpop.f32.mrb[3].mxu0 }
 0x117   :  { %v174_v47 = vadd.f32 %v173_v46, %v89_v39 }
 0x118   :  { %178 = vst [vmem:[#allocation2 + $0x10] sm:$0xff] %v172_v45 }
 0x119   :  { %179 = vst [vmem:[#allocation2 + $0x18] sm:$0xff] %v174_v47 }
 0x11b   :  { %v180_v48 = vld [vmem:[#allocation2] sm:$0x3]  ;;  %v331_v26 = vld [vmem:[#allocation2] sm:$0xc] }
 0x11e   :  { %v268_v49 = vpop.f32.mrb[0].mxu1 }
 0x11f   :  { %v276_v50 = vadd.f32 %v268_v49, %v180_v48  ;;  %v270_v51 = vpop.f32.mrb[1].mxu1 }
 0x120   :  { %v181_v52 = vld [vmem:[#allocation2 + $0x18] sm:$0xc0]  ;;  %v332_v21 = vld [vmem:[#allocation2 + $0x18] sm:$0x30] }
 0x121   :  { %3306 = vtanh.f32 %v276_v50  ;;  %v274_v53 = vrot.slane %v181_v52, 6  ;;  %v2922_v54 = vmul.f32 -1.442695, %v276_v50  ;;  %v423_v27 = vrot.slane %v332_v21, 2 }
 0x123   :  { %v277_v55 = vadd.f32 %v274_v53, %v270_v51 }
 0x125   :  { %v2923_v56 = vmul.f32 -1.442695, %v277_v55  ;;  %3308 = vtanh.f32 %v277_v55 }
 0x126   :  { %3310 = vpow2.f32 %v2922_v54 }
 0x127   :  { %3312 = vpow2.f32 %v2923_v56 }
 0x12b   :  { %v3307_v57 = vpop.eup %3306 }
 0x12c   :  { %304 = vrot.lane.b32.xlu1 %v3307_v57, %s3630_s3 }
 0x12f   :  { %v3309_v58 = vpop.eup %3308 }
 0x130   :  { %v3311_v59 = vpop.eup %3310  ;;  %308 = vrot.lane.b32.xlu1 %v3309_v58, %s3631_s14 }
 0x131   :  { %v3313_v60 = vpop.eup %3312  ;;  %v284_v62 = vadd.f32 1.0, %v3311_v59 }
 0x132   :  { %v285_v61 = vadd.f32 1.0, %v3313_v60 }
 0x134   :  { %3314 = vrcp.f32 %v285_v61 }
 0x135   :  { %3316 = vrcp.f32 %v284_v62 }
 0x13e   :  { %v3315_v63 = vpop.eup %3314 }
 0x13f   :  { %293 = vrot.lane.b32.xlu0 %v3315_v63, %s3632_s15  ;;  %315 = vrot.lane.b32.xlu1 %v3315_v63, %s3630_s3  ;;  %v3317_v1 = vpop.eup %3316 }
 0x143   :  { %299 = vrot.lane.b32.xlu0 %v3317_v1, %s3631_s14 }
 0x147   :  { %312 = vrot.lane.b32.xlu0 %v3317_v1, %s3632_s15 }
 0x19e   :  { %v305_v2 = vpop.permute.xlu1 %304 }
 0x1a2   :  { %v309_v4 = vpop.permute.xlu1 %308 }
 0x1a3   :  { %v311_v7 = vsel %vm296_vm1, %v305_v2, %v309_v4 }
 0x1b1   :  { %v294_v3 = vpop.permute.xlu0 %293  ;;  %v316_v15 = vpop.permute.xlu1 %315 }
 0x1b2   :  { %v297_v5 = vsel %vm296_vm1, %v3317_v1, %v294_v3  ;;  %v489_v1 = vld [vmem:[#allocation2 + $0x18] sm:$0xc] }
 0x1b3   :  { %v320_v10 = vmul.f32 %v311_v7, %v297_v5  ;;  %v488_v5 = vld [vmem:[#allocation2] sm:$0x30] }
 0x1b5   :  { %v300_v6 = vpop.permute.xlu0 %299 }
 0x1b6   :  { %v302_v9 = vsel %vm296_vm1, %v300_v6, %v3315_v63  ;;  %v581_v6 = vrot.slane %v489_v1, 6 }
 0x1b7   :  { %v319_v11 = vmul.f32 0.0, %v302_v9 }
 0x1b9   :  { %v321_v13 = vadd.f32 %v320_v10, %v319_v11  ;;  %v313_v14 = vpop.permute.xlu0 %312 }
 0x1ba   :  { %v318_v18 = vsel %vm296_vm1, %v313_v14, %v316_v15 }
 0x1bb   :  { %3318 = vtanh.f32 %v321_v13  ;;  %v474_v51 = vrot.slane %v321_v13, 6 }
 0x1c5   :  { %v3319_v16 = vpop.eup %3318 }
 0x1c6   :  { %v3827_v19 = vmul.f32 %v3319_v16, %v318_v18 }
 0x1c8   :  { %325 = vst.msk [vmem:[#allocation3] sm:$0x3] %vm324_vm2, %v3827_v19  ;;  %2924 = vmatmul.mubr.msk.f32.vlgmr.msra.gmra.mrb[4].mxu0 %vm198_vm3, %v3827_v19 }
 0x1c9   :  { %3057 = vmatpush1.bf16.msra.mxu0 %v3754_v12  ;;  %731 = vmatprep.mubr.f32.mxu0 %v3629_v0 }
 0x1ca   :  { %3059 = vmatprep.subr.bf16.mxu0 %v3760_v17 }
 0x1cd   :  { %3061 = vmatpush1.bf16.msra.mxu0 %v3763_v20 }
 0x1ce   :  { %3063 = vmatprep.subr.bf16.mxu0 %v3767_v22 }
 0x1d1   :  { %3065 = vmatpush1.bf16.msra.mxu0 %v3776_v28 }
 0x1d2   :  { %3067 = vmatprep.subr.bf16.mxu0 %v3780_v29 }
 0x1d5   :  { %3069 = vmatpush1.bf16.msra.mxu0 %v3786_v32 }
 0x1d6   :  { %3087 = vmatprep.subr.bf16.mxu0 %v3752_v8 }
 0x29b   :  { %v417_v23 = vpop.f32.mrb[4].mxu0 }
 0x29c   :  { %v427_v24 = vrot.slane %v417_v23, 6  ;;  %v419_v25 = vpop.f32.mrb[5].mxu0 }
 0x29d   :  { %v428_v30 = vrot.slane %v419_v25, 6 }
 0x29e   :  { %v431_v31 = vadd.f32 %v427_v24, %v331_v26 }
 0x29f   :  { %v432_v33 = vadd.f32 %v428_v30, %v423_v27 }
 0x2a0   :  { %v2925_v36 = vmul.f32 -1.442695, %v431_v31 }
 0x2a1   :  { %v2926_v38 = vmul.f32 -1.442695, %v432_v33 }
 0x2a2   :  { %3320 = vpow2.f32 %v2925_v36 }
 0x2a3   :  { %3322 = vpow2.f32 %v2926_v38 }
 0x2ac   :  { %v3321_v39 = vpop.eup %3320 }
 0x2ad   :  { %v3323_v40 = vpop.eup %3322  ;;  %v439_v41 = vadd.f32 1.0, %v3321_v39 }
 0x2ae   :  { %v440_v42 = vadd.f32 1.0, %v3323_v40 }
 0x2af   :  { %3324 = vrcp.f32 %v439_v41 }
 0x2b0   :  { %3326 = vrcp.f32 %v440_v42 }
 0x2b1   :  { %3328 = vtanh.f32 %v432_v33 }
 0x2b2   :  { %3330 = vtanh.f32 %v431_v31 }
 0x2b9   :  { %v3325_v43 = vpop.eup %3324 }
 0x2ba   :  { %v3327_v44 = vpop.eup %3326  ;;  %453 = vrot.lane.b32.xlu1 %v3325_v43, %s3631_s14 }
 0x2bb   :  { %448 = vrot.lane.b32.xlu0 %v3327_v44, %s3632_s15  ;;  %v3329_v45 = vpop.eup %3328 }
 0x2bc   :  { %v3331_v46 = vpop.eup %3330 }
 0x2be   :  { %462 = vrot.lane.b32.xlu1 %v3329_v45, %s3631_s14 }
 0x2bf   :  { %458 = vrot.lane.b32.xlu0 %v3331_v46, %s3630_s3 }
 0x2c2   :  { %469 = vrot.lane.b32.xlu1 %v3327_v44, %s3630_s3 }
 0x2c3   :  { %466 = vrot.lane.b32.xlu0 %v3325_v43, %s3632_s15 }
 0x32c   :  { %v454_v47 = vpop.permute.xlu1 %453 }
 0x32d   :  { %v449_v48 = vpop.permute.xlu0 %448  ;;  %v456_v49 = vsel %vm296_vm1, %v454_v47, %v3327_v44 }
 0x32e   :  { %v451_v53 = vsel %vm296_vm1, %v3325_v43, %v449_v48  ;;  %v476_v55 = vmul.f32 %v474_v51, %v456_v49  ;;  %v647_v48 = vld [vmem:[#allocation2 + $0x18] sm:$0x3] }
 0x330   :  { %v463_v50 = vpop.permute.xlu1 %462 }
 0x331   :  { %v459_v52 = vpop.permute.xlu0 %458 }
 0x332   :  { %v465_v54 = vsel %vm296_vm1, %v459_v52, %v463_v50  ;;  %v646_v52 = vld [vmem:[#allocation2] sm:$0xc0] }
 0x333   :  { %v477_v56 = vmul.f32 %v465_v54, %v451_v53  ;;  %v739_v53 = vrot.slane %v647_v48, 2 }
 0x334   :  { %v470_v58 = vpop.permute.xlu1 %469 }
 0x335   :  { %v478_v57 = vadd.f32 %v477_v56, %v476_v55  ;;  %v467_v59 = vpop.permute.xlu0 %466 }
 0x336   :  { %v472_v61 = vsel %vm296_vm1, %v467_v59, %v470_v58 }
 0x337   :  { %3332 = vtanh.f32 %v478_v57  ;;  %v632_v31 = vrot.slane %v478_v57, 6 }
 0x341   :  { %v3333_v60 = vpop.eup %3332 }
 0x342   :  { %v3852_v62 = vmul.f32 %v3333_v60, %v472_v61 }
 0x344   :  { %482 = vst.msk [vmem:[#allocation3] sm:$0xc] %vm481_vm4, %v3852_v62  ;;  %v506_v63 = vrot.slane %v3852_v62, 2 }
 0x346   :  { %2927 = vmatmul.mubr.msk.f32.vlgmr.msra.gmra.mrb[2].mxu1 %vm198_vm3, %v506_v63 }
 0x347   :  { %3073 = vmatpush1.bf16.msra.mxu1 %v3754_v12  ;;  %889 = vmatprep.mubr.f32.mxu1 %v3629_v0 }
 0x348   :  { %3075 = vmatprep.subr.bf16.mxu1 %v3760_v17 }
 0x34b   :  { %3077 = vmatpush1.bf16.msra.mxu1 %v3763_v20 }
 0x34c   :  { %3079 = vmatprep.subr.bf16.mxu1 %v3767_v22 }
 0x34f   :  { %3081 = vmatpush1.bf16.msra.mxu1 %v3776_v28 }
 0x350   :  { %3083 = vmatprep.subr.bf16.mxu1 %v3780_v29 }
 0x353   :  { %3085 = vmatpush1.bf16.msra.mxu1 %v3786_v32 }
 0x354   :  { %3103 = vmatprep.subr.bf16.mxu1 %v3752_v8 }
 0x419   :  { %v575_v2 = vpop.f32.mrb[2].mxu1 }
 0x41a   :  { %v585_v3 = vrot.slane %v575_v2, 4  ;;  %v577_v4 = vpop.f32.mrb[3].mxu1 }
 0x41b   :  { %v586_v7 = vrot.slane %v577_v4, 4 }
 0x41c   :  { %v589_v9 = vadd.f32 %v585_v3, %v488_v5 }
 0x41d   :  { %v590_v10 = vadd.f32 %v586_v7, %v581_v6 }
 0x41e   :  { %v2928_v11 = vmul.f32 -1.442695, %v589_v9 }
 0x41f   :  { %v2929_v13 = vmul.f32 -1.442695, %v590_v10 }
 0x420   :  { %3334 = vpow2.f32 %v2928_v11 }
 0x421   :  { %3336 = vpow2.f32 %v2929_v13 }
 0x42a   :  { %v3335_v14 = vpop.eup %3334 }
 0x42b   :  { %v3337_v15 = vpop.eup %3336  ;;  %v597_v16 = vadd.f32 1.0, %v3335_v14 }
 0x42c   :  { %v598_v18 = vadd.f32 1.0, %v3337_v15 }
 0x42d   :  { %3338 = vrcp.f32 %v597_v16 }
 0x42e   :  { %3340 = vrcp.f32 %v598_v18 }
 0x42f   :  { %3342 = vtanh.f32 %v590_v10 }
 0x430   :  { %3344 = vtanh.f32 %v589_v9 }
 0x437   :  { %v3339_v8 = vpop.eup %3338 }
 0x438   :  { %v3341_v21 = vpop.eup %3340  ;;  %611 = vrot.lane.b32.xlu1 %v3339_v8, %s3631_s14 }
 0x439   :  { %606 = vrot.lane.b32.xlu0 %v3341_v21, %s3632_s15  ;;  %v3343_v23 = vpop.eup %3342 }
 0x43a   :  { %v3345_v24 = vpop.eup %3344 }
 0x43c   :  { %620 = vrot.lane.b32.xlu1 %v3343_v23, %s3631_s14 }
 0x43d   :  { %616 = vrot.lane.b32.xlu0 %v3345_v24, %s3630_s3 }
 0x440   :  { %627 = vrot.lane.b32.xlu1 %v3341_v21, %s3630_s3 }
 0x441   :  { %624 = vrot.lane.b32.xlu0 %v3339_v8, %s3632_s15 }
 0x4aa   :  { %v612_v25 = vpop.permute.xlu1 %611 }
 0x4ab   :  { %v607_v26 = vpop.permute.xlu0 %606  ;;  %v614_v27 = vsel %vm296_vm1, %v612_v25, %v3341_v21 }
 0x4ac   :  { %v609_v36 = vsel %vm296_vm1, %v3339_v8, %v607_v26  ;;  %v634_v39 = vmul.f32 %v632_v31, %v614_v27  ;;  %v805_v27 = vld [vmem:[#allocation2 + $0x8] sm:$0xc0] }
 0x4ae   :  { %v621_v30 = vpop.permute.xlu1 %620 }
 0x4af   :  { %v617_v33 = vpop.permute.xlu0 %616 }
 0x4b0   :  { %v623_v38 = vsel %vm296_vm1, %v617_v33, %v621_v30  ;;  %v804_v30 = vld [vmem:[#allocation2 + $0x10] sm:$0x3]  ;;  %v897_v33 = vrot.slane %v805_v27, 6 }
 0x4b1   :  { %v635_v40 = vmul.f32 %v623_v38, %v609_v36 }
 0x4b2   :  { %v628_v42 = vpop.permute.xlu1 %627 }
 0x4b3   :  { %v636_v41 = vadd.f32 %v635_v40, %v634_v39  ;;  %v625_v43 = vpop.permute.xlu0 %624 }
 0x4b4   :  { %v630_v45 = vsel %vm296_vm1, %v625_v43, %v628_v42 }
 0x4b5   :  { %3346 = vtanh.f32 %v636_v41  ;;  %v790_v10 = vrot.slane %v636_v41, 6 }
 0x4bf   :  { %v3347_v44 = vpop.eup %3346 }
 0x4c0   :  { %v3877_v46 = vmul.f32 %v3347_v44, %v630_v45 }
 0x4c2   :  { %640 = vst.msk [vmem:[#allocation3] sm:$0x30] %vm639_vm5, %v3877_v46  ;;  %v664_v47 = vrot.slane %v3877_v46, 4 }
 0x4c4   :  { %2930 = vmatmul.mubr.msk.f32.vlgmr.msra.gmra.mrb[6].mxu0 %vm198_vm3, %v664_v47 }
 0x4c5   :  { %3089 = vmatpush1.bf16.msra.mxu0 %v3754_v12  ;;  %1039 = vmatprep.mubr.f32.mxu0 %v3629_v0 }
 0x4c6   :  { %3091 = vmatprep.subr.bf16.mxu0 %v3760_v17 }
 0x4c9   :  { %3093 = vmatpush1.bf16.msra.mxu0 %v3763_v20 }
 0x4ca   :  { %3095 = vmatprep.subr.bf16.mxu0 %v3767_v22 }
 0x4cd   :  { %3097 = vmatpush1.bf16.msra.mxu0 %v3776_v28 }
 0x4ce   :  { %3099 = vmatprep.subr.bf16.mxu0 %v3780_v29 }
 0x4d1   :  { %3101 = vmatpush1.bf16.msra.mxu0 %v3786_v32 }
 0x597   :  { %v733_v49 = vpop.f32.mrb[6].mxu0 }
 0x598   :  { %v743_v50 = vrot.slane %v733_v49, 2  ;;  %v735_v51 = vpop.f32.mrb[7].mxu0 }
 0x599   :  { %v744_v54 = vrot.slane %v735_v51, 2 }
 0x59a   :  { %v747_v55 = vadd.f32 %v743_v50, %v646_v52 }
 0x59b   :  { %v748_v56 = vadd.f32 %v744_v54, %v739_v53 }
 0x59c   :  { %v2931_v57 = vmul.f32 -1.442695, %v747_v55 }
 0x59d   :  { %v2932_v58 = vmul.f32 -1.442695, %v748_v56 }
 0x59e   :  { %3348 = vpow2.f32 %v2931_v57 }
 0x59f   :  { %3350 = vpow2.f32 %v2932_v58 }
 0x5a8   :  { %v3349_v59 = vpop.eup %3348 }
 0x5a9   :  { %v3351_v60 = vpop.eup %3350  ;;  %v755_v61 = vadd.f32 1.0, %v3349_v59 }
 0x5aa   :  { %v756_v63 = vadd.f32 1.0, %v3351_v60  ;;  %v956_v60 = vld [vmem:[#allocation2 + $0x8] sm:$0x30] }
 0x5ab   :  { %3352 = vrcp.f32 %v755_v61 }
 0x5ac   :  { %3354 = vrcp.f32 %v756_v63 }
 0x5ad   :  { %3356 = vtanh.f32 %v748_v56 }
 0x5ae   :  { %3358 = vtanh.f32 %v747_v55 }
 0x5b5   :  { %v3353_v1 = vpop.eup %3352 }
 0x5b6   :  { %v3355_v2 = vpop.eup %3354  ;;  %769 = vrot.lane.b32.xlu1 %v3353_v1, %s3631_s14 }
 0x5b7   :  { %764 = vrot.lane.b32.xlu0 %v3355_v2, %s3632_s15  ;;  %v3357_v3 = vpop.eup %3356 }
 0x5b8   :  { %v3359_v4 = vpop.eup %3358 }
 0x5ba   :  { %778 = vrot.lane.b32.xlu1 %v3357_v3, %s3631_s14  ;;  %v1047_v3 = vrot.slane %v956_v60, 2  ;;  %v1272_v60 = vld [vmem:[#allocation5 + $0x10] sm:$0xff] }
 0x5bb   :  { %774 = vrot.lane.b32.xlu0 %v3359_v4, %s3630_s3 }
 0x5be   :  { %785 = vrot.lane.b32.xlu1 %v3355_v2, %s3630_s3 }
 0x5bf   :  { %782 = vrot.lane.b32.xlu0 %v3353_v1, %s3632_s15 }
 0x628   :  { %v770_v5 = vpop.permute.xlu1 %769 }
 0x629   :  { %v765_v6 = vpop.permute.xlu0 %764  ;;  %v772_v7 = vsel %vm296_vm1, %v770_v5, %v3355_v2  ;;  %v955_v2 = vld [vmem:[#allocation2 + $0x10] sm:$0xc] }
 0x62a   :  { %v767_v13 = vsel %vm296_vm1, %v3353_v1, %v765_v6  ;;  %v792_v15 = vmul.f32 %v790_v10, %v772_v7 }
 0x62c   :  { %v779_v9 = vpop.permute.xlu1 %778 }
 0x62d   :  { %v775_v11 = vpop.permute.xlu0 %774 }
 0x62e   :  { %v781_v14 = vsel %vm296_vm1, %v775_v11, %v779_v9 }
 0x62f   :  { %v793_v16 = vmul.f32 %v781_v14, %v767_v13 }
 0x630   :  { %v786_v8 = vpop.permute.xlu1 %785 }
 0x631   :  { %v794_v18 = vadd.f32 %v793_v16, %v792_v15  ;;  %v783_v21 = vpop.permute.xlu0 %782 }
 0x632   :  { %v788_v24 = vsel %vm296_vm1, %v783_v21, %v786_v8 }
 0x633   :  { %3360 = vtanh.f32 %v794_v18  ;;  %v942_v48 = vrot.slane %v794_v18, 6 }
 0x63d   :  { %v3361_v23 = vpop.eup %3360 }
 0x63e   :  { %v3901_v25 = vmul.f32 %v3361_v23, %v788_v24 }
 0x640   :  { %798 = vst.msk [vmem:[#allocation3] sm:$0xc0] %vm797_vm6, %v3901_v25  ;;  %v822_v26 = vrot.slane %v3901_v25, 6 }
 0x642   :  { %2933 = vmatmul.mubr.msk.f32.vlgmr.msra.gmra.mrb[4].mxu1 %vm198_vm3, %v822_v26 }
 0x643   :  { %3105 = vmatpush1.bf16.msra.mxu1 %v3754_v12  ;;  %1196 = vmatprep.mubr.f32.mxu1 %v3629_v0 }
 0x644   :  { %3107 = vmatprep.subr.bf16.mxu1 %v3760_v17 }
 0x647   :  { %3109 = vmatpush1.bf16.msra.mxu1 %v3763_v20 }
 0x648   :  { %3111 = vmatprep.subr.bf16.mxu1 %v3767_v22 }
 0x64b   :  { %3113 = vmatpush1.bf16.msra.mxu1 %v3776_v28 }
 0x64c   :  { %3115 = vmatprep.subr.bf16.mxu1 %v3780_v29 }
 0x64f   :  { %3117 = vmatpush1.bf16.msra.mxu1 %v3786_v32 }
 0x715   :  { %v891_v31 = vpop.f32.mrb[4].mxu1 }
 0x716   :  { %v899_v36 = vadd.f32 %v891_v31, %v804_v30  ;;  %v893_v12 = vpop.f32.mrb[5].mxu1 }
 0x717   :  { %v900_v38 = vadd.f32 %v897_v33, %v893_v12 }
 0x718   :  { %v2934_v39 = vmul.f32 -1.442695, %v899_v36 }
 0x719   :  { %v2935_v40 = vmul.f32 -1.442695, %v900_v38 }
 0x71a   :  { %3362 = vpow2.f32 %v2934_v39 }
 0x71b   :  { %3364 = vpow2.f32 %v2935_v40 }
 0x724   :  { %v3363_v17 = vpop.eup %3362 }
 0x725   :  { %v3365_v20 = vpop.eup %3364  ;;  %v907_v22 = vadd.f32 1.0, %v3363_v17 }
 0x726   :  { %v908_v41 = vadd.f32 1.0, %v3365_v20 }
 0x727   :  { %3366 = vrcp.f32 %v907_v22 }
 0x728   :  { %3368 = vrcp.f32 %v908_v41 }
 0x729   :  { %3370 = vtanh.f32 %v900_v38 }
 0x72a   :  { %3372 = vtanh.f32 %v899_v36 }
 0x731   :  { %v3367_v28 = vpop.eup %3366 }
 0x732   :  { %v3369_v29 = vpop.eup %3368  ;;  %921 = vrot.lane.b32.xlu1 %v3367_v28, %s3631_s14 }
 0x733   :  { %916 = vrot.lane.b32.xlu0 %v3369_v29, %s3632_s15  ;;  %v3371_v32 = vpop.eup %3370 }
 0x734   :  { %v3373_v42 = vpop.eup %3372 }
 0x736   :  { %930 = vrot.lane.b32.xlu1 %v3371_v32, %s3631_s14 }
 0x737   :  { %926 = vrot.lane.b32.xlu0 %v3373_v42, %s3630_s3 }
 0x73a   :  { %937 = vrot.lane.b32.xlu1 %v3369_v29, %s3630_s3 }
 0x73b   :  { %934 = vrot.lane.b32.xlu0 %v3367_v28, %s3632_s15 }
 0x7a4   :  { %v922_v43 = vpop.permute.xlu1 %921 }
 0x7a5   :  { %v917_v44 = vpop.permute.xlu0 %916  ;;  %v924_v45 = vsel %vm296_vm1, %v922_v43, %v3369_v29  ;;  %v1111_v43 = vld [vmem:[#allocation2 + $0x10] sm:$0x30] }
 0x7a6   :  { %v919_v50 = vsel %vm296_vm1, %v3367_v28, %v917_v44  ;;  %v944_v52 = vmul.f32 %v942_v48, %v924_v45  ;;  %v1112_v28 = vld [vmem:[#allocation2 + $0x8] sm:$0xc] }
 0x7a7   :  { %v1204_v44 = vrot.slane %v1112_v28, 6 }
 0x7a8   :  { %v931_v47 = vpop.permute.xlu1 %930 }
 0x7a9   :  { %v927_v49 = vpop.permute.xlu0 %926 }
 0x7aa   :  { %v933_v51 = vsel %vm296_vm1, %v927_v49, %v931_v47 }
 0x7ab   :  { %v945_v53 = vmul.f32 %v933_v51, %v919_v50 }
 0x7ac   :  { %v938_v55 = vpop.permute.xlu1 %937 }
 0x7ad   :  { %v946_v54 = vadd.f32 %v945_v53, %v944_v52  ;;  %v935_v56 = vpop.permute.xlu0 %934 }
 0x7ae   :  { %v940_v58 = vsel %vm296_vm1, %v935_v56, %v938_v55  ;;  %v1271_v55 = vld [vmem:[#allocation5 + $0x8] sm:$0xff]  ;;  %v1273_v56 = vld [vmem:[#allocation5 + $0x18] sm:$0xff] }
 0x7af   :  { %3374 = vtanh.f32 %v946_v54  ;;  %v1098_v27 = vrot.slane %v946_v54, 6 }
 0x7b9   :  { %v3375_v57 = vpop.eup %3374 }
 0x7ba   :  { %v3925_v59 = vmul.f32 %v3375_v57, %v940_v58  ;;  %v3118_v57 = vpack.c.bf16 %v1273_v56, %v1271_v55  ;;  %v1270_v58 = vld [vmem:[#allocation5] sm:$0xff] }
 0x7bc   :  { %949 = vst.msk [vmem:[#allocation3 + $0x8] sm:$0x3] %vm324_vm2, %v3925_v59  ;;  %2936 = vmatmul.mubr.msk.f32.vlgmr.msra.gmra.mrb[8].mxu0 %vm198_vm3, %v3925_v59  ;;  %3119 = vmatprep.subr.bf16.mxu0 %v3118_v57 }
 0x7bd   :  { %1353 = vmatprep.mubr.f32.mxu0 %v3629_v0 }
 0x88f   :  { %v1041_v61 = vpop.f32.mrb[8].mxu0 }
 0x890   :  { %v1051_v63 = vrot.slane %v1041_v61, 6  ;;  %v1043_v1 = vpop.f32.mrb[9].mxu0  ;;  %v3120_v61 = vpack.c.bf16 %v1272_v60, %v1270_v58 }
 0x891   :  { %v1052_v4 = vrot.slane %v1043_v1, 6 }
 0x892   :  { %v1055_v5 = vadd.f32 %v1051_v63, %v955_v2  ;;  %3121 = vmatpush1.bf16.msra.mxu0 %v3120_v61  ;;  %v1275_v2 = vld [vmem:[#allocation5 + $0x28] sm:$0xff] }
 0x893   :  { %v1056_v6 = vadd.f32 %v1052_v4, %v1047_v3  ;;  %v1277_v3 = vld [vmem:[#allocation5 + $0x38] sm:$0xff] }
 0x894   :  { %v2937_v7 = vmul.f32 -1.442695, %v1055_v5  ;;  %v3122_v4 = vpack.c.bf16 %v1277_v3, %v1275_v2 }
 0x895   :  { %v2938_v9 = vmul.f32 -1.442695, %v1056_v6 }
 0x896   :  { %3376 = vpow2.f32 %v2937_v7  ;;  %3123 = vmatprep.subr.bf16.mxu0 %v3122_v4 }
 0x897   :  { %3378 = vpow2.f32 %v2938_v9 }
 0x8a0   :  { %v3377_v10 = vpop.eup %3376 }
 0x8a1   :  { %v3379_v11 = vpop.eup %3378  ;;  %v1063_v13 = vadd.f32 1.0, %v3377_v10 }
 0x8a2   :  { %v1064_v14 = vadd.f32 1.0, %v3379_v11  ;;  %v1279_v11 = vld [vmem:[#allocation5 + $0x48] sm:$0xff] }
 0x8a3   :  { %3380 = vrcp.f32 %v1063_v13  ;;  %v1281_v13 = vld [vmem:[#allocation5 + $0x58] sm:$0xff] }
 0x8a4   :  { %3382 = vrcp.f32 %v1064_v14  ;;  %v3126_v14 = vpack.c.bf16 %v1281_v13, %v1279_v11 }
 0x8a5   :  { %3384 = vtanh.f32 %v1056_v6  ;;  %v1276_v6 = vld [vmem:[#allocation5 + $0x30] sm:$0xff] }
 0x8a6   :  { %3386 = vtanh.f32 %v1055_v5  ;;  %v1274_v5 = vld [vmem:[#allocation5 + $0x20] sm:$0xff] }
 0x8a7   :  { %v3124_v7 = vpack.c.bf16 %v1276_v6, %v1274_v5 }
 0x8a9   :  { %3125 = vmatpush1.bf16.msra.mxu0 %v3124_v7 }
 0x8aa   :  { %3127 = vmatprep.subr.bf16.mxu0 %v3126_v14 }
 0x8ad   :  { %v3381_v15 = vpop.eup %3380 }
 0x8ae   :  { %v3383_v16 = vpop.eup %3382  ;;  %1077 = vrot.lane.b32.xlu1 %v3381_v15, %s3631_s14 }
 0x8af   :  { %1072 = vrot.lane.b32.xlu0 %v3383_v16, %s3632_s15  ;;  %v3385_v18 = vpop.eup %3384 }
 0x8b0   :  { %v3387_v8 = vpop.eup %3386 }
 0x8b2   :  { %1086 = vrot.lane.b32.xlu1 %v3385_v18, %s3631_s14 }
 0x8b3   :  { %1082 = vrot.lane.b32.xlu0 %v3387_v8, %s3630_s3  ;;  %v1283_v8 = vld [vmem:[#allocation5 + $0x68] sm:$0xff] }
 0x8b6   :  { %1093 = vrot.lane.b32.xlu1 %v3383_v16, %s3630_s3 }
 0x8b7   :  { %1090 = vrot.lane.b32.xlu0 %v3381_v15, %s3632_s15 }
 0x920   :  { %v1078_v21 = vpop.permute.xlu1 %1077 }
 0x921   :  { %v1073_v23 = vpop.permute.xlu0 %1072  ;;  %v1080_v24 = vsel %vm296_vm1, %v1078_v21, %v3383_v16  ;;  %v1280_v16 = vld [vmem:[#allocation5 + $0x50] sm:$0xff]  ;;  %v1285_v21 = vld [vmem:[#allocation5 + $0x78] sm:$0xff] }
 0x922   :  { %v1075_v31 = vsel %vm296_vm1, %v3381_v15, %v1073_v23  ;;  %v1100_v36 = vmul.f32 %v1098_v27, %v1080_v24  ;;  %v1278_v15 = vld [vmem:[#allocation5 + $0x40] sm:$0xff]  ;;  %v3130_v23 = vpack.c.bf16 %v1285_v21, %v1283_v8 }
 0x923   :  { %v3128_v18 = vpack.c.bf16 %v1280_v16, %v1278_v15  ;;  %v1282_v24 = vld [vmem:[#allocation5 + $0x60] sm:$0xff] }
 0x924   :  { %v1087_v26 = vpop.permute.xlu1 %1086 }
 0x925   :  { %v1083_v30 = vpop.permute.xlu0 %1082  ;;  %3129 = vmatpush1.bf16.msra.mxu0 %v3128_v18 }
 0x926   :  { %v1089_v33 = vsel %vm296_vm1, %v1083_v30, %v1087_v26  ;;  %v1284_v26 = vld [vmem:[#allocation5 + $0x70] sm:$0xff]  ;;  %3131 = vmatprep.subr.bf16.mxu0 %v3130_v23 }
 0x927   :  { %v1101_v12 = vmul.f32 %v1089_v33, %v1075_v31  ;;  %v3132_v27 = vpack.c.bf16 %v1284_v26, %v1282_v24  ;;  %v1440_v26 = vld [vmem:[#allocation8 + $0x8] sm:$0xff] }
 0x928   :  { %v1094_v39 = vpop.permute.xlu1 %1093 }
 0x929   :  { %v3941_v38 = vadd.f32 %v1101_v12, %v1100_v36  ;;  %v1091_v40 = vpop.permute.xlu0 %1090  ;;  %3133 = vmatpush1.bf16.msra.mxu0 %v3132_v27  ;;  %v1442_v27 = vld [vmem:[#allocation8 + $0x18] sm:$0xff] }
 0x92a   :  { %v1096_v20 = vsel %vm296_vm1, %v1091_v40, %v1094_v39 }
 0x92b   :  { %3388 = vtanh.f32 %v3941_v38  ;;  %v1255_v12 = vrot.slane %v3941_v38, 6  ;;  %v1269_v38 = vld [vmem:[#allocation2 + $0x8] sm:$0x3] }
 0x935   :  { %v3389_v17 = vpop.eup %3388 }
 0x936   :  { %v3945_v22 = vmul.f32 %v3389_v17, %v1096_v20 }
 0x938   :  { %1105 = vst.msk [vmem:[#allocation3 + $0x8] sm:$0xc] %vm481_vm4, %v3945_v22  ;;  %v1129_v41 = vrot.slane %v3945_v22, 2 }
 0x93a   :  { %2939 = vmatmul.mubr.msk.f32.vlgmr.msra.gmra.mrb[6].mxu1 %vm198_vm3, %v1129_v41 }
 0x93b   :  { %1537 = vmatprep.mubr.f32.mxu1 %v3629_v0 }
 0xa0d   :  { %v1198_v29 = vpop.f32.mrb[6].mxu1 }
 0xa0e   :  { %v1208_v32 = vrot.slane %v1198_v29, 4  ;;  %v1200_v42 = vpop.f32.mrb[7].mxu1 }
 0xa0f   :  { %v1209_v45 = vrot.slane %v1200_v42, 4 }
 0xa10   :  { %v1212_v47 = vadd.f32 %v1208_v32, %v1111_v43 }
 0xa11   :  { %v1213_v48 = vadd.f32 %v1209_v45, %v1204_v44 }
 0xa12   :  { %v2940_v49 = vmul.f32 -1.442695, %v1212_v47 }
 0xa13   :  { %v2941_v50 = vmul.f32 -1.442695, %v1213_v48 }
 0xa14   :  { %3390 = vpow2.f32 %v2940_v49 }
 0xa15   :  { %3392 = vpow2.f32 %v2941_v50  ;;  %v1268_v50 = vld [vmem:[#allocation2 + $0x10] sm:$0xc0] }
 0xa1e   :  { %v3391_v51 = vpop.eup %3390 }
 0xa1f   :  { %v3393_v52 = vpop.eup %3392  ;;  %v1220_v53 = vadd.f32 1.0, %v3391_v51  ;;  %v1361_v51 = vrot.slane %v1269_v38, 2  ;;  %v1447_v38 = vld [vmem:[#allocation8 + $0x40] sm:$0xff] }
 0xa20   :  { %v1221_v54 = vadd.f32 1.0, %v3393_v52 }
 0xa21   :  { %3394 = vrcp.f32 %v1220_v53 }
 0xa22   :  { %3396 = vrcp.f32 %v1221_v54 }
 0xa23   :  { %3398 = vtanh.f32 %v1213_v48 }
 0xa24   :  { %3400 = vtanh.f32 %v1212_v47 }
 0xa2b   :  { %v3395_v63 = vpop.eup %3394 }
 0xa2c   :  { %v3397_v1 = vpop.eup %3396  ;;  %1234 = vrot.lane.b32.xlu1 %v3395_v63, %s3631_s14 }
 0xa2d   :  { %1229 = vrot.lane.b32.xlu0 %v3397_v1, %s3632_s15  ;;  %v3399_v9 = vpop.eup %3398 }
 0xa2e   :  { %v3401_v10 = vpop.eup %3400 }
 0xa30   :  { %1243 = vrot.lane.b32.xlu1 %v3399_v9, %s3631_s14 }
 0xa31   :  { %1239 = vrot.lane.b32.xlu0 %v3401_v10, %s3630_s3 }
 0xa34   :  { %1250 = vrot.lane.b32.xlu1 %v3397_v1, %s3630_s3 }
 0xa35   :  { %1247 = vrot.lane.b32.xlu0 %v3395_v63, %s3632_s15 }
 0xa9e   :  { %v1235_v30 = vpop.permute.xlu1 %1234 }
 0xa9f   :  { %v1230_v31 = vpop.permute.xlu0 %1229  ;;  %v1237_v33 = vsel %vm296_vm1, %v1235_v30, %v3397_v1  ;;  %v1439_v30 = vld [vmem:[#allocation8] sm:$0xff] }
 0xaa0   :  { %v1232_v40 = vsel %vm296_vm1, %v3395_v63, %v1230_v31  ;;  %v1257_v20 = vmul.f32 %v1255_v12, %v1237_v33  ;;  %v3134_v31 = vpack.c.bf16 %v1442_v27, %v1440_v26  ;;  %v1441_v33 = vld [vmem:[#allocation8 + $0x10] sm:$0xff]  ;;  %v1446_v12 = vld [vmem:[#allocation8 + $0x38] sm:$0xff]  ;;  %v1455_v27 = vld [vmem:[%s4291_s6] sm:$0x3] }
 0xaa2   :  { %v1244_v36 = vpop.permute.xlu1 %1243  ;;  %3135 = vmatprep.subr.bf16.mxu1 %v3134_v31  ;;  %v1464_v31 = vrot.slane %v1455_v27, %v88_v37 }
 0xaa3   :  { %v1240_v39 = vpop.permute.xlu0 %1239 }
 0xaa4   :  { %v1246_v17 = vsel %vm296_vm1, %v1240_v39, %v1244_v36  ;;  %v1444_v36 = vld [vmem:[#allocation8 + $0x28] sm:$0xff] }
 0xaa5   :  { %v1258_v41 = vmul.f32 %v1246_v17, %v1232_v40  ;;  %v3136_v40 = vpack.c.bf16 %v1441_v33, %v1439_v30  ;;  %v3138_v17 = vpack.c.bf16 %v1446_v12, %v1444_v36  ;;  %v1460_v30 = vrot.slane %v1455_v27, %v84_v35 }
 0xaa6   :  { %v1251_v29 = vpop.permute.xlu1 %1250 }
 0xaa7   :  { %v1259_v28 = vadd.f32 %v1258_v41, %v1257_v20  ;;  %v1248_v32 = vpop.permute.xlu0 %1247  ;;  %v1443_v20 = vld [vmem:[#allocation8 + $0x20] sm:$0xff]  ;;  %v1445_v41 = vld [vmem:[#allocation8 + $0x30] sm:$0xff]  ;;  %3137 = vmatpush1.bf16.msra.mxu1 %v3136_v40 }
 0xaa8   :  { %v1253_v43 = vsel %vm296_vm1, %v1248_v32, %v1251_v29  ;;  %v1450_v29 = vld [vmem:[#allocation8 + $0x58] sm:$0xff]  ;;  %v3140_v32 = vpack.c.bf16 %v1445_v41, %v1443_v20  ;;  %3139 = vmatprep.subr.bf16.mxu1 %v3138_v17 }
 0xaa9   :  { %3402 = vtanh.f32 %v1259_v28 }
 0xaab   :  { %3141 = vmatpush1.bf16.msra.mxu1 %v3140_v32 }
 0xab3   :  { %v3403_v42 = vpop.eup %3402 }
 0xab4   :  { %v1261_v44 = vmul.f32 %v3403_v42, %v1253_v43  ;;  %v1557_v42 = vld [vmem:[#allocation10 + $0x8] sm:$0xff]  ;;  %v1559_v43 = vld [vmem:[#allocation10 + $0x18] sm:$0xff] }
 0xab6   :  { %1262 = vst.msk [vmem:[#allocation3 + $0x8] sm:$0x30] %vm639_vm5, %v1261_v44  ;;  %v1286_v45 = vrot.slane %v1261_v44, 4 }
 0xab8   :  { %2942 = vmatmul.mubr.msk.f32.vlgmr.msra.gmra.mrb[10].mxu0 %vm198_vm3, %v1286_v45 }
 0xab9   :  { %1636 = vmatprep.mubr.f32.mxu0 %v3629_v0 }
 0xb8b   :  { %v1355_v47 = vpop.f32.mrb[10].mxu0 }
 0xb8c   :  { %v1365_v48 = vrot.slane %v1355_v47, 2  ;;  %v1357_v49 = vpop.f32.mrb[11].mxu0  ;;  %v1449_v47 = vld [vmem:[#allocation8 + $0x50] sm:$0xff] }
 0xb8d   :  { %v1366_v52 = vrot.slane %v1357_v49, 2  ;;  %v1558_v49 = vld [vmem:[#allocation10 + $0x10] sm:$0xff] }
 0xb8e   :  { %v1369_v53 = vadd.f32 %v1365_v48, %v1268_v50  ;;  %v3997_v48 = vpack.c.bf16 %v1559_v43, %v1557_v42 }
 0xb8f   :  { %v1370_v54 = vadd.f32 %v1366_v52, %v1361_v51  ;;  %v1452_v51 = vld [vmem:[#allocation8 + $0x68] sm:$0xff]  ;;  %v1454_v52 = vld [vmem:[#allocation8 + $0x78] sm:$0xff] }
 0xb90   :  { %v2943_v55 = vmul.f32 -1.442695, %v1369_v53  ;;  %3151 = vmatprep.subr.bf16.mxu0 %v3997_v48 }
 0xb91   :  { %v2944_v56 = vmul.f32 -1.442695, %v1370_v54 }
 0xb92   :  { %3404 = vpow2.f32 %v2943_v55  ;;  %v3144_v55 = vpack.c.bf16 %v1449_v47, %v1447_v38 }
 0xb93   :  { %3406 = vpow2.f32 %v2944_v56  ;;  %v3146_v56 = vpack.c.bf16 %v1454_v52, %v1452_v51 }
 0xb9c   :  { %v3405_v57 = vpop.eup %3404 }
 0xb9d   :  { %v3407_v58 = vpop.eup %3406  ;;  %v1377_v60 = vadd.f32 1.0, %v3405_v57  ;;  %v1451_v57 = vld [vmem:[#allocation8 + $0x60] sm:$0xff] }
 0xb9e   :  { %v1378_v61 = vadd.f32 1.0, %v3407_v58  ;;  %v1453_v58 = vld [vmem:[#allocation8 + $0x70] sm:$0xff] }
 0xb9f   :  { %3408 = vrcp.f32 %v1377_v60  ;;  %v3148_v60 = vpack.c.bf16 %v1453_v58, %v1451_v57 }
 0xba0   :  { %3410 = vrcp.f32 %v1378_v61  ;;  %v1560_v61 = vld [vmem:[#allocation10 + $0x20] sm:$0xff] }
 0xba1   :  { %3412 = vtanh.f32 %v1370_v54  ;;  %v1563_v54 = vld [vmem:[#allocation10 + $0x38] sm:$0xff] }
 0xba2   :  { %3414 = vtanh.f32 %v1369_v53  ;;  %v1561_v53 = vld [vmem:[#allocation10 + $0x28] sm:$0xff] }
 0xba9   :  { %v3409_v63 = vpop.eup %3408 }
 0xbaa   :  { %v3411_v1 = vpop.eup %3410  ;;  %1391 = vrot.lane.b32.xlu1 %v3409_v63, %s3631_s14 }
 0xbab   :  { %1386 = vrot.lane.b32.xlu0 %v3411_v1, %s3632_s15  ;;  %v3413_v2 = vpop.eup %3412 }
 0xbac   :  { %v3415_v3 = vpop.eup %3414 }
 0xbae   :  { %1400 = vrot.lane.b32.xlu1 %v3413_v2, %s3631_s14  ;;  %v1565_v2 = vld [vmem:[#allocation10 + $0x48] sm:$0xff] }
 0xbaf   :  { %1396 = vrot.lane.b32.xlu0 %v3415_v3, %s3630_s3  ;;  %v1567_v3 = vld [vmem:[#allocation10 + $0x58] sm:$0xff] }
 0xbb2   :  { %1407 = vrot.lane.b32.xlu1 %v3411_v1, %s3630_s3 }
 0xbb3   :  { %1404 = vrot.lane.b32.xlu0 %v3409_v63, %s3632_s15 }
 0xbb6   :  { %1107 = vrot.lane.b32.xlu1 %v3945_v22, %s3631_s14  ;;  %v1412_v22 = vrot.slane %v1259_v28, 6  ;;  %v1448_v28 = vld [vmem:[#allocation8 + $0x48] sm:$0xff] }
 0xbb7   :  { %951 = vrot.lane.b32.xlu0 %v3925_v59, %s3631_s14  ;;  %v3142_v45 = vpack.c.bf16 %v1450_v29, %v1448_v28 }
 0xbb9   :  { %3143 = vmatprep.subr.bf16.mxu1 %v3142_v45 }
 0xbba   :  { %484 = vrot.lane.b32.xlu1 %v3852_v62, %s3631_s14  ;;  %3145 = vmatpush1.bf16.msra.mxu1 %v3144_v55 }
 0xbbb   :  { %1264 = vrot.lane.b32.xlu0 %v1261_v44, %s3631_s14  ;;  %v1556_v44 = vld [vmem:[#allocation10] sm:$0xff]  ;;  %3147 = vmatprep.subr.bf16.mxu1 %v3146_v56 }
 0xbbc   :  { %v3999_v50 = vpack.c.bf16 %v1558_v49, %v1556_v44 }
 0xbbe   :  { %3153 = vmatpush1.bf16.msra.mxu0 %v3999_v50  ;;  %3149 = vmatpush1.bf16.msra.mxu1 %v3148_v60 }
 0xbbf   :  { %327 = vrot.lane.b32.xlu0 %v3827_v19, %s3631_s14  ;;  %3167 = vmatprep.subr.bf16.mxu1 %v3997_v48 }
 0xbc3   :  { %642 = vrot.lane.b32.xlu0 %v3877_v46, %s3631_s14 }
 0xc1c   :  { %v1392_v4 = vpop.permute.xlu1 %1391 }
 0xc1d   :  { %v1387_v5 = vpop.permute.xlu0 %1386  ;;  %v1394_v6 = vsel %vm296_vm1, %v1392_v4, %v3411_v1  ;;  %v4009_v4 = vpack.c.bf16 %v1567_v3, %v1565_v2 }
 0xc1e   :  { %v1389_v59 = vsel %vm296_vm1, %v3409_v63, %v1387_v5  ;;  %v1414_v62 = vmul.f32 %v1412_v22, %v1394_v6  ;;  %v1562_v63 = vld [vmem:[#allocation10 + $0x30] sm:$0xff]  ;;  %v1564_v6 = vld [vmem:[#allocation10 + $0x40] sm:$0xff] }
 0xc1f   :  { %v4007_v1 = vpack.c.bf16 %v1562_v63, %v1560_v61 }
 0xc20   :  { %v1401_v7 = vpop.permute.xlu1 %1400 }
 0xc21   :  { %v1397_v9 = vpop.permute.xlu0 %1396 }
 0xc22   :  { %v1403_v10 = vsel %vm296_vm1, %v1397_v9, %v1401_v7  ;;  %v1566_v7 = vld [vmem:[#allocation10 + $0x50] sm:$0xff]  ;;  %v1569_v9 = vld [vmem:[#allocation10 + $0x68] sm:$0xff] }
 0xc23   :  { %v1415_v11 = vmul.f32 %v1403_v10, %v1389_v59  ;;  %v4014_v22 = vpack.c.bf16 %v1566_v7, %v1564_v6  ;;  %v1571_v59 = vld [vmem:[#allocation10 + $0x78] sm:$0xff]  ;;  %v1568_v10 = vld [vmem:[#allocation10 + $0x60] sm:$0xff] }
 0xc24   :  { %v1408_v13 = vpop.permute.xlu1 %1407 }
 0xc25   :  { %v1416_v14 = vadd.f32 %v1415_v11, %v1414_v62  ;;  %v1405_v15 = vpop.permute.xlu0 %1404  ;;  %v4016_v62 = vpack.c.bf16 %v1571_v59, %v1569_v9  ;;  %v1570_v11 = vld [vmem:[#allocation10 + $0x70] sm:$0xff] }
 0xc26   :  { %v1410_v21 = vsel %vm296_vm1, %v1405_v15, %v1408_v13  ;;  %v4019_v13 = vpack.c.bf16 %v1570_v11, %v1568_v10 }
 0xc27   :  { %3416 = vtanh.f32 %v1416_v14 }
 0xc28   :  { %v1108_v19 = vpop.permute.xlu1 %1107 }
 0xc29   :  { %1110 = vst.msk [vmem:[#allocation4 + $0x2] sm:$0xc] %vm481_vm4, %v1108_v19  ;;  %v952_v46 = vpop.permute.xlu0 %951 }
 0xc2a   :  { %954 = vst.msk [vmem:[#allocation4 + $0x6] sm:$0x3] %vm324_vm2, %v952_v46 }
 0xc2c   :  { %v485_v16 = vpop.permute.xlu1 %484 }
 0xc2d   :  { %487 = vst.msk [vmem:[#allocation4 + $0xa] sm:$0xc] %vm481_vm4, %v485_v16  ;;  %v1265_v18 = vpop.permute.xlu0 %1264  ;;  %v1425_v16 = vld [vmem:[#allocation3] sm:$0xff] }
 0xc2e   :  { %1267 = vst.msk [vmem:[#allocation4 - $0x2] sm:$0x30] %vm639_vm5, %v1265_v18 }
 0xc31   :  { %v3417_v8 = vpop.eup %3416  ;;  %v328_v23 = vpop.permute.xlu0 %327 }
 0xc32   :  { %v1418_v24 = vmul.f32 %v3417_v8, %v1410_v21  ;;  %330 = vst.msk [vmem:[#allocation4 + $0xe] sm:$0x3] %vm324_vm2, %v328_v23 }
 0xc34   :  { %1419 = vst.msk [vmem:[#allocation3 + $0x8] sm:$0xc0] %vm797_vm6, %v1418_v24  ;;  %1421 = vrot.lane.b32.xlu1 %v1418_v24, %s3631_s14 }
 0xc35   :  { %v643_v39 = vpop.permute.xlu0 %642 }
 0xc36   :  { %645 = vst.msk [vmem:[#allocation4 + $0x6] sm:$0x30] %vm639_vm5, %v643_v39 }
 0xc38   :  { %800 = vrot.lane.b32.xlu1 %v3901_v25, %s3631_s14  ;;  %v4003_v25 = vpack.c.bf16 %v1563_v54, %v1561_v53 }
 0xc3a   :  { %3155 = vmatprep.subr.bf16.mxu0 %v4003_v25 }
 0xc3b   :  { %3157 = vmatpush1.bf16.msra.mxu0 %v4007_v1  ;;  %v1426_v21 = vld [vmem:[#allocation3 + $0x8] sm:$0xff] }
 0xc3c   :  { %3159 = vmatprep.subr.bf16.mxu0 %v4009_v4 }
 0xc3f   :  { %3161 = vmatpush1.bf16.msra.mxu0 %v4014_v22 }
 0xc40   :  { %3163 = vmatprep.subr.bf16.mxu0 %v4016_v62 }
 0xc43   :  { %3165 = vmatpush1.bf16.msra.mxu0 %v4019_v13 }
 0xc44   :  { %3183 = vmatprep.subr.bf16.mxu0 %v3997_v48 }
 0xc46   :  { %1637 = vmatmul.mubr.f32.vlgmr.msra.gmra.mrb[12].mxu0 %v3629_v0 }
 0xc47   :  { %3185 = vmatpush1.bf16.msra.mxu0 %v3999_v50  ;;  %1940 = vmatprep.mubr.f32.mxu0 %v3629_v0 }
 0xc48   :  { %3187 = vmatprep.subr.bf16.mxu0 %v4003_v25 }
 0xc4b   :  { %3189 = vmatpush1.bf16.msra.mxu0 %v4007_v1 }
 0xc4c   :  { %3191 = vmatprep.subr.bf16.mxu0 %v4009_v4 }
 0xc4f   :  { %3193 = vmatpush1.bf16.msra.mxu0 %v4014_v22 }
 0xc50   :  { %3195 = vmatprep.subr.bf16.mxu0 %v4016_v62 }
 0xc53   :  { %3197 = vmatpush1.bf16.msra.mxu0 %v4019_v13 }
 0xc54   :  { %3215 = vmatprep.subr.bf16.mxu0 %v3997_v48 }
 0xca6   :  { %v1422_v5 = vpop.permute.xlu1 %1421 }
 0xca7   :  { %1424 = vst.msk [vmem:[#allocation4 - $0x6] sm:$0xc0] %vm797_vm6, %v1422_v5 }
 0xcaa   :  { %v801_v14 = vpop.permute.xlu1 %800 }
 0xcab   :  { %803 = vst.msk [vmem:[#allocation4 + $0x2] sm:$0xc0] %vm797_vm6, %v801_v14 }
 0xcae   :  { %v1427_v15 = vld [vmem:[#allocation4] sm:$0xff] }
 0xcaf   :  { %1431 = vrot.lane.b32.xlu0 %v1427_v15, %s3632_s15 }
 0xcb2   :  { %v1428_v19 = vld [vmem:[#allocation4 + $0x8] sm:$0xff] }
 0xcb3   :  { %1433 = vrot.lane.b32.xlu1 %v1428_v19, %s3632_s15 }
 0xd19   :  { %v1638_v24 = vpop.f32.mrb[12].mxu0 }
 0xd1a   :  { %v1640_v26 = vpop.f32.mrb[13].mxu0 }
 0xd21   :  { %v1432_v46 = vpop.permute.xlu0 %1431 }
 0xd22   :  { %v1437_v18 = vsel %vm296_vm1, %v1425_v16, %v1432_v46 }
 0xd23   :  { %2945 = vmatmul.mubr.msk.f32.vlgmr.msra.gmra.mrb[8].mxu1 %vm198_vm3, %v1437_v18 }
 0xd24   :  { %1543 = vmatprep.mubr.f32.mxu1 %v3629_v0  ;;  %3169 = vmatpush1.bf16.msra.mxu1 %v3999_v50 }
 0xd25   :  { %v1434_v8 = vpop.permute.xlu1 %1433  ;;  %3171 = vmatprep.subr.bf16.mxu1 %v4003_v25 }
 0xd26   :  { %v1438_v23 = vsel %vm296_vm1, %v1426_v21, %v1434_v8 }
 0xd27   :  { %2946 = vmatmul.mubr.msk.f32.gmra.mrb[10].mxu1 %vm198_vm3, %v1438_v23 }
 0xd28   :  { %3173 = vmatpush1.bf16.msra.mxu1 %v4007_v1  ;;  %1783 = vmatprep.mubr.f32.mxu1 %v3629_v0 }
 0xd29   :  { %3175 = vmatprep.subr.bf16.mxu1 %v4009_v4 }
 0xd2c   :  { %3177 = vmatpush1.bf16.msra.mxu1 %v4014_v22 }
 0xd2d   :  { %3179 = vmatprep.subr.bf16.mxu1 %v4016_v62 }
 0xd30   :  { %3181 = vmatpush1.bf16.msra.mxu1 %v4019_v13 }
 0xd31   :  { %3199 = vmatprep.subr.bf16.mxu1 %v3997_v48 }
 0xdf6   :  { %v1539_v33 = vpop.f32.mrb[8].mxu1 }
 0xdf7   :  { %v1540_v36 = vadd.f32 %v1539_v33, %v1460_v30  ;;  %v1541_v12 = vpop.f32.mrb[9].mxu1 }
 0xdf8   :  { %v1542_v39 = vadd.f32 %v1541_v12, %v1464_v31 }
 0xdf9   :  { %1550 = vst [vmem:[#allocation2] sm:$0xff] %v1540_v36 }
 0xdfa   :  { %1551 = vst [vmem:[#allocation2 + $0x8] sm:$0xff] %v1542_v39  ;;  %v1545_v40 = vpop.f32.mrb[10].mxu1 }
 0xdfb   :  { %v1546_v17 = vadd.f32 %v1545_v40, %v1460_v30  ;;  %v1547_v20 = vpop.f32.mrb[11].mxu1 }
 0xdfc   :  { %v1548_v41 = vadd.f32 %v1547_v20, %v1464_v31 }
 0xdfd   :  { %1552 = vst [vmem:[#allocation2 + $0x10] sm:$0xff] %v1546_v17 }
 0xdfe   :  { %1553 = vst [vmem:[#allocation2 + $0x18] sm:$0xff] %v1548_v41 }
 0xe00   :  { %v1554_v28 = vld [vmem:[#allocation2] sm:$0x3]  ;;  %v1699_v15 = vld [vmem:[#allocation2] sm:$0xc] }
 0xe01   :  { %v1646_v29 = vadd.f32 %v1638_v24, %v1554_v28 }
 0xe03   :  { %v2947_v32 = vmul.f32 -1.442695, %v1646_v29 }
 0xe05   :  { %3418 = vpow2.f32 %v2947_v32  ;;  %v1555_v35 = vld [vmem:[#allocation2 + $0x18] sm:$0xc0]  ;;  %v1700_v59 = vld [vmem:[#allocation2 + $0x18] sm:$0x30] }
 0xe06   :  { %v1644_v42 = vrot.slane %v1555_v35, 6  ;;  %v1791_v19 = vrot.slane %v1700_v59, 2 }
 0xe08   :  { %v1647_v34 = vadd.f32 %v1644_v42, %v1640_v26 }
 0xe0a   :  { %v2948_v37 = vmul.f32 -1.442695, %v1647_v34 }
 0xe0c   :  { %3420 = vpow2.f32 %v2948_v37 }
 0xe0f   :  { %v3419_v43 = vpop.eup %3418 }
 0xe10   :  { %v1654_v44 = vadd.f32 1.0, %v3419_v43 }
 0xe12   :  { %3422 = vrcp.f32 %v1654_v44 }
 0xe13   :  { %3424 = vtanh.f32 %v1647_v34 }
 0xe16   :  { %v3421_v45 = vpop.eup %3420 }
 0xe17   :  { %v1655_v38 = vadd.f32 1.0, %v3421_v45 }
 0xe19   :  { %3426 = vrcp.f32 %v1655_v38 }
 0xe1a   :  { %3428 = vtanh.f32 %v1646_v29 }
 0xe1c   :  { %v3423_v47 = vpop.eup %3422 }
 0xe1d   :  { %1668 = vrot.lane.b32.xlu1 %v3423_v47, %s3631_s14  ;;  %v3425_v49 = vpop.eup %3424 }
 0xe21   :  { %1677 = vrot.lane.b32.xlu1 %v3425_v49, %s3631_s14 }
 0xe23   :  { %v3427_v51 = vpop.eup %3426 }
 0xe24   :  { %1663 = vrot.lane.b32.xlu0 %v3427_v51, %s3632_s15  ;;  %v3429_v52 = vpop.eup %3428 }
 0xe25   :  { %1684 = vrot.lane.b32.xlu1 %v3427_v51, %s3630_s3 }
 0xe28   :  { %1673 = vrot.lane.b32.xlu0 %v3429_v52, %s3630_s3 }
 0xe2c   :  { %1681 = vrot.lane.b32.xlu0 %v3423_v47, %s3632_s15 }
 0xe8f   :  { %v1669_v53 = vpop.permute.xlu1 %1668 }
 0xe90   :  { %v1671_v55 = vsel %vm296_vm1, %v1669_v53, %v3427_v51  ;;  %v1855_v53 = vld [vmem:[#allocation2] sm:$0x30] }
 0xe91   :  { %v1688_v61 = vmul.f32 0.0, %v1671_v55 }
 0xe93   :  { %v1678_v56 = vpop.permute.xlu1 %1677 }
 0xe96   :  { %v1664_v54 = vpop.permute.xlu0 %1663 }
 0xe97   :  { %v1666_v58 = vsel %vm296_vm1, %v3423_v47, %v1664_v54  ;;  %v1685_v5 = vpop.permute.xlu1 %1684  ;;  %v1856_v47 = vld [vmem:[#allocation2 + $0x18] sm:$0xc] }
 0xe98   :  { %v1948_v54 = vrot.slane %v1856_v47, 6 }
 0xe9a   :  { %v1674_v57 = vpop.permute.xlu0 %1673 }
 0xe9b   :  { %v1680_v60 = vsel %vm296_vm1, %v1674_v57, %v1678_v56 }
 0xe9c   :  { %v1689_v63 = vmul.f32 %v1680_v60, %v1666_v58 }
 0xe9e   :  { %v1690_v2 = vadd.f32 %v1689_v63, %v1688_v61  ;;  %v1682_v3 = vpop.permute.xlu0 %1681 }
 0xe9f   :  { %v1687_v7 = vsel %vm296_vm1, %v1682_v3, %v1685_v5 }
 0xea0   :  { %3430 = vtanh.f32 %v1690_v2  ;;  %v1842_v20 = vrot.slane %v1690_v2, 6 }
 0xeaa   :  { %v3431_v6 = vpop.eup %3430 }
 0xeab   :  { %v4068_v9 = vmul.f32 %v3431_v6, %v1687_v7 }
 0xead   :  { %1693 = vst.msk [vmem:[#allocation3] sm:$0x3] %vm324_vm2, %v4068_v9  ;;  %2949 = vmatmul.mubr.msk.f32.vlgmr.msra.gmra.mrb[12].mxu1 %vm198_vm3, %v4068_v9 }
 0xeae   :  { %3201 = vmatpush1.bf16.msra.mxu1 %v3999_v50  ;;  %2097 = vmatprep.mubr.f32.mxu1 %v3629_v0 }
 0xeaf   :  { %3203 = vmatprep.subr.bf16.mxu1 %v4003_v25 }
 0xeb2   :  { %3205 = vmatpush1.bf16.msra.mxu1 %v4007_v1 }
 0xeb3   :  { %3207 = vmatprep.subr.bf16.mxu1 %v4009_v4 }
 0xeb6   :  { %3209 = vmatpush1.bf16.msra.mxu1 %v4014_v22 }
 0xeb7   :  { %3211 = vmatprep.subr.bf16.mxu1 %v4016_v62 }
 0xeba   :  { %3213 = vmatpush1.bf16.msra.mxu1 %v4019_v13 }
 0xebb   :  { %3231 = vmatprep.subr.bf16.mxu1 %v3997_v48 }
 0xf80   :  { %v1785_v10 = vpop.f32.mrb[12].mxu1 }
 0xf81   :  { %v1795_v11 = vrot.slane %v1785_v10, 6  ;;  %v1787_v14 = vpop.f32.mrb[13].mxu1 }
 0xf82   :  { %v1796_v46 = vrot.slane %v1787_v14, 6 }
 0xf83   :  { %v1799_v16 = vadd.f32 %v1795_v11, %v1699_v15 }
 0xf84   :  { %v1800_v18 = vadd.f32 %v1796_v46, %v1791_v19 }
 0xf85   :  { %v2950_v8 = vmul.f32 -1.442695, %v1799_v16 }
 0xf86   :  { %v2951_v21 = vmul.f32 -1.442695, %v1800_v18 }
 0xf87   :  { %3432 = vpow2.f32 %v2950_v8 }
 0xf88   :  { %3434 = vpow2.f32 %v2951_v21 }
 0xf91   :  { %v3433_v23 = vpop.eup %3432 }
 0xf92   :  { %v3435_v24 = vpop.eup %3434  ;;  %v1807_v26 = vadd.f32 1.0, %v3433_v23 }
 0xf93   :  { %v1808_v27 = vadd.f32 1.0, %v3435_v24 }
 0xf94   :  { %3436 = vrcp.f32 %v1807_v26 }
 0xf95   :  { %3438 = vrcp.f32 %v1808_v27 }
 0xf96   :  { %3440 = vtanh.f32 %v1800_v18 }
 0xf97   :  { %3442 = vtanh.f32 %v1799_v16 }
 0xf9e   :  { %v3437_v30 = vpop.eup %3436 }
 0xf9f   :  { %v3439_v31 = vpop.eup %3438  ;;  %1821 = vrot.lane.b32.xlu1 %v3437_v30, %s3631_s14 }
 0xfa0   :  { %1816 = vrot.lane.b32.xlu0 %v3439_v31, %s3632_s15  ;;  %v3441_v33 = vpop.eup %3440 }
 0xfa1   :  { %v3443_v36 = vpop.eup %3442 }
 0xfa3   :  { %1830 = vrot.lane.b32.xlu1 %v3441_v33, %s3631_s14  ;;  %v2013_v33 = vld [vmem:[#allocation2 + $0x18] sm:$0x3] }
 0xfa4   :  { %1826 = vrot.lane.b32.xlu0 %v3443_v36, %s3630_s3 }
 0xfa7   :  { %1837 = vrot.lane.b32.xlu1 %v3439_v31, %s3630_s3 }
 0xfa8   :  { %1834 = vrot.lane.b32.xlu0 %v3437_v30, %s3632_s15 }
0x1011   :  { %v1822_v12 = vpop.permute.xlu1 %1821 }
0x1012   :  { %v1817_v39 = vpop.permute.xlu0 %1816  ;;  %v1824_v40 = vsel %vm296_vm1, %v1822_v12, %v3439_v31 }
0x1013   :  { %v1819_v28 = vsel %vm296_vm1, %v3437_v30, %v1817_v39  ;;  %v1844_v32 = vmul.f32 %v1842_v20, %v1824_v40  ;;  %v2012_v40 = vld [vmem:[#allocation2] sm:$0xc0] }
0x1015   :  { %v1831_v17 = vpop.permute.xlu1 %1830 }
0x1016   :  { %v1827_v41 = vpop.permute.xlu0 %1826 }
0x1017   :  { %v1833_v29 = vsel %vm296_vm1, %v1827_v41, %v1831_v17  ;;  %v2105_v17 = vrot.slane %v2013_v33, 2 }
0x1018   :  { %v1845_v35 = vmul.f32 %v1833_v29, %v1819_v28 }
0x1019   :  { %v1838_v34 = vpop.permute.xlu1 %1837 }
0x101a   :  { %v1846_v42 = vadd.f32 %v1845_v35, %v1844_v32  ;;  %v1835_v37 = vpop.permute.xlu0 %1834 }
0x101b   :  { %v1840_v44 = vsel %vm296_vm1, %v1835_v37, %v1838_v34 }
0x101c   :  { %3444 = vtanh.f32 %v1846_v42  ;;  %v1999_v15 = vrot.slane %v1846_v42, 6 }
0x1026   :  { %v3445_v43 = vpop.eup %3444 }
0x1027   :  { %v4093_v45 = vmul.f32 %v3445_v43, %v1840_v44 }
0x1029   :  { %1849 = vst.msk [vmem:[#allocation3] sm:$0xc] %vm481_vm4, %v4093_v45  ;;  %v1873_v38 = vrot.slane %v4093_v45, 2 }
0x102b   :  { %2952 = vmatmul.mubr.msk.f32.vlgmr.msra.gmra.mrb[14].mxu0 %vm198_vm3, %v1873_v38 }
0x102c   :  { %3217 = vmatpush1.bf16.msra.mxu0 %v3999_v50  ;;  %2254 = vmatprep.mubr.f32.mxu0 %v3629_v0 }
0x102d   :  { %3219 = vmatprep.subr.bf16.mxu0 %v4003_v25 }
0x1030   :  { %3221 = vmatpush1.bf16.msra.mxu0 %v4007_v1 }
0x1031   :  { %3223 = vmatprep.subr.bf16.mxu0 %v4009_v4 }
0x1034   :  { %3225 = vmatpush1.bf16.msra.mxu0 %v4014_v22 }
0x1035   :  { %3227 = vmatprep.subr.bf16.mxu0 %v4016_v62 }
0x1038   :  { %3229 = vmatpush1.bf16.msra.mxu0 %v4019_v13 }
0x1039   :  { %3247 = vmatprep.subr.bf16.mxu0 %v3997_v48 }
0x10fe   :  { %v1942_v49 = vpop.f32.mrb[14].mxu0 }
0x10ff   :  { %v1952_v51 = vrot.slane %v1942_v49, 4  ;;  %v1944_v52 = vpop.f32.mrb[15].mxu0 }
0x1100   :  { %v1953_v55 = vrot.slane %v1944_v52, 4 }
0x1101   :  { %v1956_v56 = vadd.f32 %v1952_v51, %v1855_v53 }
0x1102   :  { %v1957_v57 = vadd.f32 %v1953_v55, %v1948_v54 }
0x1103   :  { %v2953_v58 = vmul.f32 -1.442695, %v1956_v56 }
0x1104   :  { %v2954_v60 = vmul.f32 -1.442695, %v1957_v57 }
0x1105   :  { %3446 = vpow2.f32 %v2953_v58 }
0x1106   :  { %3448 = vpow2.f32 %v2954_v60 }
0x110f   :  { %v3447_v61 = vpop.eup %3446 }
0x1110   :  { %v3449_v63 = vpop.eup %3448  ;;  %v1964_v2 = vadd.f32 1.0, %v3447_v61 }
0x1111   :  { %v1965_v3 = vadd.f32 1.0, %v3449_v63 }
0x1112   :  { %3450 = vrcp.f32 %v1964_v2 }
0x1113   :  { %3452 = vrcp.f32 %v1965_v3 }
0x1114   :  { %3454 = vtanh.f32 %v1957_v57 }
0x1115   :  { %3456 = vtanh.f32 %v1956_v56 }
0x111c   :  { %v3451_v48 = vpop.eup %3450 }
0x111d   :  { %v3453_v5 = vpop.eup %3452  ;;  %1978 = vrot.lane.b32.xlu1 %v3451_v48, %s3631_s14 }
0x111e   :  { %1973 = vrot.lane.b32.xlu0 %v3453_v5, %s3632_s15  ;;  %v3455_v6 = vpop.eup %3454 }
0x111f   :  { %v3457_v7 = vpop.eup %3456 }
0x1121   :  { %1987 = vrot.lane.b32.xlu1 %v3455_v6, %s3631_s14 }
0x1122   :  { %1983 = vrot.lane.b32.xlu0 %v3457_v7, %s3630_s3  ;;  %v2170_v7 = vld [vmem:[#allocation2 + $0x8] sm:$0xc0] }
0x1125   :  { %1994 = vrot.lane.b32.xlu1 %v3453_v5, %s3630_s3 }
0x1126   :  { %1991 = vrot.lane.b32.xlu0 %v3451_v48, %s3632_s15 }
0x118f   :  { %v1979_v59 = vpop.permute.xlu1 %1978 }
0x1190   :  { %v1974_v10 = vpop.permute.xlu0 %1973  ;;  %v1981_v11 = vsel %vm296_vm1, %v1979_v59, %v3453_v5  ;;  %v2169_v59 = vld [vmem:[#allocation2 + $0x10] sm:$0x3] }
0x1191   :  { %v1976_v46 = vsel %vm296_vm1, %v3451_v48, %v1974_v10  ;;  %v2001_v18 = vmul.f32 %v1999_v15, %v1981_v11  ;;  %v2262_v11 = vrot.slane %v2170_v7, 6 }
0x1193   :  { %v1988_v14 = vpop.permute.xlu1 %1987 }
0x1194   :  { %v1984_v19 = vpop.permute.xlu0 %1983 }
0x1195   :  { %v1990_v16 = vsel %vm296_vm1, %v1984_v19, %v1988_v14 }
0x1196   :  { %v2002_v8 = vmul.f32 %v1990_v16, %v1976_v46 }
0x1197   :  { %v1995_v23 = vpop.permute.xlu1 %1994 }
0x1198   :  { %v2003_v21 = vadd.f32 %v2002_v8, %v2001_v18  ;;  %v1992_v24 = vpop.permute.xlu0 %1991 }
0x1199   :  { %v1997_v27 = vsel %vm296_vm1, %v1992_v24, %v1995_v23 }
0x119a   :  { %3458 = vtanh.f32 %v2003_v21  ;;  %v2156_v54 = vrot.slane %v2003_v21, 6 }
0x11a4   :  { %v3459_v26 = vpop.eup %3458 }
0x11a5   :  { %v4118_v30 = vmul.f32 %v3459_v26, %v1997_v27 }
0x11a7   :  { %2006 = vst.msk [vmem:[#allocation3] sm:$0x30] %vm639_vm5, %v4118_v30  ;;  %v2030_v31 = vrot.slane %v4118_v30, 4 }
0x11a9   :  { %2955 = vmatmul.mubr.msk.f32.vlgmr.msra.gmra.mrb[14].mxu1 %vm198_vm3, %v2030_v31 }
0x11aa   :  { %3233 = vmatpush1.bf16.msra.mxu1 %v3999_v50  ;;  %2404 = vmatprep.mubr.f32.mxu1 %v3629_v0 }
0x11ab   :  { %3235 = vmatprep.subr.bf16.mxu1 %v4003_v25 }
0x11ae   :  { %3237 = vmatpush1.bf16.msra.mxu1 %v4007_v1 }
0x11af   :  { %3239 = vmatprep.subr.bf16.mxu1 %v4009_v4 }
0x11b2   :  { %3241 = vmatpush1.bf16.msra.mxu1 %v4014_v22 }
0x11b3   :  { %3243 = vmatprep.subr.bf16.mxu1 %v4016_v62 }
0x11b6   :  { %3245 = vmatpush1.bf16.msra.mxu1 %v4019_v13 }
0x127c   :  { %v2099_v36 = vpop.f32.mrb[14].mxu1 }
0x127d   :  { %v2109_v12 = vrot.slane %v2099_v36, 2  ;;  %v2101_v39 = vpop.f32.mrb[15].mxu1 }
0x127e   :  { %v2110_v20 = vrot.slane %v2101_v39, 2 }
0x127f   :  { %v2113_v41 = vadd.f32 %v2109_v12, %v2012_v40 }
0x1280   :  { %v2114_v28 = vadd.f32 %v2110_v20, %v2105_v17 }
0x1281   :  { %v2956_v29 = vmul.f32 -1.442695, %v2113_v41 }
0x1282   :  { %v2957_v32 = vmul.f32 -1.442695, %v2114_v28 }
0x1283   :  { %3460 = vpow2.f32 %v2956_v29  ;;  %v2321_v29 = vld [vmem:[#allocation2 + $0x8] sm:$0x30] }
0x1284   :  { %3462 = vpow2.f32 %v2957_v32 }
0x128d   :  { %v3461_v35 = vpop.eup %3460 }
0x128e   :  { %v3463_v42 = vpop.eup %3462  ;;  %v2121_v34 = vadd.f32 1.0, %v3461_v35 }
0x128f   :  { %v2122_v37 = vadd.f32 1.0, %v3463_v42 }
0x1290   :  { %3464 = vrcp.f32 %v2121_v34  ;;  %v2320_v34 = vld [vmem:[#allocation2 + $0x10] sm:$0xc] }
0x1291   :  { %3466 = vrcp.f32 %v2122_v37  ;;  %v2412_v37 = vrot.slane %v2321_v29, 2  ;;  %v2640_v29 = vld [vmem:[#allocation10 + $0x28] sm:$0xff] }
0x1292   :  { %3468 = vtanh.f32 %v2114_v28 }
0x1293   :  { %3470 = vtanh.f32 %v2113_v41 }
0x129a   :  { %v3465_v43 = vpop.eup %3464 }
0x129b   :  { %v3467_v44 = vpop.eup %3466  ;;  %2135 = vrot.lane.b32.xlu1 %v3465_v43, %s3631_s14 }
0x129c   :  { %2130 = vrot.lane.b32.xlu0 %v3467_v44, %s3632_s15  ;;  %v3469_v38 = vpop.eup %3468 }
0x129d   :  { %v3471_v47 = vpop.eup %3470 }
0x129f   :  { %2144 = vrot.lane.b32.xlu1 %v3469_v38, %s3631_s14 }
0x12a0   :  { %2140 = vrot.lane.b32.xlu0 %v3471_v47, %s3630_s3 }
0x12a3   :  { %2151 = vrot.lane.b32.xlu1 %v3467_v44, %s3630_s3 }
0x12a4   :  { %2148 = vrot.lane.b32.xlu0 %v3465_v43, %s3632_s15 }
0x130d   :  { %v2136_v49 = vpop.permute.xlu1 %2135 }
0x130e   :  { %v2131_v51 = vpop.permute.xlu0 %2130  ;;  %v2138_v52 = vsel %vm296_vm1, %v2136_v49, %v3467_v44 }
0x130f   :  { %v2133_v56 = vsel %vm296_vm1, %v3465_v43, %v2131_v51  ;;  %v2158_v58 = vmul.f32 %v2156_v54, %v2138_v52 }
0x1311   :  { %v2145_v53 = vpop.permute.xlu1 %2144 }
0x1312   :  { %v2141_v55 = vpop.permute.xlu0 %2140 }
0x1313   :  { %v2147_v57 = vsel %vm296_vm1, %v2141_v55, %v2145_v53 }
0x1314   :  { %v2159_v60 = vmul.f32 %v2147_v57, %v2133_v56 }
0x1315   :  { %v2152_v63 = vpop.permute.xlu1 %2151 }
0x1316   :  { %v2160_v61 = vadd.f32 %v2159_v60, %v2158_v58  ;;  %v2149_v2 = vpop.permute.xlu0 %2148 }
0x1317   :  { %v2154_v48 = vsel %vm296_vm1, %v2149_v2, %v2152_v63 }
0x1318   :  { %3472 = vtanh.f32 %v2160_v61  ;;  %v2307_v26 = vrot.slane %v2160_v61, 6 }
0x1322   :  { %v3473_v3 = vpop.eup %3472 }
0x1323   :  { %v4142_v5 = vmul.f32 %v3473_v3, %v2154_v48 }
0x1325   :  { %2163 = vst.msk [vmem:[#allocation3] sm:$0xc0] %vm797_vm6, %v4142_v5  ;;  %v2187_v6 = vrot.slane %v4142_v5, 6 }
0x1327   :  { %2958 = vmatmul.mubr.msk.f32.vlgmr.msra.gmra.mrb[16].mxu0 %vm198_vm3, %v2187_v6 }
0x1328   :  { %3249 = vmatpush1.bf16.msra.mxu0 %v3999_v50  ;;  %2561 = vmatprep.mubr.f32.mxu0 %v3629_v0 }
0x1329   :  { %3251 = vmatprep.subr.bf16.mxu0 %v4003_v25 }
0x132c   :  { %3253 = vmatpush1.bf16.msra.mxu0 %v4007_v1 }
0x132d   :  { %3255 = vmatprep.subr.bf16.mxu0 %v4009_v4 }
0x1330   :  { %3257 = vmatpush1.bf16.msra.mxu0 %v4014_v22 }
0x1331   :  { %3259 = vmatprep.subr.bf16.mxu0 %v4016_v62 }
0x1334   :  { %3261 = vmatpush1.bf16.msra.mxu0 %v4019_v13 }
0x13fa   :  { %v2256_v10 = vpop.f32.mrb[16].mxu0 }
0x13fb   :  { %v2264_v14 = vadd.f32 %v2256_v10, %v2169_v59  ;;  %v2258_v50 = vpop.f32.mrb[17].mxu0 }
0x13fc   :  { %v2265_v15 = vadd.f32 %v2262_v11, %v2258_v50 }
0x13fd   :  { %v2959_v19 = vmul.f32 -1.442695, %v2264_v14 }
0x13fe   :  { %v2960_v46 = vmul.f32 -1.442695, %v2265_v15 }
0x13ff   :  { %3474 = vpow2.f32 %v2959_v19 }
0x1400   :  { %3476 = vpow2.f32 %v2960_v46 }
0x1409   :  { %v3475_v25 = vpop.eup %3474 }
0x140a   :  { %v3477_v1 = vpop.eup %3476  ;;  %v2272_v4 = vadd.f32 1.0, %v3475_v25  ;;  %v2477_v25 = vld [vmem:[#allocation2 + $0x8] sm:$0xc] }
0x140b   :  { %v2273_v16 = vadd.f32 1.0, %v3477_v1 }
0x140c   :  { %3478 = vrcp.f32 %v2272_v4 }
0x140d   :  { %3480 = vrcp.f32 %v2273_v16 }
0x140e   :  { %3482 = vtanh.f32 %v2265_v15 }
0x140f   :  { %3484 = vtanh.f32 %v2264_v14 }
0x1416   :  { %v3479_v22 = vpop.eup %3478 }
0x1417   :  { %v3481_v62 = vpop.eup %3480  ;;  %2286 = vrot.lane.b32.xlu1 %v3479_v22, %s3631_s14 }
0x1418   :  { %2281 = vrot.lane.b32.xlu0 %v3481_v62, %s3632_s15  ;;  %v3483_v13 = vpop.eup %3482 }
0x1419   :  { %v3485_v18 = vpop.eup %3484 }
0x141b   :  { %2295 = vrot.lane.b32.xlu1 %v3483_v13, %s3631_s14 }
0x141c   :  { %2291 = vrot.lane.b32.xlu0 %v3485_v18, %s3630_s3 }
0x141f   :  { %2302 = vrot.lane.b32.xlu1 %v3481_v62, %s3630_s3 }
0x1420   :  { %2299 = vrot.lane.b32.xlu0 %v3479_v22, %s3632_s15 }
0x1489   :  { %v2287_v8 = vpop.permute.xlu1 %2286 }
0x148a   :  { %v2282_v21 = vpop.permute.xlu0 %2281  ;;  %v2289_v23 = vsel %vm296_vm1, %v2287_v8, %v3481_v62  ;;  %v2569_v62 = vrot.slane %v2477_v25, 6 }
0x148b   :  { %v2284_v31 = vsel %vm296_vm1, %v3479_v22, %v2282_v21  ;;  %v2309_v36 = vmul.f32 %v2307_v26, %v2289_v23  ;;  %v2476_v22 = vld [vmem:[#allocation2 + $0x10] sm:$0x30] }
0x148d   :  { %v2296_v24 = vpop.permute.xlu1 %2295 }
0x148e   :  { %v2292_v27 = vpop.permute.xlu0 %2291 }
0x148f   :  { %v2298_v33 = vsel %vm296_vm1, %v2292_v27, %v2296_v24 }
0x1490   :  { %v2310_v12 = vmul.f32 %v2298_v33, %v2284_v31  ;;  %v2636_v33 = vld [vmem:[#allocation10 + $0x8] sm:$0xff] }
0x1491   :  { %v2303_v40 = vpop.permute.xlu1 %2302 }
0x1492   :  { %v2311_v39 = vadd.f32 %v2310_v12, %v2309_v36  ;;  %v2300_v17 = vpop.permute.xlu0 %2299  ;;  %v2638_v36 = vld [vmem:[#allocation10 + $0x18] sm:$0xff] }
0x1493   :  { %v2305_v41 = vsel %vm296_vm1, %v2300_v17, %v2303_v40  ;;  %v3262_v12 = vpack.c.bf16 %v2638_v36, %v2636_v33  ;;  %v2637_v40 = vld [vmem:[#allocation10 + $0x10] sm:$0xff] }
0x1494   :  { %3486 = vtanh.f32 %v2311_v39  ;;  %v2463_v2 = vrot.slane %v2311_v39, 6  ;;  %v2635_v39 = vld [vmem:[#allocation10] sm:$0xff] }
0x1495   :  { %v3264_v17 = vpack.c.bf16 %v2637_v40, %v2635_v39  ;;  %3263 = vmatprep.subr.bf16.mxu1 %v3262_v12 }
0x149e   :  { %v3487_v20 = vpop.eup %3486 }
0x149f   :  { %v4166_v28 = vmul.f32 %v3487_v20, %v2305_v41 }
0x14a1   :  { %2314 = vst.msk [vmem:[#allocation3 + $0x8] sm:$0x3] %vm324_vm2, %v4166_v28  ;;  %2961 = vmatmul.mubr.msk.f32.vlgmr.msra.gmra.mrb[16].mxu1 %vm198_vm3, %v4166_v28 }
0x14a2   :  { %2718 = vmatprep.mubr.f32.mxu1 %v3629_v0  ;;  %3265 = vmatpush1.bf16.msra.mxu1 %v3264_v17 }
0x1574   :  { %v2406_v32 = vpop.f32.mrb[16].mxu1 }
0x1575   :  { %v2416_v35 = vrot.slane %v2406_v32, 6  ;;  %v2408_v42 = vpop.f32.mrb[17].mxu1  ;;  %v2642_v32 = vld [vmem:[#allocation10 + $0x38] sm:$0xff] }
0x1576   :  { %v2417_v43 = vrot.slane %v2408_v42, 6  ;;  %v2639_v42 = vld [vmem:[#allocation10 + $0x20] sm:$0xff] }
0x1577   :  { %v2420_v44 = vadd.f32 %v2416_v35, %v2320_v34  ;;  %v3266_v35 = vpack.c.bf16 %v2642_v32, %v2640_v29  ;;  %v2641_v34 = vld [vmem:[#allocation10 + $0x30] sm:$0xff] }
0x1578   :  { %v2421_v38 = vadd.f32 %v2417_v43, %v2412_v37  ;;  %v3268_v37 = vpack.c.bf16 %v2641_v34, %v2639_v42 }
0x1579   :  { %v2962_v47 = vmul.f32 -1.442695, %v2420_v44  ;;  %3267 = vmatprep.subr.bf16.mxu1 %v3266_v35 }
0x157a   :  { %v2963_v49 = vmul.f32 -1.442695, %v2421_v38  ;;  %3269 = vmatpush1.bf16.msra.mxu1 %v3268_v37 }
0x157b   :  { %3488 = vpow2.f32 %v2962_v47  ;;  %v2646_v47 = vld [vmem:[#allocation10 + $0x58] sm:$0xff] }
0x157c   :  { %3490 = vpow2.f32 %v2963_v49 }
0x1585   :  { %v3489_v51 = vpop.eup %3488 }
0x1586   :  { %v3491_v52 = vpop.eup %3490  ;;  %v2428_v53 = vadd.f32 1.0, %v3489_v51  ;;  %v2643_v51 = vld [vmem:[#allocation10 + $0x40] sm:$0xff] }
0x1587   :  { %v2429_v54 = vadd.f32 1.0, %v3491_v52  ;;  %v2645_v52 = vld [vmem:[#allocation10 + $0x50] sm:$0xff] }
0x1588   :  { %3492 = vrcp.f32 %v2428_v53  ;;  %v3272_v53 = vpack.c.bf16 %v2645_v52, %v2643_v51 }
0x1589   :  { %3494 = vrcp.f32 %v2429_v54  ;;  %v2648_v54 = vld [vmem:[#allocation10 + $0x68] sm:$0xff] }
0x158a   :  { %3496 = vtanh.f32 %v2421_v38  ;;  %v2644_v38 = vld [vmem:[#allocation10 + $0x48] sm:$0xff] }
0x158b   :  { %3498 = vtanh.f32 %v2420_v44  ;;  %v3270_v49 = vpack.c.bf16 %v2646_v47, %v2644_v38 }
0x158d   :  { %3271 = vmatprep.subr.bf16.mxu1 %v3270_v49 }
0x158e   :  { %3273 = vmatpush1.bf16.msra.mxu1 %v3272_v53 }
0x1592   :  { %v3493_v0 = vpop.eup %3492 }
0x1593   :  { %v3495_v55 = vpop.eup %3494  ;;  %2442 = vrot.lane.b32.xlu1 %v3493_v0, %s3631_s14 }
0x1594   :  { %2437 = vrot.lane.b32.xlu0 %v3495_v55, %s3632_s15  ;;  %v3497_v56 = vpop.eup %3496 }
0x1595   :  { %v3499_v57 = vpop.eup %3498 }
0x1597   :  { %2451 = vrot.lane.b32.xlu1 %v3497_v56, %s3631_s14  ;;  %v2647_v56 = vld [vmem:[#allocation10 + $0x60] sm:$0xff] }
0x1598   :  { %2447 = vrot.lane.b32.xlu0 %v3499_v57, %s3630_s3  ;;  %v2649_v57 = vld [vmem:[#allocation10 + $0x70] sm:$0xff] }
0x159b   :  { %2458 = vrot.lane.b32.xlu1 %v3495_v55, %s3630_s3 }
0x159c   :  { %2455 = vrot.lane.b32.xlu0 %v3493_v0, %s3632_s15 }
0x1605   :  { %v2443_v58 = vpop.permute.xlu1 %2442 }
0x1606   :  { %v2438_v60 = vpop.permute.xlu0 %2437  ;;  %v2445_v61 = vsel %vm296_vm1, %v2443_v58, %v3495_v55  ;;  %v3276_v58 = vpack.c.bf16 %v2649_v57, %v2647_v56  ;;  %v2807_v57 = vld [vmem:[%s4292_s7 + $0x18] sm:$0xff] }
0x1607   :  { %v2440_v48 = vsel %vm296_vm1, %v3493_v0, %v2438_v60  ;;  %v2465_v7 = vmul.f32 %v2463_v2, %v2445_v61  ;;  %v2650_v0 = vld [vmem:[#allocation10 + $0x78] sm:$0xff] }
0x1608   :  { %v3274_v55 = vpack.c.bf16 %v2650_v0, %v2648_v54  ;;  %v2804_v54 = vld [vmem:[%s4292_s7] sm:$0xff]  ;;  %v2805_v0 = vld [vmem:[%s4292_s7 + $0x8] sm:$0xff] }
0x1609   :  { %v2452_v63 = vpop.permute.xlu1 %2451  ;;  %v3278_v56 = vpack.c.bf16 %v2805_v0, %v2804_v54 }
0x160a   :  { %v2448_v3 = vpop.permute.xlu0 %2447  ;;  %3275 = vmatprep.subr.bf16.mxu1 %v3274_v55  ;;  %v2806_v55 = vld [vmem:[%s4292_s7 + $0x10] sm:$0xff] }
0x160b   :  { %v2454_v6 = vsel %vm296_vm1, %v2448_v3, %v2452_v63  ;;  %3277 = vmatpush1.bf16.msra.mxu1 %v3276_v58  ;;  %3279 = vmatprep.subr.bf16.mxu0 %v3278_v56 }
0x160c   :  { %v2466_v59 = vmul.f32 %v2454_v6, %v2440_v48 }
0x160d   :  { %v2459_v11 = vpop.permute.xlu1 %2458 }
0x160e   :  { %v4182_v10 = vadd.f32 %v2466_v59, %v2465_v7  ;;  %v2456_v14 = vpop.permute.xlu0 %2455 }
0x160f   :  { %v2461_v15 = vsel %vm296_vm1, %v2456_v14, %v2459_v11 }
0x1610   :  { %3500 = vtanh.f32 %v4182_v10  ;;  %v2620_v3 = vrot.slane %v4182_v10, 6  ;;  %v2634_v10 = vld [vmem:[#allocation2 + $0x8] sm:$0x3] }
0x161a   :  { %v3501_v50 = vpop.eup %3500 }
0x161b   :  { %v4186_v19 = vmul.f32 %v3501_v50, %v2461_v15 }
0x161d   :  { %2470 = vst.msk [vmem:[#allocation3 + $0x8] sm:$0xc] %vm481_vm4, %v4186_v19  ;;  %v2494_v46 = vrot.slane %v4186_v19, 2 }
0x161f   :  { %2964 = vmatmul.mubr.msk.f32.vlgmr.msra.gmra.mrb[18].mxu0 %vm198_vm3, %v2494_v46 }
0x1620   :  { %3281 = vmatpush3.bf16.msra.mxu0 %v3278_v56 }
0x16f2   :  { %v2563_v1 = vpop.f32.mrb[18].mxu0 }
0x16f3   :  { %v2573_v4 = vrot.slane %v2563_v1, 4  ;;  %v2565_v16 = vpop.f32.mrb[19].mxu0 }
0x16f4   :  { %v2574_v13 = vrot.slane %v2565_v16, 4 }
0x16f5   :  { %v2577_v18 = vadd.f32 %v2573_v4, %v2476_v22 }
0x16f6   :  { %v2578_v8 = vadd.f32 %v2574_v13, %v2569_v62  ;;  %v2633_v13 = vld [vmem:[#allocation2 + $0x10] sm:$0xc0] }
0x16f7   :  { %v2965_v21 = vmul.f32 -1.442695, %v2577_v18 }
0x16f8   :  { %v2966_v23 = vmul.f32 -1.442695, %v2578_v8 }
0x16f9   :  { %3502 = vpow2.f32 %v2965_v21 }
0x16fa   :  { %3504 = vpow2.f32 %v2966_v23 }
0x1703   :  { %v3503_v24 = vpop.eup %3502 }
0x1704   :  { %v3505_v26 = vpop.eup %3504  ;;  %v2585_v27 = vadd.f32 1.0, %v3503_v24 }
0x1705   :  { %v2586_v31 = vadd.f32 1.0, %v3505_v26 }
0x1706   :  { %3506 = vrcp.f32 %v2585_v27 }
0x1707   :  { %3508 = vrcp.f32 %v2586_v31 }
0x1708   :  { %3510 = vtanh.f32 %v2578_v8 }
0x1709   :  { %3512 = vtanh.f32 %v2577_v18  ;;  %v2726_v18 = vrot.slane %v2634_v10, 2 }
0x1710   :  { %v3507_v20 = vpop.eup %3506 }
0x1711   :  { %v3509_v41 = vpop.eup %3508  ;;  %2599 = vrot.lane.b32.xlu1 %v3507_v20, %s3631_s14 }
0x1712   :  { %2594 = vrot.lane.b32.xlu0 %v3509_v41, %s3632_s15  ;;  %v3511_v43 = vpop.eup %3510 }
0x1713   :  { %v3513_v44 = vpop.eup %3512 }
0x1715   :  { %2608 = vrot.lane.b32.xlu1 %v3511_v43, %s3631_s14 }
0x1716   :  { %2604 = vrot.lane.b32.xlu0 %v3513_v44, %s3630_s3 }
0x1719   :  { %2615 = vrot.lane.b32.xlu1 %v3509_v41, %s3630_s3 }
0x171a   :  { %2612 = vrot.lane.b32.xlu0 %v3507_v20, %s3632_s15 }
0x1783   :  { %v2600_v60 = vpop.permute.xlu1 %2599 }
0x1784   :  { %v2595_v61 = vpop.permute.xlu0 %2594  ;;  %v2602_v63 = vsel %vm296_vm1, %v2600_v60, %v3509_v41  ;;  %v3282_v60 = vpack.c.bf16 %v2807_v57, %v2806_v55 }
0x1785   :  { %v2597_v6 = vsel %vm296_vm1, %v3507_v20, %v2595_v61  ;;  %v2622_v59 = vmul.f32 %v2620_v3, %v2602_v63  ;;  %v2808_v61 = vld [vmem:[%s4292_s7 + $0x20] sm:$0xff]  ;;  %v2809_v63 = vld [vmem:[%s4292_s7 + $0x28] sm:$0xff]  ;;  %v2810_v3 = vld [vmem:[%s4292_s7 + $0x30] sm:$0xff] }
0x1786   :  { %3283 = vmatprep.subr.bf16.mxu0 %v3282_v60 }
0x1787   :  { %v2609_v2 = vpop.permute.xlu1 %2608  ;;  %3285 = vmatpush3.bf16.msra.mxu0 %v3282_v60 }
0x1788   :  { %v2605_v48 = vpop.permute.xlu0 %2604 }
0x1789   :  { %v2611_v7 = vsel %vm296_vm1, %v2605_v48, %v2609_v2  ;;  %v3286_v2 = vpack.c.bf16 %v2809_v63, %v2808_v61  ;;  %v2811_v48 = vld [vmem:[%s4292_s7 + $0x38] sm:$0xff] }
0x178a   :  { %v2623_v11 = vmul.f32 %v2611_v7, %v2597_v6  ;;  %v3290_v6 = vpack.c.bf16 %v2811_v48, %v2810_v3 }
0x178b   :  { %v2616_v50 = vpop.permute.xlu1 %2615  ;;  %3287 = vmatprep.subr.bf16.mxu0 %v3286_v2 }
0x178c   :  { %v2624_v14 = vadd.f32 %v2623_v11, %v2622_v59  ;;  %v2613_v15 = vpop.permute.xlu0 %2612  ;;  %3289 = vmatpush3.bf16.msra.mxu0 %v3286_v2 }
0x178d   :  { %v2618_v25 = vsel %vm296_vm1, %v2613_v15, %v2616_v50  ;;  %3291 = vmatprep.subr.bf16.mxu0 %v3290_v6  ;;  %v2790_v50 = vld [vmem:[#allocation3] sm:$0xff] }
0x178e   :  { %3514 = vtanh.f32 %v2624_v14 }
0x1790   :  { %3293 = vmatpush3.bf16.msra.mxu0 %v3290_v6 }
0x1798   :  { %v3515_v46 = vpop.eup %3514 }
0x1799   :  { %v2626_v1 = vmul.f32 %v3515_v46, %v2618_v25 }
0x179b   :  { %2627 = vst.msk [vmem:[#allocation3 + $0x8] sm:$0x30] %vm639_vm5, %v2626_v1  ;;  %v2651_v4 = vrot.slane %v2626_v1, 4 }
0x179d   :  { %2967 = vmatmul.mubr.msk.f32.vlgmr.msra.gmra.mrb[18].mxu1 %vm198_vm3, %v2651_v4  ;;  %v2970_v4 = vld [vmem:[%s4293_s8] ss:$0 sm:$0xff] }
0x1870   :  { %v2720_v16 = vpop.f32.mrb[18].mxu1 }
0x1871   :  { %v2730_v22 = vrot.slane %v2720_v16, 2  ;;  %v2722_v62 = vpop.f32.mrb[19].mxu1 }
0x1872   :  { %v2731_v8 = vrot.slane %v2722_v62, 2 }
0x1873   :  { %v2734_v21 = vadd.f32 %v2730_v22, %v2633_v13 }
0x1874   :  { %v2735_v23 = vadd.f32 %v2731_v8, %v2726_v18 }
0x1875   :  { %v2968_v24 = vmul.f32 -1.442695, %v2734_v21 }
0x1876   :  { %v2969_v26 = vmul.f32 -1.442695, %v2735_v23 }
0x1877   :  { %3516 = vpow2.f32 %v2968_v24 }
0x1878   :  { %3518 = vpow2.f32 %v2969_v26 }
0x1881   :  { %v3517_v27 = vpop.eup %3516 }
0x1882   :  { %v3519_v31 = vpop.eup %3518  ;;  %v2742_v33 = vadd.f32 1.0, %v3517_v27 }
0x1883   :  { %v2743_v36 = vadd.f32 1.0, %v3519_v31 }
0x1884   :  { %3520 = vrcp.f32 %v2742_v33 }
0x1885   :  { %3522 = vrcp.f32 %v2743_v36 }
0x1886   :  { %3524 = vtanh.f32 %v2735_v23 }
0x1887   :  { %3526 = vtanh.f32 %v2734_v21 }
0x188e   :  { %v3521_v12 = vpop.eup %3520 }
0x188f   :  { %v3523_v39 = vpop.eup %3522  ;;  %2756 = vrot.lane.b32.xlu1 %v3521_v12, %s3631_s14 }
0x1890   :  { %2751 = vrot.lane.b32.xlu0 %v3523_v39, %s3632_s15  ;;  %v3525_v40 = vpop.eup %3524 }
0x1891   :  { %v3527_v17 = vpop.eup %3526 }
0x1893   :  { %2765 = vrot.lane.b32.xlu1 %v3525_v40, %s3631_s14 }
0x1894   :  { %2761 = vrot.lane.b32.xlu0 %v3527_v17, %s3630_s3 }
0x1897   :  { %2772 = vrot.lane.b32.xlu1 %v3523_v39, %s3630_s3 }
0x1898   :  { %2769 = vrot.lane.b32.xlu0 %v3521_v12, %s3632_s15 }
0x189b   :  { %2472 = vrot.lane.b32.xlu1 %v4186_v19, %s3631_s14  ;;  %v2777_v19 = vrot.slane %v2624_v14, 6 }
0x189c   :  { %2316 = vrot.lane.b32.xlu0 %v4166_v28, %s3631_s14 }
0x189f   :  { %1851 = vrot.lane.b32.xlu1 %v4093_v45, %s3631_s14 }
0x18a0   :  { %2629 = vrot.lane.b32.xlu0 %v2626_v1, %s3631_s14 }
0x18a4   :  { %1695 = vrot.lane.b32.xlu0 %v4068_v9, %s3631_s14 }
0x18a8   :  { %2008 = vrot.lane.b32.xlu0 %v4118_v30, %s3631_s14 }
0x1901   :  { %v2757_v20 = vpop.permute.xlu1 %2756 }
0x1902   :  { %v2752_v41 = vpop.permute.xlu0 %2751  ;;  %v2759_v29 = vsel %vm296_vm1, %v2757_v20, %v3523_v39 }
0x1903   :  { %v2754_v28 = vsel %vm296_vm1, %v3521_v12, %v2752_v41  ;;  %v2779_v45 = vmul.f32 %v2777_v19, %v2759_v29 }
0x1905   :  { %v2766_v32 = vpop.permute.xlu1 %2765 }
0x1906   :  { %v2762_v35 = vpop.permute.xlu0 %2761 }
0x1907   :  { %v2768_v42 = vsel %vm296_vm1, %v2762_v35, %v2766_v32 }
0x1908   :  { %v2780_v34 = vmul.f32 %v2768_v42, %v2754_v28 }
0x1909   :  { %v2773_v37 = vpop.permute.xlu1 %2772 }
0x190a   :  { %v2781_v43 = vadd.f32 %v2780_v34, %v2779_v45  ;;  %v2770_v44 = vpop.permute.xlu0 %2769 }
0x190b   :  { %v2775_v51 = vsel %vm296_vm1, %v2770_v44, %v2773_v37 }
0x190c   :  { %3528 = vtanh.f32 %v2781_v43 }
0x190d   :  { %v2473_v9 = vpop.permute.xlu1 %2472 }
0x190e   :  { %2475 = vst.msk [vmem:[#allocation4 + $0x2] sm:$0xc] %vm481_vm4, %v2473_v9  ;;  %v2317_v30 = vpop.permute.xlu0 %2316 }
0x190f   :  { %2319 = vst.msk [vmem:[#allocation4 + $0x6] sm:$0x3] %vm324_vm2, %v2317_v30 }
0x1911   :  { %v1852_v38 = vpop.permute.xlu1 %1851 }
0x1912   :  { %1854 = vst.msk [vmem:[#allocation4 + $0xa] sm:$0xc] %vm481_vm4, %v1852_v38  ;;  %v2630_v47 = vpop.permute.xlu0 %2629 }
0x1913   :  { %2632 = vst.msk [vmem:[#allocation4 - $0x2] sm:$0x30] %vm639_vm5, %v2630_v47 }
0x1916   :  { %v3529_v49 = vpop.eup %3528  ;;  %v1696_v52 = vpop.permute.xlu0 %1695 }
0x1917   :  { %v2783_v53 = vmul.f32 %v3529_v49, %v2775_v51  ;;  %1698 = vst.msk [vmem:[#allocation4 + $0xe] sm:$0x3] %vm324_vm2, %v1696_v52 }
0x1919   :  { %2784 = vst.msk [vmem:[#allocation3 + $0x8] sm:$0xc0] %vm797_vm6, %v2783_v53  ;;  %2786 = vrot.lane.b32.xlu1 %v2783_v53, %s3631_s14 }
0x191a   :  { %v2009_v58 = vpop.permute.xlu0 %2008 }
0x191b   :  { %2011 = vst.msk [vmem:[#allocation4 + $0x6] sm:$0x30] %vm639_vm5, %v2009_v58 }
0x191d   :  { %2165 = vrot.lane.b32.xlu1 %v4142_v5, %s3631_s14 }
0x1920   :  { %v2791_v25 = vld [vmem:[#allocation3 + $0x8] sm:$0xff] }
0x198b   :  { %v2787_v7 = vpop.permute.xlu1 %2786 }
0x198c   :  { %2789 = vst.msk [vmem:[#allocation4 - $0x6] sm:$0xc0] %vm797_vm6, %v2787_v7 }
0x198f   :  { %v2166_v5 = vpop.permute.xlu1 %2165 }
0x1990   :  { %2168 = vst.msk [vmem:[#allocation4 + $0x2] sm:$0xc0] %vm797_vm6, %v2166_v5 }
0x1993   :  { %v2792_v59 = vld [vmem:[#allocation4] sm:$0xff] }
0x1994   :  { %2796 = vrot.lane.b32.xlu0 %v2792_v59, %s3632_s15 }
0x1997   :  { %v2793_v11 = vld [vmem:[#allocation4 + $0x8] sm:$0xff] }
0x1998   :  { %2798 = vrot.lane.b32.xlu1 %v2793_v11, %s3632_s15 }
0x1a06   :  { %v2797_v14 = vpop.permute.xlu0 %2796 }
0x1a07   :  { %v2802_v15 = vsel %vm296_vm1, %v2790_v50, %v2797_v14 }
0x1a08   :  { %2999 = vmatprep.mubr.msk.f32.mxu0 %vm198_vm3, %v2802_v15 }
0x1a0a   :  { %v2799_v46 = vpop.permute.xlu1 %2798 }
0x1a0b   :  { %v2803_v1 = vsel %vm296_vm1, %v2791_v25, %v2799_v46 }
0x1a0c   :  { %3000 = vmatmul.mubr.msk.f32.vlgmr.msra.gmra.mrb[20].mxu0 %vm198_vm3, %v2803_v1 }
0x1adf   :  { %v3001_v10 = vpop.f32.mrb[20].mxu0 }
0x1ae0   :  { %v2897_v16 = vadd.f32 %v3001_v10, %v2970_v4  ;;  %v2891_v22 = vpop.f32.mrb[21].mxu0 }
0x1ae1   :  { %v2892_v62 = vadd.f32 %v2970_v4, %v2891_v22 }
0x1ae2   :  { %2901 = vst.msk [vmem:[#allocation11 + $0x8] sm:$0xff] %vm296_vm1, %v2897_v16 }
0x1ae3   :  { %2900 = vst.msk [vmem:[#allocation11] sm:$0xff] %vm296_vm1, %v2892_v62 }
0x1ae4   :  { %3607 = shalt.err (!%p3604_p0)
}
0x1ae5   :  { %s3608_s0 = scalar_lea.hbm %s4294_s9, 256 }
0x1ae6   :  { %p3609_p1 = scmp.ne.s32.totalorder %s4294_s9, %s3608_s0  ;;  %p3612_p2 = scmp.lt.u32.totalorder %s3608_s0, %s4294_s9 }
0x1ae8   :  { %p3614_p3 = pnand %p3612_p2, %p3609_p1 }
0x1aea   :  { %3617 = shalt.err (!%p3614_p3)
}
0x1aeb   :  { %s3634_s16 = smov 128   ;;  %s3635_s17 = smov 8  }
0x1aec   :  { %2913 = dma.vmem_to_hbm [thread:$0]  %s2908_s13, 256, %s4294_s9, [#allocation7], %s3634_s16, %s3634_s16, %s3635_s17  }
0x1aed   :  { %3622 = dma.done.wait [#allocation7], 256  }
0x1aee   :  { %3623 = vsyncadd [#allocation7], 4294967040 }
0x1aef   :  { %2917 = vsyncpa [#allocation6], 1 }
0x1af0   :  { %2918 = vsyncpa [#allocation9], 1 }
0x1af1   :  { %2919 = vsyncpa [#allocation7], 1 }

</bundles_post_ra>
